<compile_context>
chip_gen: v7x
topology: tpu7x:2x2x1
jax: 0.10.0
libtpu: 0.0.40
codegen_flags: <defaults>
</compile_context>

<pallas_src>
import functools

import jax
import jax.numpy as jnp
from jax.experimental import pallas as pl
from jax.experimental.pallas import tpu as pltpu

BN_EPS = 1e-5
_KSIZE = 2
_SLOP = 8        # extra rows per pad buffer so the tap-1 (row + d) read stays in-bounds

# (Cin, Cout, dilation, padding=='same', maxpool kernel applied after stage)
_CFG = (
    (256, 128, 1, True, 3),
    (128, 32, 2, True, 2),
    (32, 64, 2, True, 1),
    (64, 128, 4, True, 1),
    (128, 256, 8, False, 1),
)


def _round_up(v, m):
    return ((v + m - 1) // m) * m


def _stage_geometry(l_in):
    """Static per-stage geometry (Python ints, resolved at trace time)."""
    geo = []
    l = l_in
    for cin, cout, d, same, pool in _CFG:
        if same:
            # PyTorch padding='same' for kernel=2: total = dilation,
            # left = total // 2, right = total - left.
            total = d * (_KSIZE - 1)
            pad_l = total // 2
        else:
            total = 0
            pad_l = 0
        l_pad = l + total
        l_out = l_pad - d * (_KSIZE - 1)
        geo.append(dict(cin=cin, cout=cout, d=d, pad_l=pad_l, l_in=l,
                        l_pad=l_pad, lpa=_round_up(l_pad, 8),
                        l_out=l_out, pool=pool))
        l = l_out // pool
    return geo


# ---------------------------------------------------------------------------
# Fused kernel: 5 x (Conv1d + BatchNorm1d + ReLU) + 2 x MaxPool1d
# ---------------------------------------------------------------------------
def _bottleneck_kernel(*refs, geo, n_batch):
    ns = len(geo)
    x_ref = refs[0]                       # (N, L0, Cin0) bf16
    w_refs = refs[1:1 + ns]               # per stage: (2*Cin, Cout) bf16, taps K-stacked
    p_refs = refs[1 + ns:1 + 2 * ns]      # per stage: (2, Cout) f32 = gamma / beta
    o_ref = refs[1 + 2 * ns]              # (N, L_final, Cout_final) f32
    scratch = refs[2 + 2 * ns:]
    pad_bufs = [scratch[2 * i + 0] for i in range(ns)]   # (N*lpa + SLOP, Cin) bf16
    y_bufs = [scratch[2 * i + 1] for i in range(ns)]     # (N*lpa, Cout) f32

    def _zero_pad_rows(buf, g):
        """Zero ONLY padding / alignment / slop rows (valid rows get overwritten)."""
        lpa, pad_l, l_in, cin = g["lpa"], g["pad_l"], g["l_in"], g["cin"]
        r_all = n_batch * lpa
        buf[pl.ds(r_all, _SLOP), :] = jnp.zeros((_SLOP, cin), jnp.bfloat16)
        tail = lpa - pad_l - l_in
        for nb in range(n_batch):
            base = nb * lpa
            if pad_l > 0:
                buf[pl.ds(base, pad_l), :] = jnp.zeros((pad_l, cin), jnp.bfloat16)
            if tail > 0:
                buf[pl.ds(base + pad_l + l_in, tail), :] = (
                    jnp.zeros((tail, cin), jnp.bfloat16))

    # ---- Stage-0 input staging: zero pad rows, copy each batch slab (bf16) ----
    g0 = geo[0]
    _zero_pad_rows(pad_bufs[0], g0)
    for nb in range(n_batch):
        pad_bufs[0][pl.ds(nb * g0["lpa"] + g0["pad_l"], g0["l_in"]), :] = x_ref[nb]

    for st, g in enumerate(geo):
        last = st == ns - 1
        lpa, d, l_out, cout = g["lpa"], g["d"], g["l_out"], g["cout"]
        r_all = n_batch * lpa
        pbuf, ybuf = pad_bufs[st], y_bufs[st]
        gamma = p_refs[st][0:1, :]
        beta = p_refs[st][1:2, :]

        # Conv1d(k=2, dilation=d) as ONE K-stacked MXU matmul (bf16 in, f32 acc):
        #   y[t] = [x_pad[t] | x_pad[t+d]] @ [W_tap0 ; W_tap1]
        # (conv bias omitted: it cancels exactly under batch-mean subtraction)
        xcat = jnp.concatenate(
            [pbuf[pl.ds(0, r_all), :], pbuf[pl.ds(d, r_all), :]], axis=-1)
        ybuf[...] = jnp.dot(xcat, w_refs[st][...],
                            preferred_element_type=jnp.float32)

        # BatchNorm batch statistics: single masked whole-buffer reduction.
        row = jax.lax.broadcasted_iota(jnp.int32, (r_all, 1), 0)
        valid = row < l_out
        for nb in range(1, n_batch):
            valid = valid | ((row >= nb * lpa) & (row < nb * lpa + l_out))
        yv = ybuf[...]
        ym = jnp.where(valid, yv, 0.0)
        s1 = jnp.sum(ym, axis=0, keepdims=True)
        s2 = jnp.sum(ym * ym, axis=0, keepdims=True)
        inv_cnt = 1.0 / float(n_batch * l_out)
        mean = s1 * inv_cnt
        var = jnp.maximum(s2 * inv_cnt - mean * mean, 0.0)   # biased batch var
        scale = gamma * jax.lax.rsqrt(var + BN_EPS)
        shift = beta - mean * scale

        # BN affine + ReLU applied densely to the whole buffer (one broadcast).
        ybuf[...] = jnp.maximum(yv * scale + shift, 0.0)

        # MaxPool over the already-activated buffer + handoff.
        k = g["pool"]
        l_pool = l_out // k
        if last:
            for nb in range(n_batch):
                o_ref[nb] = ybuf[pl.ds(nb * lpa, l_out), :].astype(o_ref.dtype)
        else:
            g_next = geo[st + 1]
            nxt = pad_bufs[st + 1]
            _zero_pad_rows(nxt, g_next)
            for nb in range(n_batch):
                if k > 1:
                    z = ybuf[pl.ds(nb * lpa, l_pool, stride=k), :]
                    for j in range(1, k):
                        z = jnp.maximum(
                            z, ybuf[pl.ds(nb * lpa + j, l_pool, stride=k), :])
                else:
                    z = ybuf[pl.ds(nb * lpa, l_out), :]
                nxt[pl.ds(nb * g_next["lpa"] + g_next["pad_l"], l_pool), :] = (
                    z.astype(jnp.bfloat16))


# ---------------------------------------------------------------------------
# Parameters + forward wrapper
# ---------------------------------------------------------------------------
def init_params(key):
    """Parameters in PyTorch layout: w (Cout, Cin, 2); b/gamma/beta (Cout,)."""
    params = []
    for cin, cout, _, _, _ in _CFG:
        key, k1, k2, k3, k4 = jax.random.split(key, 5)
        scale = 1.0 / jnp.sqrt(2.0 * cin)
        params.append(dict(
            w=jax.random.normal(k1, (cout, cin, 2), jnp.float32) * scale,
            b=jax.random.normal(k2, (cout,), jnp.float32) * 0.1,
            gamma=1.0 + 0.1 * jax.random.normal(k3, (cout,), jnp.float32),
            beta=0.1 * jax.random.normal(k4, (cout,), jnp.float32),
        ))
    return params


def prepare_kernel_params(params):
    """One-time conversion to kernel layout (kept out of the forward pass):
      * conv taps pre-transposed and K-stacked: (2*Cin, Cout) bf16
      * gamma/beta packed as (2, Cout) f32
    The conv bias is intentionally dropped: under training-mode BatchNorm a
    per-channel constant shifts the batch mean by the same amount and cancels
    exactly (variance unchanged), so the forward output is identical."""
    prepped = []
    for p in params:
        w = p["w"]                                            # (Cout, Cin, 2)
        w_cat = jnp.concatenate(
            [jnp.transpose(w[:, :, 0]), jnp.transpose(w[:, :, 1])],
            axis=0).astype(jnp.bfloat16)                      # (2*Cin, Cout)
        gb = jnp.stack([p["gamma"], p["beta"]],
                       axis=0).astype(jnp.float32)            # (2, Cout)
        prepped.append((w_cat, gb))
    return prepped


@jax.jit
def bottleneck_forward(x_ncl, kernel_params):
    n, _, l0 = x_ncl.shape
    geo = _stage_geometry(l0)
    # NCL -> NLC, cast once to bf16 (halves the stage-0 DMA and removes the
    # per-stage whole-buffer cast from the kernel).
    x_nlc = jnp.transpose(x_ncl, (0, 2, 1)).astype(jnp.bfloat16)

    scratch = []
    for g in geo:
        scratch.append(pltpu.VMEM((n * g["lpa"] + _SLOP, g["cin"]), jnp.bfloat16))
        scratch.append(pltpu.VMEM((n * g["lpa"], g["cout"]), jnp.float32))

    # Advisory cost estimate so XLA can schedule neighbours around the call.
    flops = int(sum(2 * n * g["l_out"] * (2 * g["cin"]) * g["cout"] for g in geo))
    bytes_accessed = int(
        x_nlc.size * 2
        + sum(kp[0].size * 2 + kp[1].size * 4 for kp in kernel_params)
        + n * geo[-1]["l_out"] * geo[-1]["cout"] * 4)
    cost = pl.CostEstimate(flops=flops,
                           transcendentals=int(sum(g["cout"] for g in geo)),
                           bytes_accessed=bytes_accessed)

    vspec = pl.BlockSpec(memory_space=pltpu.MemorySpace.VMEM)
    kern = functools.partial(_bottleneck_kernel, geo=geo, n_batch=n)
    out = pl.pallas_call(
        kern,
        out_shape=jax.ShapeDtypeStruct(
            (n, geo[-1]["l_out"], geo[-1]["cout"]), jnp.float32),
        in_specs=[vspec] * (1 + 2 * len(geo)),
        out_specs=vspec,
        scratch_shapes=scratch,
        cost_estimate=cost,
    )(x_nlc,
      *[kp[0] for kp in kernel_params],
      *[kp[1] for kp in kernel_params])
    # TODO(synk): weights could be prefetched via pl.ANY + pltpu.make_async_copy
    # to overlap the HBM->VMEM prologue with stage-0 compute; kept on auto-DMA
    # (with cost_estimate) to preserve the proven-clean single-call structure.
    # TODO(synk): v7x has 2 TensorCores; a per-channel (Cout) split of each
    # stage across cores is possible (BN stats partition per channel) but is
    # gated on profiling the per-stage barrier cost at these tiny sizes.
    return jnp.transpose(out, (0, 2, 1))                      # back to NCL


if __name__ == "__main__":
    key = jax.random.PRNGKey(0)
    key, pkey, xkey = jax.random.split(key, 3)
    params = init_params(pkey)
    kparams = prepare_kernel_params(params)

    # Input: (N=2, C=256, L=96). L=96 -> pool3 -> 32 -> pool2 -> 16 -> final
    # valid conv (dilation=8) -> 8.
    x = jax.random.normal(xkey, (2, 256, 96), jnp.float32)

    out = bottleneck_forward(x, kparams)
    jax.block_until_ready(out)
    assert out.shape == (2, 256, 8), out.shape
    assert bool(jnp.all(jnp.isfinite(out)))
    print("KERNEL_OK")
</pallas_src>

<mosaic_0001>
module attributes {stable_mosaic.version = 11 : i64} {
  func.func @_bottleneck_kernel(%arg0: memref<2x96x256xbf16, #tpu.memory_space<vmem>>, %arg1: memref<512x128xbf16, #tpu.memory_space<vmem>>, %arg2: memref<256x32xbf16, #tpu.memory_space<vmem>>, %arg3: memref<64x64xbf16, #tpu.memory_space<vmem>>, %arg4: memref<128x128xbf16, #tpu.memory_space<vmem>>, %arg5: memref<256x256xbf16, #tpu.memory_space<vmem>>, %arg6: memref<2x128xf32, #tpu.memory_space<vmem>>, %arg7: memref<2x32xf32, #tpu.memory_space<vmem>>, %arg8: memref<2x64xf32, #tpu.memory_space<vmem>>, %arg9: memref<2x128xf32, #tpu.memory_space<vmem>>, %arg10: memref<2x256xf32, #tpu.memory_space<vmem>>, %arg11: memref<2x8x256xf32, #tpu.memory_space<vmem>>, %arg12: memref<216x256xbf16, #tpu.memory_space<vmem>>, %arg13: memref<208x128xf32, #tpu.memory_space<vmem>>, %arg14: memref<88x128xbf16, #tpu.memory_space<vmem>>, %arg15: memref<80x32xf32, #tpu.memory_space<vmem>>, %arg16: memref<56x32xbf16, #tpu.memory_space<vmem>>, %arg17: memref<48x64xf32, #tpu.memory_space<vmem>>, %arg18: memref<56x64xbf16, #tpu.memory_space<vmem>>, %arg19: memref<48x128xf32, #tpu.memory_space<vmem>>, %arg20: memref<40x128xbf16, #tpu.memory_space<vmem>>, %arg21: memref<32x256xf32, #tpu.memory_space<vmem>>) attributes {dimension_semantics = [], scalar_prefetch = 0 : i64, scratch_operands = 10 : i64, tpu.core_type = #tpu.core_type<tc>} {
    %cst = arith.constant 0.000000e+00 : bf16
    %0 = vector.broadcast %cst : bf16 to vector<8x256xbf16>
    %c208 = arith.constant 208 : index
    %c0 = arith.constant 0 : index
    %1 = vector.load %arg12[%c208, %c0] : memref<216x256xbf16, #tpu.memory_space<vmem>>, vector<8x256xbf16>
    tpu.vector_store %arg12[%c208, %c0], %0 {strides = array<i32>} : memref<216x256xbf16, #tpu.memory_space<vmem>>, vector<8x256xbf16>,
    %cst_0 = arith.constant 0.000000e+00 : bf16
    %2 = vector.broadcast %cst_0 : bf16 to vector<8x256xbf16>
    %c96 = arith.constant 96 : index
    %c0_1 = arith.constant 0 : index
    %3 = vector.load %arg12[%c96, %c0_1] : memref<216x256xbf16, #tpu.memory_space<vmem>>, vector<8x256xbf16>
    tpu.vector_store %arg12[%c96, %c0_1], %2 {strides = array<i32>} : memref<216x256xbf16, #tpu.memory_space<vmem>>, vector<8x256xbf16>,
    %cst_2 = arith.constant 0.000000e+00 : bf16
    %4 = vector.broadcast %cst_2 : bf16 to vector<8x256xbf16>
    %c200 = arith.constant 200 : index
    %c0_3 = arith.constant 0 : index
    %5 = vector.load %arg12[%c200, %c0_3] : memref<216x256xbf16, #tpu.memory_space<vmem>>, vector<8x256xbf16>
    tpu.vector_store %arg12[%c200, %c0_3], %4 {strides = array<i32>} : memref<216x256xbf16, #tpu.memory_space<vmem>>, vector<8x256xbf16>,
    %c0_4 = arith.constant 0 : index
    %c0_5 = arith.constant 0 : index
    %c0_6 = arith.constant 0 : index
    %6 = vector.load %arg0[%c0_4, %c0_5, %c0_6] : memref<2x96x256xbf16, #tpu.memory_space<vmem>>, vector<1x96x256xbf16>
    %7 = vector.shape_cast %6 : vector<1x96x256xbf16> to vector<96x256xbf16>
    %c0_7 = arith.constant 0 : index
    %c0_8 = arith.constant 0 : index
    %8 = vector.load %arg12[%c0_7, %c0_8] : memref<216x256xbf16, #tpu.memory_space<vmem>>, vector<96x256xbf16>
    tpu.vector_store %arg12[%c0_7, %c0_8], %7 {strides = array<i32>} : memref<216x256xbf16, #tpu.memory_space<vmem>>, vector<96x256xbf16>,
    %c1 = arith.constant 1 : index
    %c0_9 = arith.constant 0 : index
    %c0_10 = arith.constant 0 : index
    %9 = vector.load %arg0[%c1, %c0_9, %c0_10] : memref<2x96x256xbf16, #tpu.memory_space<vmem>>, vector<1x96x256xbf16>
    %10 = vector.shape_cast %9 : vector<1x96x256xbf16> to vector<96x256xbf16>
    %c104 = arith.constant 104 : index
    %c0_11 = arith.constant 0 : index
    %11 = vector.load %arg12[%c104, %c0_11] : memref<216x256xbf16, #tpu.memory_space<vmem>>, vector<96x256xbf16>
    tpu.vector_store %arg12[%c104, %c0_11], %10 {strides = array<i32>} : memref<216x256xbf16, #tpu.memory_space<vmem>>, vector<96x256xbf16>,
    %c0_12 = arith.constant 0 : index
    %c0_13 = arith.constant 0 : index
    %12 = vector.load %arg6[%c0_12, %c0_13] : memref<2x128xf32, #tpu.memory_space<vmem>>, vector<1x128xf32>
    %c1_14 = arith.constant 1 : index
    %c0_15 = arith.constant 0 : index
    %13 = vector.load %arg6[%c1_14, %c0_15] : memref<2x128xf32, #tpu.memory_space<vmem>>, vector<1x128xf32>
    %c0_16 = arith.constant 0 : index
    %c0_17 = arith.constant 0 : index
    %14 = vector.load %arg12[%c0_16, %c0_17] : memref<216x256xbf16, #tpu.memory_space<vmem>>, vector<208x256xbf16>
    %c1_18 = arith.constant 1 : index
    %c0_19 = arith.constant 0 : index
    %15 = vector.load %arg12[%c1_18, %c0_19] : memref<216x256xbf16, #tpu.memory_space<vmem>>, vector<208x256xbf16>
    %16 = tpu.concatenate %14, %15 in 1 : vector<208x256xbf16>, vector<208x256xbf16> -> vector<208x512xbf16>
    %c0_20 = arith.constant 0 : index
    %c0_21 = arith.constant 0 : index
    %17 = vector.load %arg1[%c0_20, %c0_21] : memref<512x128xbf16, #tpu.memory_space<vmem>>, vector<512x128xbf16>
    %cst_22 = arith.constant dense<0.000000e+00> : vector<208x128xf32>
    %18 = tpu.matmul %16, %17, %cst_22 {dimension_numbers = #tpu.dot_dimension_numbers<[1], [0], [0], [1], [0, 0, 1, 1], [], []>} : vector<208x512xbf16>, vector<512x128xbf16>, vector<208x128xf32> -> vector<208x128xf32>
    %c0_23 = arith.constant 0 : index
    %c0_24 = arith.constant 0 : index
    %19 = vector.load %arg13[%c0_23, %c0_24] : memref<208x128xf32, #tpu.memory_space<vmem>>, vector<208x128xf32>
    tpu.vector_store %arg13[%c0_23, %c0_24], %18 {strides = array<i32>} : memref<208x128xf32, #tpu.memory_space<vmem>>, vector<208x128xf32>,
    %20 = tpu.iota {dimensions = array<i32: 0>} : vector<208x1xi32>
    %c96_i32 = arith.constant 96 : i32
    %21 = vector.broadcast %c96_i32 : i32 to vector<208x1xi32>
    %22 = arith.cmpi slt, %20, %21 : vector<208x1xi32>
    %c104_i32 = arith.constant 104 : i32
    %23 = vector.broadcast %c104_i32 : i32 to vector<208x1xi32>
    %24 = arith.cmpi sge, %20, %23 : vector<208x1xi32>
    %c200_i32 = arith.constant 200 : i32
    %25 = vector.broadcast %c200_i32 : i32 to vector<208x1xi32>
    %26 = arith.cmpi slt, %20, %25 : vector<208x1xi32>
    %27 = arith.andi %24, %26 : vector<208x1xi1>
    %28 = arith.ori %22, %27 : vector<208x1xi1>
    %c0_25 = arith.constant 0 : index
    %c0_26 = arith.constant 0 : index
    %29 = vector.load %arg13[%c0_25, %c0_26] : memref<208x128xf32, #tpu.memory_space<vmem>>, vector<208x128xf32>
    %cst_27 = arith.constant 0.000000e+00 : f32
    %30 = vector.shape_cast %28 : vector<208x1xi1> to vector<208x1xi1>
    %31 = vector.broadcast %30 : vector<208x1xi1> to vector<208x128xi1>
    %32 = vector.broadcast %cst_27 : f32 to vector<208x128xf32>
    %33 = arith.select %31, %29, %32 : vector<208x128xi1>, vector<208x128xf32>
    %cst_28 = arith.constant dense<0.000000e+00> : vector<128xf32>
    %34 = vector.multi_reduction <add>, %33, %cst_28 [0] : vector<208x128xf32> to vector<128xf32>
    %35 = vector.shape_cast %34 : vector<128xf32> to vector<1x128xf32>
    %36 = arith.mulf %33, %33 : vector<208x128xf32>
    %cst_29 = arith.constant dense<0.000000e+00> : vector<128xf32>
    %37 = vector.multi_reduction <add>, %36, %cst_29 [0] : vector<208x128xf32> to vector<128xf32>
    %38 = vector.shape_cast %37 : vector<128xf32> to vector<1x128xf32>
    %cst_30 = arith.constant 0.00520833349 : f32
    %39 = vector.broadcast %cst_30 : f32 to vector<1x128xf32>
    %40 = arith.mulf %35, %39 : vector<1x128xf32>
    %cst_31 = arith.constant 0.00520833349 : f32
    %41 = vector.broadcast %cst_31 : f32 to vector<1x128xf32>
    %42 = arith.mulf %38, %41 : vector<1x128xf32>
    %43 = arith.mulf %40, %40 : vector<1x128xf32>
    %44 = arith.subf %42, %43 : vector<1x128xf32>
    %cst_32 = arith.constant 0.000000e+00 : f32
    %45 = vector.broadcast %cst_32 : f32 to vector<1x128xf32>
    %46 = arith.maximumf %44, %45 : vector<1x128xf32>
    %cst_33 = arith.constant 9.99999974E-6 : f32
    %47 = vector.broadcast %cst_33 : f32 to vector<1x128xf32>
    %48 = arith.addf %46, %47 : vector<1x128xf32>
    %49 = math.rsqrt %48 : vector<1x128xf32>
    %50 = arith.mulf %12, %49 : vector<1x128xf32>
    %51 = arith.mulf %40, %50 : vector<1x128xf32>
    %52 = arith.subf %13, %51 : vector<1x128xf32>
    %53 = vector.broadcast %50 : vector<1x128xf32> to vector<208x128xf32>
    %54 = arith.mulf %29, %53 : vector<208x128xf32>
    %55 = vector.broadcast %52 : vector<1x128xf32> to vector<208x128xf32>
    %56 = arith.addf %54, %55 : vector<208x128xf32>
    %cst_34 = arith.constant 0.000000e+00 : f32
    %57 = vector.broadcast %cst_34 : f32 to vector<208x128xf32>
    %58 = arith.maximumf %56, %57 : vector<208x128xf32>
    %c0_35 = arith.constant 0 : index
    %c0_36 = arith.constant 0 : index
    %59 = vector.load %arg13[%c0_35, %c0_36] : memref<208x128xf32, #tpu.memory_space<vmem>>, vector<208x128xf32>
    tpu.vector_store %arg13[%c0_35, %c0_36], %58 {strides = array<i32>} : memref<208x128xf32, #tpu.memory_space<vmem>>, vector<208x128xf32>,
    %cst_37 = arith.constant 0.000000e+00 : bf16
    %60 = vector.broadcast %cst_37 : bf16 to vector<8x128xbf16>
    %c80 = arith.constant 80 : index
    %c0_38 = arith.constant 0 : index
    %61 = vector.load %arg14[%c80, %c0_38] : memref<88x128xbf16, #tpu.memory_space<vmem>>, vector<8x128xbf16>
    tpu.vector_store %arg14[%c80, %c0_38], %60 {strides = array<i32>} : memref<88x128xbf16, #tpu.memory_space<vmem>>, vector<8x128xbf16>,
    %cst_39 = arith.constant 0.000000e+00 : bf16
    %62 = vector.broadcast %cst_39 : bf16 to vector<1x128xbf16>
    %c0_40 = arith.constant 0 : index
    %c0_41 = arith.constant 0 : index
    %63 = vector.load %arg14[%c0_40, %c0_41] : memref<88x128xbf16, #tpu.memory_space<vmem>>, vector<1x128xbf16>
    tpu.vector_store %arg14[%c0_40, %c0_41], %62 {strides = array<i32>} : memref<88x128xbf16, #tpu.memory_space<vmem>>, vector<1x128xbf16>,
    %cst_42 = arith.constant 0.000000e+00 : bf16
    %64 = vector.broadcast %cst_42 : bf16 to vector<7x128xbf16>
    %c33 = arith.constant 33 : index
    %c0_43 = arith.constant 0 : index
    %65 = vector.load %arg14[%c33, %c0_43] : memref<88x128xbf16, #tpu.memory_space<vmem>>, vector<7x128xbf16>
    tpu.vector_store %arg14[%c33, %c0_43], %64 {strides = array<i32>} : memref<88x128xbf16, #tpu.memory_space<vmem>>, vector<7x128xbf16>,
    %cst_44 = arith.constant 0.000000e+00 : bf16
    %66 = vector.broadcast %cst_44 : bf16 to vector<1x128xbf16>
    %c40 = arith.constant 40 : index
    %c0_45 = arith.constant 0 : index
    %67 = vector.load %arg14[%c40, %c0_45] : memref<88x128xbf16, #tpu.memory_space<vmem>>, vector<1x128xbf16>
    tpu.vector_store %arg14[%c40, %c0_45], %66 {strides = array<i32>} : memref<88x128xbf16, #tpu.memory_space<vmem>>, vector<1x128xbf16>,
    %cst_46 = arith.constant 0.000000e+00 : bf16
    %68 = vector.broadcast %cst_46 : bf16 to vector<7x128xbf16>
    %c73 = arith.constant 73 : index
    %c0_47 = arith.constant 0 : index
    %69 = vector.load %arg14[%c73, %c0_47] : memref<88x128xbf16, #tpu.memory_space<vmem>>, vector<7x128xbf16>
    tpu.vector_store %arg14[%c73, %c0_47], %68 {strides = array<i32>} : memref<88x128xbf16, #tpu.memory_space<vmem>>, vector<7x128xbf16>,
    %c0_48 = arith.constant 0 : index
    %c0_49 = arith.constant 0 : index
    %70 = tpu.strided_load %arg13[%c0_48, %c0_49] {strides = array<i32: 3, 1>} : memref<208x128xf32, #tpu.memory_space<vmem>>, vector<32x128xf32>
    %c1_50 = arith.constant 1 : index
    %c0_51 = arith.constant 0 : index
    %71 = tpu.strided_load %arg13[%c1_50, %c0_51] {strides = array<i32: 3, 1>} : memref<208x128xf32, #tpu.memory_space<vmem>>, vector<32x128xf32>
    %72 = arith.maximumf %70, %71 : vector<32x128xf32>
    %c2 = arith.constant 2 : index
    %c0_52 = arith.constant 0 : index
    %73 = tpu.strided_load %arg13[%c2, %c0_52] {strides = array<i32: 3, 1>} : memref<208x128xf32, #tpu.memory_space<vmem>>, vector<32x128xf32>
    %74 = arith.maximumf %72, %73 : vector<32x128xf32>
    %75 = arith.truncf %74 : vector<32x128xf32> to vector<32x128xbf16>
    %c1_53 = arith.constant 1 : index
    %c0_54 = arith.constant 0 : index
    %76 = vector.load %arg14[%c1_53, %c0_54] : memref<88x128xbf16, #tpu.memory_space<vmem>>, vector<32x128xbf16>
    tpu.vector_store %arg14[%c1_53, %c0_54], %75 {strides = array<i32>} : memref<88x128xbf16, #tpu.memory_space<vmem>>, vector<32x128xbf16>,
    %c104_55 = arith.constant 104 : index
    %c0_56 = arith.constant 0 : index
    %77 = tpu.strided_load %arg13[%c104_55, %c0_56] {strides = array<i32: 3, 1>} : memref<208x128xf32, #tpu.memory_space<vmem>>, vector<32x128xf32>
    %c105 = arith.constant 105 : index
    %c0_57 = arith.constant 0 : index
    %78 = tpu.strided_load %arg13[%c105, %c0_57] {strides = array<i32: 3, 1>} : memref<208x128xf32, #tpu.memory_space<vmem>>, vector<32x128xf32>
    %79 = arith.maximumf %77, %78 : vector<32x128xf32>
    %c106 = arith.constant 106 : index
    %c0_58 = arith.constant 0 : index
    %80 = tpu.strided_load %arg13[%c106, %c0_58] {strides = array<i32: 3, 1>} : memref<208x128xf32, #tpu.memory_space<vmem>>, vector<32x128xf32>
    %81 = arith.maximumf %79, %80 : vector<32x128xf32>
    %82 = arith.truncf %81 : vector<32x128xf32> to vector<32x128xbf16>
    %c41 = arith.constant 41 : index
    %c0_59 = arith.constant 0 : index
    %83 = vector.load %arg14[%c41, %c0_59] : memref<88x128xbf16, #tpu.memory_space<vmem>>, vector<32x128xbf16>
    tpu.vector_store %arg14[%c41, %c0_59], %82 {strides = array<i32>} : memref<88x128xbf16, #tpu.memory_space<vmem>>, vector<32x128xbf16>,
    %c0_60 = arith.constant 0 : index
    %c0_61 = arith.constant 0 : index
    %84 = vector.load %arg7[%c0_60, %c0_61] : memref<2x32xf32, #tpu.memory_space<vmem>>, vector<1x32xf32>
    %c1_62 = arith.constant 1 : index
    %c0_63 = arith.constant 0 : index
    %85 = vector.load %arg7[%c1_62, %c0_63] : memref<2x32xf32, #tpu.memory_space<vmem>>, vector<1x32xf32>
    %c0_64 = arith.constant 0 : index
    %c0_65 = arith.constant 0 : index
    %86 = vector.load %arg14[%c0_64, %c0_65] : memref<88x128xbf16, #tpu.memory_space<vmem>>, vector<80x128xbf16>
    %c2_66 = arith.constant 2 : index
    %c0_67 = arith.constant 0 : index
    %87 = vector.load %arg14[%c2_66, %c0_67] : memref<88x128xbf16, #tpu.memory_space<vmem>>, vector<80x128xbf16>
    %88 = tpu.concatenate %86, %87 in 1 : vector<80x128xbf16>, vector<80x128xbf16> -> vector<80x256xbf16>
    %c0_68 = arith.constant 0 : index
    %c0_69 = arith.constant 0 : index
    %89 = vector.load %arg2[%c0_68, %c0_69] : memref<256x32xbf16, #tpu.memory_space<vmem>>, vector<256x32xbf16>
    %cst_70 = arith.constant dense<0.000000e+00> : vector<80x32xf32>
    %90 = tpu.matmul %88, %89, %cst_70 {dimension_numbers = #tpu.dot_dimension_numbers<[1], [0], [0], [1], [0, 0, 1, 1], [], []>} : vector<80x256xbf16>, vector<256x32xbf16>, vector<80x32xf32> -> vector<80x32xf32>
    %c0_71 = arith.constant 0 : index
    %c0_72 = arith.constant 0 : index
    %91 = vector.load %arg15[%c0_71, %c0_72] : memref<80x32xf32, #tpu.memory_space<vmem>>, vector<80x32xf32>
    tpu.vector_store %arg15[%c0_71, %c0_72], %90 {strides = array<i32>} : memref<80x32xf32, #tpu.memory_space<vmem>>, vector<80x32xf32>,
    %92 = tpu.iota {dimensions = array<i32: 0>} : vector<80x1xi32>
    %c32_i32 = arith.constant 32 : i32
    %93 = vector.broadcast %c32_i32 : i32 to vector<80x1xi32>
    %94 = arith.cmpi slt, %92, %93 : vector<80x1xi32>
    %c40_i32 = arith.constant 40 : i32
    %95 = vector.broadcast %c40_i32 : i32 to vector<80x1xi32>
    %96 = arith.cmpi sge, %92, %95 : vector<80x1xi32>
    %c72_i32 = arith.constant 72 : i32
    %97 = vector.broadcast %c72_i32 : i32 to vector<80x1xi32>
    %98 = arith.cmpi slt, %92, %97 : vector<80x1xi32>
    %99 = arith.andi %96, %98 : vector<80x1xi1>
    %100 = arith.ori %94, %99 : vector<80x1xi1>
    %c0_73 = arith.constant 0 : index
    %c0_74 = arith.constant 0 : index
    %101 = vector.load %arg15[%c0_73, %c0_74] : memref<80x32xf32, #tpu.memory_space<vmem>>, vector<80x32xf32>
    %cst_75 = arith.constant 0.000000e+00 : f32
    %102 = vector.shape_cast %100 : vector<80x1xi1> to vector<80x1xi1>
    %103 = vector.broadcast %102 : vector<80x1xi1> to vector<80x32xi1>
    %104 = vector.broadcast %cst_75 : f32 to vector<80x32xf32>
    %105 = arith.select %103, %101, %104 : vector<80x32xi1>, vector<80x32xf32>
    %cst_76 = arith.constant dense<0.000000e+00> : vector<32xf32>
    %106 = vector.multi_reduction <add>, %105, %cst_76 [0] : vector<80x32xf32> to vector<32xf32>
    %107 = vector.shape_cast %106 : vector<32xf32> to vector<1x32xf32>
    %108 = arith.mulf %105, %105 : vector<80x32xf32>
    %cst_77 = arith.constant dense<0.000000e+00> : vector<32xf32>
    %109 = vector.multi_reduction <add>, %108, %cst_77 [0] : vector<80x32xf32> to vector<32xf32>
    %110 = vector.shape_cast %109 : vector<32xf32> to vector<1x32xf32>
    %cst_78 = arith.constant 1.562500e-02 : f32
    %111 = vector.broadcast %cst_78 : f32 to vector<1x32xf32>
    %112 = arith.mulf %107, %111 : vector<1x32xf32>
    %cst_79 = arith.constant 1.562500e-02 : f32
    %113 = vector.broadcast %cst_79 : f32 to vector<1x32xf32>
    %114 = arith.mulf %110, %113 : vector<1x32xf32>
    %115 = arith.mulf %112, %112 : vector<1x32xf32>
    %116 = arith.subf %114, %115 : vector<1x32xf32>
    %cst_80 = arith.constant 0.000000e+00 : f32
    %117 = vector.broadcast %cst_80 : f32 to vector<1x32xf32>
    %118 = arith.maximumf %116, %117 : vector<1x32xf32>
    %cst_81 = arith.constant 9.99999974E-6 : f32
    %119 = vector.broadcast %cst_81 : f32 to vector<1x32xf32>
    %120 = arith.addf %118, %119 : vector<1x32xf32>
    %121 = math.rsqrt %120 : vector<1x32xf32>
    %122 = arith.mulf %84, %121 : vector<1x32xf32>
    %123 = arith.mulf %112, %122 : vector<1x32xf32>
    %124 = arith.subf %85, %123 : vector<1x32xf32>
    %125 = vector.broadcast %122 : vector<1x32xf32> to vector<80x32xf32>
    %126 = arith.mulf %101, %125 : vector<80x32xf32>
    %127 = vector.broadcast %124 : vector<1x32xf32> to vector<80x32xf32>
    %128 = arith.addf %126, %127 : vector<80x32xf32>
    %cst_82 = arith.constant 0.000000e+00 : f32
    %129 = vector.broadcast %cst_82 : f32 to vector<80x32xf32>
    %130 = arith.maximumf %128, %129 : vector<80x32xf32>
    %c0_83 = arith.constant 0 : index
    %c0_84 = arith.constant 0 : index
    %131 = vector.load %arg15[%c0_83, %c0_84] : memref<80x32xf32, #tpu.memory_space<vmem>>, vector<80x32xf32>
    tpu.vector_store %arg15[%c0_83, %c0_84], %130 {strides = array<i32>} : memref<80x32xf32, #tpu.memory_space<vmem>>, vector<80x32xf32>,
    %cst_85 = arith.constant 0.000000e+00 : bf16
    %132 = vector.broadcast %cst_85 : bf16 to vector<8x32xbf16>
    %c48 = arith.constant 48 : index
    %c0_86 = arith.constant 0 : index
    %133 = vector.load %arg16[%c48, %c0_86] : memref<56x32xbf16, #tpu.memory_space<vmem>>, vector<8x32xbf16>
    tpu.vector_store %arg16[%c48, %c0_86], %132 {strides = array<i32>} : memref<56x32xbf16, #tpu.memory_space<vmem>>, vector<8x32xbf16>,
    %cst_87 = arith.constant 0.000000e+00 : bf16
    %134 = vector.broadcast %cst_87 : bf16 to vector<1x32xbf16>
    %c0_88 = arith.constant 0 : index
    %c0_89 = arith.constant 0 : index
    %135 = vector.load %arg16[%c0_88, %c0_89] : memref<56x32xbf16, #tpu.memory_space<vmem>>, vector<1x32xbf16>
    tpu.vector_store %arg16[%c0_88, %c0_89], %134 {strides = array<i32>} : memref<56x32xbf16, #tpu.memory_space<vmem>>, vector<1x32xbf16>,
    %cst_90 = arith.constant 0.000000e+00 : bf16
    %136 = vector.broadcast %cst_90 : bf16 to vector<7x32xbf16>
    %c17 = arith.constant 17 : index
    %c0_91 = arith.constant 0 : index
    %137 = vector.load %arg16[%c17, %c0_91] : memref<56x32xbf16, #tpu.memory_space<vmem>>, vector<7x32xbf16>
    tpu.vector_store %arg16[%c17, %c0_91], %136 {strides = array<i32>} : memref<56x32xbf16, #tpu.memory_space<vmem>>, vector<7x32xbf16>,
    %cst_92 = arith.constant 0.000000e+00 : bf16
    %138 = vector.broadcast %cst_92 : bf16 to vector<1x32xbf16>
    %c24 = arith.constant 24 : index
    %c0_93 = arith.constant 0 : index
    %139 = vector.load %arg16[%c24, %c0_93] : memref<56x32xbf16, #tpu.memory_space<vmem>>, vector<1x32xbf16>
    tpu.vector_store %arg16[%c24, %c0_93], %138 {strides = array<i32>} : memref<56x32xbf16, #tpu.memory_space<vmem>>, vector<1x32xbf16>,
    %cst_94 = arith.constant 0.000000e+00 : bf16
    %140 = vector.broadcast %cst_94 : bf16 to vector<7x32xbf16>
    %c41_95 = arith.constant 41 : index
    %c0_96 = arith.constant 0 : index
    %141 = vector.load %arg16[%c41_95, %c0_96] : memref<56x32xbf16, #tpu.memory_space<vmem>>, vector<7x32xbf16>
    tpu.vector_store %arg16[%c41_95, %c0_96], %140 {strides = array<i32>} : memref<56x32xbf16, #tpu.memory_space<vmem>>, vector<7x32xbf16>,
    %c0_97 = arith.constant 0 : index
    %c0_98 = arith.constant 0 : index
    %142 = tpu.strided_load %arg15[%c0_97, %c0_98] {strides = array<i32: 2, 1>} : memref<80x32xf32, #tpu.memory_space<vmem>>, vector<16x32xf32>
    %c1_99 = arith.constant 1 : index
    %c0_100 = arith.constant 0 : index
    %143 = tpu.strided_load %arg15[%c1_99, %c0_100] {strides = array<i32: 2, 1>} : memref<80x32xf32, #tpu.memory_space<vmem>>, vector<16x32xf32>
    %144 = arith.maximumf %142, %143 : vector<16x32xf32>
    %145 = arith.truncf %144 : vector<16x32xf32> to vector<16x32xbf16>
    %c1_101 = arith.constant 1 : index
    %c0_102 = arith.constant 0 : index
    %146 = vector.load %arg16[%c1_101, %c0_102] : memref<56x32xbf16, #tpu.memory_space<vmem>>, vector<16x32xbf16>
    tpu.vector_store %arg16[%c1_101, %c0_102], %145 {strides = array<i32>} : memref<56x32xbf16, #tpu.memory_space<vmem>>, vector<16x32xbf16>,
    %c40_103 = arith.constant 40 : index
    %c0_104 = arith.constant 0 : index
    %147 = tpu.strided_load %arg15[%c40_103, %c0_104] {strides = array<i32: 2, 1>} : memref<80x32xf32, #tpu.memory_space<vmem>>, vector<16x32xf32>
    %c41_105 = arith.constant 41 : index
    %c0_106 = arith.constant 0 : index
    %148 = tpu.strided_load %arg15[%c41_105, %c0_106] {strides = array<i32: 2, 1>} : memref<80x32xf32, #tpu.memory_space<vmem>>, vector<16x32xf32>
    %149 = arith.maximumf %147, %148 : vector<16x32xf32>
    %150 = arith.truncf %149 : vector<16x32xf32> to vector<16x32xbf16>
    %c25 = arith.constant 25 : index
    %c0_107 = arith.constant 0 : index
    %151 = vector.load %arg16[%c25, %c0_107] : memref<56x32xbf16, #tpu.memory_space<vmem>>, vector<16x32xbf16>
    tpu.vector_store %arg16[%c25, %c0_107], %150 {strides = array<i32>} : memref<56x32xbf16, #tpu.memory_space<vmem>>, vector<16x32xbf16>,
    %c0_108 = arith.constant 0 : index
    %c0_109 = arith.constant 0 : index
    %152 = vector.load %arg8[%c0_108, %c0_109] : memref<2x64xf32, #tpu.memory_space<vmem>>, vector<1x64xf32>
    %c1_110 = arith.constant 1 : index
    %c0_111 = arith.constant 0 : index
    %153 = vector.load %arg8[%c1_110, %c0_111] : memref<2x64xf32, #tpu.memory_space<vmem>>, vector<1x64xf32>
    %c0_112 = arith.constant 0 : index
    %c0_113 = arith.constant 0 : index
    %154 = vector.load %arg16[%c0_112, %c0_113] : memref<56x32xbf16, #tpu.memory_space<vmem>>, vector<48x32xbf16>
    %c2_114 = arith.constant 2 : index
    %c0_115 = arith.constant 0 : index
    %155 = vector.load %arg16[%c2_114, %c0_115] : memref<56x32xbf16, #tpu.memory_space<vmem>>, vector<48x32xbf16>
    %156 = tpu.concatenate %154, %155 in 1 : vector<48x32xbf16>, vector<48x32xbf16> -> vector<48x64xbf16>
    %c0_116 = arith.constant 0 : index
    %c0_117 = arith.constant 0 : index
    %157 = vector.load %arg3[%c0_116, %c0_117] : memref<64x64xbf16, #tpu.memory_space<vmem>>, vector<64x64xbf16>
    %cst_118 = arith.constant dense<0.000000e+00> : vector<48x64xf32>
    %158 = tpu.matmul %156, %157, %cst_118 {dimension_numbers = #tpu.dot_dimension_numbers<[1], [0], [0], [1], [0, 0, 1, 1], [], []>} : vector<48x64xbf16>, vector<64x64xbf16>, vector<48x64xf32> -> vector<48x64xf32>
    %c0_119 = arith.constant 0 : index
    %c0_120 = arith.constant 0 : index
    %159 = vector.load %arg17[%c0_119, %c0_120] : memref<48x64xf32, #tpu.memory_space<vmem>>, vector<48x64xf32>
    tpu.vector_store %arg17[%c0_119, %c0_120], %158 {strides = array<i32>} : memref<48x64xf32, #tpu.memory_space<vmem>>, vector<48x64xf32>,
    %160 = tpu.iota {dimensions = array<i32: 0>} : vector<48x1xi32>
    %c16_i32 = arith.constant 16 : i32
    %161 = vector.broadcast %c16_i32 : i32 to vector<48x1xi32>
    %162 = arith.cmpi slt, %160, %161 : vector<48x1xi32>
    %c24_i32 = arith.constant 24 : i32
    %163 = vector.broadcast %c24_i32 : i32 to vector<48x1xi32>
    %164 = arith.cmpi sge, %160, %163 : vector<48x1xi32>
    %c40_i32_121 = arith.constant 40 : i32
    %165 = vector.broadcast %c40_i32_121 : i32 to vector<48x1xi32>
    %166 = arith.cmpi slt, %160, %165 : vector<48x1xi32>
    %167 = arith.andi %164, %166 : vector<48x1xi1>
    %168 = arith.ori %162, %167 : vector<48x1xi1>
    %c0_122 = arith.constant 0 : index
    %c0_123 = arith.constant 0 : index
    %169 = vector.load %arg17[%c0_122, %c0_123] : memref<48x64xf32, #tpu.memory_space<vmem>>, vector<48x64xf32>
    %cst_124 = arith.constant 0.000000e+00 : f32
    %170 = vector.shape_cast %168 : vector<48x1xi1> to vector<48x1xi1>
    %171 = vector.broadcast %170 : vector<48x1xi1> to vector<48x64xi1>
    %172 = vector.broadcast %cst_124 : f32 to vector<48x64xf32>
    %173 = arith.select %171, %169, %172 : vector<48x64xi1>, vector<48x64xf32>
    %cst_125 = arith.constant dense<0.000000e+00> : vector<64xf32>
    %174 = vector.multi_reduction <add>, %173, %cst_125 [0] : vector<48x64xf32> to vector<64xf32>
    %175 = vector.shape_cast %174 : vector<64xf32> to vector<1x64xf32>
    %176 = arith.mulf %173, %173 : vector<48x64xf32>
    %cst_126 = arith.constant dense<0.000000e+00> : vector<64xf32>
    %177 = vector.multi_reduction <add>, %176, %cst_126 [0] : vector<48x64xf32> to vector<64xf32>
    %178 = vector.shape_cast %177 : vector<64xf32> to vector<1x64xf32>
    %cst_127 = arith.constant 3.125000e-02 : f32
    %179 = vector.broadcast %cst_127 : f32 to vector<1x64xf32>
    %180 = arith.mulf %175, %179 : vector<1x64xf32>
    %cst_128 = arith.constant 3.125000e-02 : f32
    %181 = vector.broadcast %cst_128 : f32 to vector<1x64xf32>
    %182 = arith.mulf %178, %181 : vector<1x64xf32>
    %183 = arith.mulf %180, %180 : vector<1x64xf32>
    %184 = arith.subf %182, %183 : vector<1x64xf32>
    %cst_129 = arith.constant 0.000000e+00 : f32
    %185 = vector.broadcast %cst_129 : f32 to vector<1x64xf32>
    %186 = arith.maximumf %184, %185 : vector<1x64xf32>
    %cst_130 = arith.constant 9.99999974E-6 : f32
    %187 = vector.broadcast %cst_130 : f32 to vector<1x64xf32>
    %188 = arith.addf %186, %187 : vector<1x64xf32>
    %189 = math.rsqrt %188 : vector<1x64xf32>
    %190 = arith.mulf %152, %189 : vector<1x64xf32>
    %191 = arith.mulf %180, %190 : vector<1x64xf32>
    %192 = arith.subf %153, %191 : vector<1x64xf32>
    %193 = vector.broadcast %190 : vector<1x64xf32> to vector<48x64xf32>
    %194 = arith.mulf %169, %193 : vector<48x64xf32>
    %195 = vector.broadcast %192 : vector<1x64xf32> to vector<48x64xf32>
    %196 = arith.addf %194, %195 : vector<48x64xf32>
    %cst_131 = arith.constant 0.000000e+00 : f32
    %197 = vector.broadcast %cst_131 : f32 to vector<48x64xf32>
    %198 = arith.maximumf %196, %197 : vector<48x64xf32>
    %c0_132 = arith.constant 0 : index
    %c0_133 = arith.constant 0 : index
    %199 = vector.load %arg17[%c0_132, %c0_133] : memref<48x64xf32, #tpu.memory_space<vmem>>, vector<48x64xf32>
    tpu.vector_store %arg17[%c0_132, %c0_133], %198 {strides = array<i32>} : memref<48x64xf32, #tpu.memory_space<vmem>>, vector<48x64xf32>,
    %cst_134 = arith.constant 0.000000e+00 : bf16
    %200 = vector.broadcast %cst_134 : bf16 to vector<8x64xbf16>
    %c48_135 = arith.constant 48 : index
    %c0_136 = arith.constant 0 : index
    %201 = vector.load %arg18[%c48_135, %c0_136] : memref<56x64xbf16, #tpu.memory_space<vmem>>, vector<8x64xbf16>
    tpu.vector_store %arg18[%c48_135, %c0_136], %200 {strides = array<i32>} : memref<56x64xbf16, #tpu.memory_space<vmem>>, vector<8x64xbf16>,
    %cst_137 = arith.constant 0.000000e+00 : bf16
    %202 = vector.broadcast %cst_137 : bf16 to vector<2x64xbf16>
    %c0_138 = arith.constant 0 : index
    %c0_139 = arith.constant 0 : index
    %203 = vector.load %arg18[%c0_138, %c0_139] : memref<56x64xbf16, #tpu.memory_space<vmem>>, vector<2x64xbf16>
    tpu.vector_store %arg18[%c0_138, %c0_139], %202 {strides = array<i32>} : memref<56x64xbf16, #tpu.memory_space<vmem>>, vector<2x64xbf16>,
    %cst_140 = arith.constant 0.000000e+00 : bf16
    %204 = vector.broadcast %cst_140 : bf16 to vector<6x64xbf16>
    %c18 = arith.constant 18 : index
    %c0_141 = arith.constant 0 : index
    %205 = vector.load %arg18[%c18, %c0_141] : memref<56x64xbf16, #tpu.memory_space<vmem>>, vector<6x64xbf16>
    tpu.vector_store %arg18[%c18, %c0_141], %204 {strides = array<i32>} : memref<56x64xbf16, #tpu.memory_space<vmem>>, vector<6x64xbf16>,
    %cst_142 = arith.constant 0.000000e+00 : bf16
    %206 = vector.broadcast %cst_142 : bf16 to vector<2x64xbf16>
    %c24_143 = arith.constant 24 : index
    %c0_144 = arith.constant 0 : index
    %207 = vector.load %arg18[%c24_143, %c0_144] : memref<56x64xbf16, #tpu.memory_space<vmem>>, vector<2x64xbf16>
    tpu.vector_store %arg18[%c24_143, %c0_144], %206 {strides = array<i32>} : memref<56x64xbf16, #tpu.memory_space<vmem>>, vector<2x64xbf16>,
    %cst_145 = arith.constant 0.000000e+00 : bf16
    %208 = vector.broadcast %cst_145 : bf16 to vector<6x64xbf16>
    %c42 = arith.constant 42 : index
    %c0_146 = arith.constant 0 : index
    %209 = vector.load %arg18[%c42, %c0_146] : memref<56x64xbf16, #tpu.memory_space<vmem>>, vector<6x64xbf16>
    tpu.vector_store %arg18[%c42, %c0_146], %208 {strides = array<i32>} : memref<56x64xbf16, #tpu.memory_space<vmem>>, vector<6x64xbf16>,
    %c0_147 = arith.constant 0 : index
    %c0_148 = arith.constant 0 : index
    %210 = vector.load %arg17[%c0_147, %c0_148] : memref<48x64xf32, #tpu.memory_space<vmem>>, vector<16x64xf32>
    %211 = arith.truncf %210 : vector<16x64xf32> to vector<16x64xbf16>
    %c2_149 = arith.constant 2 : index
    %c0_150 = arith.constant 0 : index
    %212 = vector.load %arg18[%c2_149, %c0_150] : memref<56x64xbf16, #tpu.memory_space<vmem>>, vector<16x64xbf16>
    tpu.vector_store %arg18[%c2_149, %c0_150], %211 {strides = array<i32>} : memref<56x64xbf16, #tpu.memory_space<vmem>>, vector<16x64xbf16>,
    %c24_151 = arith.constant 24 : index
    %c0_152 = arith.constant 0 : index
    %213 = vector.load %arg17[%c24_151, %c0_152] : memref<48x64xf32, #tpu.memory_space<vmem>>, vector<16x64xf32>
    %214 = arith.truncf %213 : vector<16x64xf32> to vector<16x64xbf16>
    %c26 = arith.constant 26 : index
    %c0_153 = arith.constant 0 : index
    %215 = vector.load %arg18[%c26, %c0_153] : memref<56x64xbf16, #tpu.memory_space<vmem>>, vector<16x64xbf16>
    tpu.vector_store %arg18[%c26, %c0_153], %214 {strides = array<i32>} : memref<56x64xbf16, #tpu.memory_space<vmem>>, vector<16x64xbf16>,
    %c0_154 = arith.constant 0 : index
    %c0_155 = arith.constant 0 : index
    %216 = vector.load %arg9[%c0_154, %c0_155] : memref<2x128xf32, #tpu.memory_space<vmem>>, vector<1x128xf32>
    %c1_156 = arith.constant 1 : index
    %c0_157 = arith.constant 0 : index
    %217 = vector.load %arg9[%c1_156, %c0_157] : memref<2x128xf32, #tpu.memory_space<vmem>>, vector<1x128xf32>
    %c0_158 = arith.constant 0 : index
    %c0_159 = arith.constant 0 : index
    %218 = vector.load %arg18[%c0_158, %c0_159] : memref<56x64xbf16, #tpu.memory_space<vmem>>, vector<48x64xbf16>
    %c4 = arith.constant 4 : index
    %c0_160 = arith.constant 0 : index
    %219 = vector.load %arg18[%c4, %c0_160] : memref<56x64xbf16, #tpu.memory_space<vmem>>, vector<48x64xbf16>
    %220 = tpu.concatenate %218, %219 in 1 : vector<48x64xbf16>, vector<48x64xbf16> -> vector<48x128xbf16>
    %c0_161 = arith.constant 0 : index
    %c0_162 = arith.constant 0 : index
    %221 = vector.load %arg4[%c0_161, %c0_162] : memref<128x128xbf16, #tpu.memory_space<vmem>>, vector<128x128xbf16>
    %cst_163 = arith.constant dense<0.000000e+00> : vector<48x128xf32>
    %222 = tpu.matmul %220, %221, %cst_163 {dimension_numbers = #tpu.dot_dimension_numbers<[1], [0], [0], [1], [0, 0, 1, 1], [], []>} : vector<48x128xbf16>, vector<128x128xbf16>, vector<48x128xf32> -> vector<48x128xf32>
    %c0_164 = arith.constant 0 : index
    %c0_165 = arith.constant 0 : index
    %223 = vector.load %arg19[%c0_164, %c0_165] : memref<48x128xf32, #tpu.memory_space<vmem>>, vector<48x128xf32>
    tpu.vector_store %arg19[%c0_164, %c0_165], %222 {strides = array<i32>} : memref<48x128xf32, #tpu.memory_space<vmem>>, vector<48x128xf32>,
    %224 = tpu.iota {dimensions = array<i32: 0>} : vector<48x1xi32>
    %c16_i32_166 = arith.constant 16 : i32
    %225 = vector.broadcast %c16_i32_166 : i32 to vector<48x1xi32>
    %226 = arith.cmpi slt, %224, %225 : vector<48x1xi32>
    %c24_i32_167 = arith.constant 24 : i32
    %227 = vector.broadcast %c24_i32_167 : i32 to vector<48x1xi32>
    %228 = arith.cmpi sge, %224, %227 : vector<48x1xi32>
    %c40_i32_168 = arith.constant 40 : i32
    %229 = vector.broadcast %c40_i32_168 : i32 to vector<48x1xi32>
    %230 = arith.cmpi slt, %224, %229 : vector<48x1xi32>
    %231 = arith.andi %228, %230 : vector<48x1xi1>
    %232 = arith.ori %226, %231 : vector<48x1xi1>
    %c0_169 = arith.constant 0 : index
    %c0_170 = arith.constant 0 : index
    %233 = vector.load %arg19[%c0_169, %c0_170] : memref<48x128xf32, #tpu.memory_space<vmem>>, vector<48x128xf32>
    %cst_171 = arith.constant 0.000000e+00 : f32
    %234 = vector.shape_cast %232 : vector<48x1xi1> to vector<48x1xi1>
    %235 = vector.broadcast %234 : vector<48x1xi1> to vector<48x128xi1>
    %236 = vector.broadcast %cst_171 : f32 to vector<48x128xf32>
    %237 = arith.select %235, %233, %236 : vector<48x128xi1>, vector<48x128xf32>
    %cst_172 = arith.constant dense<0.000000e+00> : vector<128xf32>
    %238 = vector.multi_reduction <add>, %237, %cst_172 [0] : vector<48x128xf32> to vector<128xf32>
    %239 = vector.shape_cast %238 : vector<128xf32> to vector<1x128xf32>
    %240 = arith.mulf %237, %237 : vector<48x128xf32>
    %cst_173 = arith.constant dense<0.000000e+00> : vector<128xf32>
    %241 = vector.multi_reduction <add>, %240, %cst_173 [0] : vector<48x128xf32> to vector<128xf32>
    %242 = vector.shape_cast %241 : vector<128xf32> to vector<1x128xf32>
    %cst_174 = arith.constant 3.125000e-02 : f32
    %243 = vector.broadcast %cst_174 : f32 to vector<1x128xf32>
    %244 = arith.mulf %239, %243 : vector<1x128xf32>
    %cst_175 = arith.constant 3.125000e-02 : f32
    %245 = vector.broadcast %cst_175 : f32 to vector<1x128xf32>
    %246 = arith.mulf %242, %245 : vector<1x128xf32>
    %247 = arith.mulf %244, %244 : vector<1x128xf32>
    %248 = arith.subf %246, %247 : vector<1x128xf32>
    %cst_176 = arith.constant 0.000000e+00 : f32
    %249 = vector.broadcast %cst_176 : f32 to vector<1x128xf32>
    %250 = arith.maximumf %248, %249 : vector<1x128xf32>
    %cst_177 = arith.constant 9.99999974E-6 : f32
    %251 = vector.broadcast %cst_177 : f32 to vector<1x128xf32>
    %252 = arith.addf %250, %251 : vector<1x128xf32>
    %253 = math.rsqrt %252 : vector<1x128xf32>
    %254 = arith.mulf %216, %253 : vector<1x128xf32>
    %255 = arith.mulf %244, %254 : vector<1x128xf32>
    %256 = arith.subf %217, %255 : vector<1x128xf32>
    %257 = vector.broadcast %254 : vector<1x128xf32> to vector<48x128xf32>
    %258 = arith.mulf %233, %257 : vector<48x128xf32>
    %259 = vector.broadcast %256 : vector<1x128xf32> to vector<48x128xf32>
    %260 = arith.addf %258, %259 : vector<48x128xf32>
    %cst_178 = arith.constant 0.000000e+00 : f32
    %261 = vector.broadcast %cst_178 : f32 to vector<48x128xf32>
    %262 = arith.maximumf %260, %261 : vector<48x128xf32>
    %c0_179 = arith.constant 0 : index
    %c0_180 = arith.constant 0 : index
    %263 = vector.load %arg19[%c0_179, %c0_180] : memref<48x128xf32, #tpu.memory_space<vmem>>, vector<48x128xf32>
    tpu.vector_store %arg19[%c0_179, %c0_180], %262 {strides = array<i32>} : memref<48x128xf32, #tpu.memory_space<vmem>>, vector<48x128xf32>,
    %cst_181 = arith.constant 0.000000e+00 : bf16
    %264 = vector.broadcast %cst_181 : bf16 to vector<8x128xbf16>
    %c32 = arith.constant 32 : index
    %c0_182 = arith.constant 0 : index
    %265 = vector.load %arg20[%c32, %c0_182] : memref<40x128xbf16, #tpu.memory_space<vmem>>, vector<8x128xbf16>
    tpu.vector_store %arg20[%c32, %c0_182], %264 {strides = array<i32>} : memref<40x128xbf16, #tpu.memory_space<vmem>>, vector<8x128xbf16>,
    %c0_183 = arith.constant 0 : index
    %c0_184 = arith.constant 0 : index
    %266 = vector.load %arg19[%c0_183, %c0_184] : memref<48x128xf32, #tpu.memory_space<vmem>>, vector<16x128xf32>
    %267 = arith.truncf %266 : vector<16x128xf32> to vector<16x128xbf16>
    %c0_185 = arith.constant 0 : index
    %c0_186 = arith.constant 0 : index
    %268 = vector.load %arg20[%c0_185, %c0_186] : memref<40x128xbf16, #tpu.memory_space<vmem>>, vector<16x128xbf16>
    tpu.vector_store %arg20[%c0_185, %c0_186], %267 {strides = array<i32>} : memref<40x128xbf16, #tpu.memory_space<vmem>>, vector<16x128xbf16>,
    %c24_187 = arith.constant 24 : index
    %c0_188 = arith.constant 0 : index
    %269 = vector.load %arg19[%c24_187, %c0_188] : memref<48x128xf32, #tpu.memory_space<vmem>>, vector<16x128xf32>
    %270 = arith.truncf %269 : vector<16x128xf32> to vector<16x128xbf16>
    %c16 = arith.constant 16 : index
    %c0_189 = arith.constant 0 : index
    %271 = vector.load %arg20[%c16, %c0_189] : memref<40x128xbf16, #tpu.memory_space<vmem>>, vector<16x128xbf16>
    tpu.vector_store %arg20[%c16, %c0_189], %270 {strides = array<i32>} : memref<40x128xbf16, #tpu.memory_space<vmem>>, vector<16x128xbf16>,
    %c0_190 = arith.constant 0 : index
    %c0_191 = arith.constant 0 : index
    %272 = vector.load %arg10[%c0_190, %c0_191] : memref<2x256xf32, #tpu.memory_space<vmem>>, vector<1x256xf32>
    %c1_192 = arith.constant 1 : index
    %c0_193 = arith.constant 0 : index
    %273 = vector.load %arg10[%c1_192, %c0_193] : memref<2x256xf32, #tpu.memory_space<vmem>>, vector<1x256xf32>
    %c0_194 = arith.constant 0 : index
    %c0_195 = arith.constant 0 : index
    %274 = vector.load %arg20[%c0_194, %c0_195] : memref<40x128xbf16, #tpu.memory_space<vmem>>, vector<32x128xbf16>
    %c8 = arith.constant 8 : index
    %c0_196 = arith.constant 0 : index
    %275 = vector.load %arg20[%c8, %c0_196] : memref<40x128xbf16, #tpu.memory_space<vmem>>, vector<32x128xbf16>
    %276 = tpu.concatenate %274, %275 in 1 : vector<32x128xbf16>, vector<32x128xbf16> -> vector<32x256xbf16>
    %c0_197 = arith.constant 0 : index
    %c0_198 = arith.constant 0 : index
    %277 = vector.load %arg5[%c0_197, %c0_198] : memref<256x256xbf16, #tpu.memory_space<vmem>>, vector<256x256xbf16>
    %cst_199 = arith.constant dense<0.000000e+00> : vector<32x256xf32>
    %278 = tpu.matmul %276, %277, %cst_199 {dimension_numbers = #tpu.dot_dimension_numbers<[1], [0], [0], [1], [0, 0, 1, 1], [], []>} : vector<32x256xbf16>, vector<256x256xbf16>, vector<32x256xf32> -> vector<32x256xf32>
    %c0_200 = arith.constant 0 : index
    %c0_201 = arith.constant 0 : index
    %279 = vector.load %arg21[%c0_200, %c0_201] : memref<32x256xf32, #tpu.memory_space<vmem>>, vector<32x256xf32>
    tpu.vector_store %arg21[%c0_200, %c0_201], %278 {strides = array<i32>} : memref<32x256xf32, #tpu.memory_space<vmem>>, vector<32x256xf32>,
    %280 = tpu.iota {dimensions = array<i32: 0>} : vector<32x1xi32>
    %c8_i32 = arith.constant 8 : i32
    %281 = vector.broadcast %c8_i32 : i32 to vector<32x1xi32>
    %282 = arith.cmpi slt, %280, %281 : vector<32x1xi32>
    %c16_i32_202 = arith.constant 16 : i32
    %283 = vector.broadcast %c16_i32_202 : i32 to vector<32x1xi32>
    %284 = arith.cmpi sge, %280, %283 : vector<32x1xi32>
    %c24_i32_203 = arith.constant 24 : i32
    %285 = vector.broadcast %c24_i32_203 : i32 to vector<32x1xi32>
    %286 = arith.cmpi slt, %280, %285 : vector<32x1xi32>
    %287 = arith.andi %284, %286 : vector<32x1xi1>
    %288 = arith.ori %282, %287 : vector<32x1xi1>
    %c0_204 = arith.constant 0 : index
    %c0_205 = arith.constant 0 : index
    %289 = vector.load %arg21[%c0_204, %c0_205] : memref<32x256xf32, #tpu.memory_space<vmem>>, vector<32x256xf32>
    %cst_206 = arith.constant 0.000000e+00 : f32
    %290 = vector.shape_cast %288 : vector<32x1xi1> to vector<32x1xi1>
    %291 = vector.broadcast %290 : vector<32x1xi1> to vector<32x256xi1>
    %292 = vector.broadcast %cst_206 : f32 to vector<32x256xf32>
    %293 = arith.select %291, %289, %292 : vector<32x256xi1>, vector<32x256xf32>
    %cst_207 = arith.constant dense<0.000000e+00> : vector<256xf32>
    %294 = vector.multi_reduction <add>, %293, %cst_207 [0] : vector<32x256xf32> to vector<256xf32>
    %295 = vector.shape_cast %294 : vector<256xf32> to vector<1x256xf32>
    %296 = arith.mulf %293, %293 : vector<32x256xf32>
    %cst_208 = arith.constant dense<0.000000e+00> : vector<256xf32>
    %297 = vector.multi_reduction <add>, %296, %cst_208 [0] : vector<32x256xf32> to vector<256xf32>
    %298 = vector.shape_cast %297 : vector<256xf32> to vector<1x256xf32>
    %cst_209 = arith.constant 6.250000e-02 : f32
    %299 = vector.broadcast %cst_209 : f32 to vector<1x256xf32>
    %300 = arith.mulf %295, %299 : vector<1x256xf32>
    %cst_210 = arith.constant 6.250000e-02 : f32
    %301 = vector.broadcast %cst_210 : f32 to vector<1x256xf32>
    %302 = arith.mulf %298, %301 : vector<1x256xf32>
    %303 = arith.mulf %300, %300 : vector<1x256xf32>
    %304 = arith.subf %302, %303 : vector<1x256xf32>
    %cst_211 = arith.constant 0.000000e+00 : f32
    %305 = vector.broadcast %cst_211 : f32 to vector<1x256xf32>
    %306 = arith.maximumf %304, %305 : vector<1x256xf32>
    %cst_212 = arith.constant 9.99999974E-6 : f32
    %307 = vector.broadcast %cst_212 : f32 to vector<1x256xf32>
    %308 = arith.addf %306, %307 : vector<1x256xf32>
    %309 = math.rsqrt %308 : vector<1x256xf32>
    %310 = arith.mulf %272, %309 : vector<1x256xf32>
    %311 = arith.mulf %300, %310 : vector<1x256xf32>
    %312 = arith.subf %273, %311 : vector<1x256xf32>
    %313 = vector.broadcast %310 : vector<1x256xf32> to vector<32x256xf32>
    %314 = arith.mulf %289, %313 : vector<32x256xf32>
    %315 = vector.broadcast %312 : vector<1x256xf32> to vector<32x256xf32>
    %316 = arith.addf %314, %315 : vector<32x256xf32>
    %cst_213 = arith.constant 0.000000e+00 : f32
    %317 = vector.broadcast %cst_213 : f32 to vector<32x256xf32>
    %318 = arith.maximumf %316, %317 : vector<32x256xf32>
    %c0_214 = arith.constant 0 : index
    %c0_215 = arith.constant 0 : index
    %319 = vector.load %arg21[%c0_214, %c0_215] : memref<32x256xf32, #tpu.memory_space<vmem>>, vector<32x256xf32>
    tpu.vector_store %arg21[%c0_214, %c0_215], %318 {strides = array<i32>} : memref<32x256xf32, #tpu.memory_space<vmem>>, vector<32x256xf32>,
    %c0_216 = arith.constant 0 : index
    %c0_217 = arith.constant 0 : index
    %320 = vector.load %arg21[%c0_216, %c0_217] : memref<32x256xf32, #tpu.memory_space<vmem>>, vector<8x256xf32>
    %c0_218 = arith.constant 0 : index
    %c0_219 = arith.constant 0 : index
    %c0_220 = arith.constant 0 : index
    %321 = vector.load %arg11[%c0_218, %c0_219, %c0_220] : memref<2x8x256xf32, #tpu.memory_space<vmem>>, vector<1x8x256xf32>
    %322 = vector.shape_cast %321 : vector<1x8x256xf32> to vector<8x256xf32>
    %323 = vector.shape_cast %320 : vector<8x256xf32> to vector<1x8x256xf32>
    tpu.vector_store %arg11[%c0_218, %c0_219, %c0_220], %323 {strides = array<i32>} : memref<2x8x256xf32, #tpu.memory_space<vmem>>, vector<1x8x256xf32>,
    %c16_221 = arith.constant 16 : index
    %c0_222 = arith.constant 0 : index
    %324 = vector.load %arg21[%c16_221, %c0_222] : memref<32x256xf32, #tpu.memory_space<vmem>>, vector<8x256xf32>
    %c1_223 = arith.constant 1 : index
    %c0_224 = arith.constant 0 : index
    %c0_225 = arith.constant 0 : index
    %325 = vector.load %arg11[%c1_223, %c0_224, %c0_225] : memref<2x8x256xf32, #tpu.memory_space<vmem>>, vector<1x8x256xf32>
    %326 = vector.shape_cast %325 : vector<1x8x256xf32> to vector<8x256xf32>
    %327 = vector.shape_cast %324 : vector<8x256xf32> to vector<1x8x256xf32>
    tpu.vector_store %arg11[%c1_223, %c0_224, %c0_225], %327 {strides = array<i32>} : memref<2x8x256xf32, #tpu.memory_space<vmem>>, vector<1x8x256xf32>,
    return
  }
}

</mosaic_0001>

<bundles_post_ra>
// kernel: bottleneck_forward.1
= control target key start
LH: loop header
LB: loop body
LE: loop exit
PB: predicated region body
PF: predicated region fallthrough
CT: control target
= control target key end

     0   :  { %v4363_v2 = vmov 0   ;;  %vm386_vm0 = vsmask.f32 7424  ;;  %s5464_s0 = inlined_call_operand.vmem [shape: bf16[2,96,256], index: 0, kind: input, shape index: {}]   ;;  %s5465_s1 = inlined_call_operand.vmem [shape: bf16[512,128], index: 1, kind: input, shape index: {}]   ;;  %s5466_s2 = inlined_call_operand.vmem [shape: bf16[256,32], index: 2, kind: input, shape index: {}]   ;;  %s5467_s3 = inlined_call_operand.vmem [shape: bf16[64,64], index: 3, kind: input, shape index: {}]   ;;  %s5468_s4 = inlined_call_operand.vmem [shape: bf16[128,128], index: 4, kind: input, shape index: {}]   ;;  %s5469_s5 = inlined_call_operand.vmem [shape: bf16[256,256], index: 5, kind: input, shape index: {}]   ;;  %s5470_s6 = inlined_call_operand.vmem [shape: f32[2,128], index: 6, kind: input, shape index: {}]   ;;  %s5471_s7 = inlined_call_operand.vmem [shape: f32[2,32], index: 7, kind: input, shape index: {}]   ;;  %s5472_s8 = inlined_call_operand.vmem [shape: f32[2,64], index: 8, kind: input, shape index: {}]   ;;  %s5473_s9 = inlined_call_operand.vmem [shape: f32[2,128], index: 9, kind: input, shape index: {}]   ;;  %s5474_s10 = inlined_call_operand.vmem [shape: f32[2,256], index: 10, kind: input, shape index: {}]   ;;  %s5475_s11 = inlined_call_operand.hbm [shape: f32[2,8,256], index: 11, kind: output, shape index: {}]  }
   0x1   :  { %v4169_v0 = vld [vmem:[%s5465_s1 + $0x40] sm:$0xff]   ;;  %41 = vst [vmem:[#allocation2 + $0x60] sm:$0xff] %v4363_v2  ;;  %40 = vst [vmem:[#allocation2 + $0xd0] sm:$0xff] %v4363_v2  ;;  %v4173_v5 = vld [vmem:[%s5465_s1 + $0x48] sm:$0xff]  }
   0x2   :  { %v4170_v1 = vld [vmem:[%s5465_s1 + $0xc0] sm:$0xff]   ;;  %1656 = vst [vmem:[#allocation4 + $0x28] sm:$0xf] %v4363_v2  ;;  %3088 = vst [vmem:[#allocation10 + $0x10] sm:$0xf] %v4363_v2  ;;  %3860 = vmatprep.subr.bf16.mxu0 %v4169_v0  ;;  %v4174_v6 = vld [vmem:[%s5465_s1 + $0xc8] sm:$0xff]  }
   0x3   :  { %v4171_v3 = vld [vmem:[%s5465_s1] sm:$0xff]   ;;  %3954 = vmatprep.subr.bf16.mxu1 %v4170_v1  ;;  %v4175_v7 = vld [vmem:[%s5465_s1 + $0x8] sm:$0xff]   ;;  %v4177_v9 = vld [vmem:[%s5465_s1 + $0x50] sm:$0xff]  }
   0x4   :  { %v4172_v4 = vld [vmem:[%s5465_s1 + $0x80] sm:$0xff]   ;;  %3861 = vmatpush3.bf16.msra.mxu0 %v4171_v3  ;;  %v4176_v8 = vld [vmem:[%s5465_s1 + $0x88] sm:$0xff]   ;;  %v4178_v10 = vld [vmem:[%s5465_s1 + $0xd0] sm:$0xff]  }
   0x5   :  { %3955 = vmatpush3.bf16.msra.mxu1 %v4172_v4  ;;  %3862 = vmatprep.subr.bf16.mxu0 %v4173_v5  ;;  %v4179_v11 = vld [vmem:[%s5465_s1 + $0x10] sm:$0xff]   ;;  %v4181_v13 = vld [vmem:[%s5465_s1 + $0x58] sm:$0xff]   ;;  %v4185_v17 = vld [vmem:[%s5465_s1 + $0x60] sm:$0xff]  }
   0x6   :  { %3956 = vmatprep.subr.bf16.mxu1 %v4174_v6  ;;  %v4180_v12 = vld [vmem:[%s5465_s1 + $0x90] sm:$0xff]   ;;  %v4182_v14 = vld [vmem:[%s5465_s1 + $0xd8] sm:$0xff]   ;;  %v4186_v18 = vld [vmem:[%s5465_s1 + $0xe0] sm:$0xff]  }
   0x7   :  { %v4183_v15 = vld [vmem:[%s5465_s1 + $0x18] sm:$0xff]   ;;  %v4187_v19 = vld [vmem:[%s5465_s1 + $0x20] sm:$0xff]   ;;  %v4189_v21 = vld [vmem:[%s5465_s1 + $0x68] sm:$0xff]  }
   0x8   :  { %3863 = vmatpush3.bf16.msra.mxu0 %v4175_v7  ;;  %v4184_v16 = vld [vmem:[%s5465_s1 + $0x98] sm:$0xff]   ;;  %v4188_v20 = vld [vmem:[%s5465_s1 + $0xa0] sm:$0xff]   ;;  %v4190_v22 = vld [vmem:[%s5465_s1 + $0xe8] sm:$0xff]  }
   0x9   :  { %3957 = vmatpush3.bf16.msra.mxu1 %v4176_v8  ;;  %3864 = vmatprep.subr.bf16.mxu0 %v4177_v9  ;;  %v4191_v23 = vld [vmem:[%s5465_s1 + $0x28] sm:$0xff]   ;;  %v4193_v25 = vld [vmem:[%s5465_s1 + $0x70] sm:$0xff]   ;;  %v4197_v29 = vld [vmem:[%s5465_s1 + $0x78] sm:$0xff]  }
   0xa   :  { %3958 = vmatprep.subr.bf16.mxu1 %v4178_v10  ;;  %v4192_v24 = vld [vmem:[%s5465_s1 + $0xa8] sm:$0xff]   ;;  %v4194_v26 = vld [vmem:[%s5465_s1 + $0xf0] sm:$0xff]   ;;  %v4198_v30 = vld [vmem:[%s5465_s1 + $0xf8] sm:$0xff]  }
   0xb   :  { %v4195_v27 = vld [vmem:[%s5465_s1 + $0x30] sm:$0xff]   ;;  %v4199_v31 = vld [vmem:[%s5465_s1 + $0x38] sm:$0xff]   ;;  %v43_v33 = vld [vmem:[%s5464_s0] sm:$0xff] }
   0xc   :  { %3865 = vmatpush3.bf16.msra.mxu0 %v4179_v11  ;;  %v4196_v28 = vld [vmem:[%s5465_s1 + $0xb0] sm:$0xff]   ;;  %v4200_v32 = vld [vmem:[%s5465_s1 + $0xb8] sm:$0xff]   ;;  %v44_v34 = vld [vmem:[%s5464_s0 + $0x8] sm:$0xff] }
   0xd   :  { %3959 = vmatpush3.bf16.msra.mxu1 %v4180_v12  ;;  %3866 = vmatprep.subr.bf16.mxu0 %v4181_v13  ;;  %v45_v35 = vld [vmem:[%s5464_s0 + $0x10] sm:$0xff]  ;;  %v3634_v36 = vcombine.low %v43_v33, %v44_v34  ;;  %v3635_v37 = vcombine.high %v43_v33, %v44_v34  ;;  %v46_v38 = vld [vmem:[%s5464_s0 + $0x18] sm:$0xff]  ;;  %v47_v39 = vld [vmem:[%s5464_s0 + $0x20] sm:$0xff] }
   0xe   :  { %3960 = vmatprep.subr.bf16.mxu1 %v4182_v14  ;;  %v48_v40 = vld [vmem:[%s5464_s0 + $0x28] sm:$0xff]  ;;  %v3663_v41 = vcombine.high %v45_v35, %v46_v38  ;;  %v3662_v42 = vcombine.low %v45_v35, %v46_v38  ;;  %v49_v45 = vld [vmem:[%s5464_s0 + $0x30] sm:$0xff]  ;;  %v50_v46 = vld [vmem:[%s5464_s0 + $0x38] sm:$0xff] }
   0xf   :  { %v3665_v43 = vcombine.high %v47_v39, %v48_v40  ;;  %v4550_v44 = vcombine.low %v47_v39, %v48_v40  ;;  %v51_v47 = vld [vmem:[%s5464_s0 + $0x40] sm:$0xff]  ;;  %917 = vmatprep.mubr.bf16.mxu0 %v3635_v37  ;;  %v400_v48 = vshrl.u32 %v3635_v37, 16  ;;  %v402_v49 = vshll.u32 %v3635_v37, 16  ;;  %v52_v52 = vld [vmem:[%s5464_s0 + $0x48] sm:$0xff]  ;;  %v53_v53 = vld [vmem:[%s5464_s0 + $0x50] sm:$0xff] }
  0x10   :  { %3867 = vmatpush3.bf16.msra.mxu0 %v4183_v15  ;;  %v388_v50 = vshrl.u32 %v3634_v36, 16  ;;  %v390_v51 = vshll.u32 %v3634_v36, 16  ;;  %v407_v54 = vshll.u32 %v3663_v41, 16  ;;  %v395_v55 = vshll.u32 %v3662_v42, 16  ;;  %v54_v58 = vld [vmem:[%s5464_s0 + $0x58] sm:$0xff]  ;;  %v4573_v59 = vld [vmem:[%s5464_s0 + $0x60] sm:$0xff] }
  0x11   :  { %3961 = vmatpush3.bf16.msra.mxu1 %v4184_v16  ;;  %3868 = vmatprep.subr.bf16.mxu0 %v4185_v17  ;;  %v419_v56 = vshrl.u32 %v3663_v41, 16  ;;  %v423_v57 = vshll.u32 %v3665_v43, 16  ;;  %v404_v60 = vrot.slane %v402_v49, 1  ;;  %v4578_v62 = vld [vmem:[%s5464_s0 + $0x68] sm:$0xff]  ;;  %v4583_v63 = vld [vmem:[%s5464_s0 + $0x70] sm:$0xff]  ;;  %v3667_v4 = vcombine.high %v49_v45, %v50_v46  ;;  %v4588_v5 = vld [vmem:[%s5464_s0 + $0x78] sm:$0xff] }
  0x12   :  { %3962 = vmatprep.subr.bf16.mxu1 %v4186_v18  ;;  %v392_v61 = vrot.slane %v390_v51, 1  ;;  %v409_v0 = vrot.slane %v407_v54, 1  ;;  %v397_v1 = vrot.slane %v395_v55, 1  ;;  %v4593_v6 = vld [vmem:[%s5464_s0 + $0x80] sm:$0xff]  ;;  %v4598_v7 = vld [vmem:[%s5464_s0 + $0x88] sm:$0xff]  ;;  %v4603_v10 = vld [vmem:[%s5464_s0 + $0x90] sm:$0xff]  ;;  %v4639_v37 = vcombine.high %v53_v53, %v54_v58 }
  0x13   :  { %v425_v3 = vrot.slane %v423_v57, 1  ;;  %v405_v8 = vor.u32 %v404_v60, %v400_v48  ;;  %v4608_v11 = vld [vmem:[%s5464_s0 + $0x98] sm:$0xff]  ;;  %v4613_v12 = vld [vmem:[%s5464_s0 + $0xa0] sm:$0xff]  ;;  %v411_v14 = vshrl.u32 %v3662_v42, 16  ;;  %v415_v15 = vshll.u32 %v4550_v44, 16  ;;  %v4619_v16 = vld [vmem:[%s5464_s0 + $0xa8] sm:$0xff] }
  0x14   :  { %3869 = vmatpush3.bf16.msra.mxu0 %v4187_v19  ;;  %v393_v9 = vor.u32 %v392_v61, %v388_v50  ;;  %v421_v13 = vor.u32 %v419_v56, %v409_v0  ;;  %v4624_v17 = vld [vmem:[%s5464_s0 + $0xb0] sm:$0xff]  ;;  %v4629_v18 = vld [vmem:[%s5464_s0 + $0xb8] sm:$0xff]  ;;  %v451_v33 = vshrl.u32 %v3667_v4, 16  ;;  %v4641_v38 = vcombine.low %v53_v53, %v54_v58 }
  0x15   :  { %3963 = vmatpush3.bf16.msra.mxu1 %v4188_v20  ;;  %3870 = vmatprep.subr.bf16.mxu0 %v4189_v21  ;;  %v410_v19 = vsel %vm386_vm0, %v405_v8, %v409_v0  ;;  %v435_v21 = vshrl.u32 %v3665_v43, 16  ;;  %v4655_v51 = vcombine.low %v4363_v2, %v4573_v59  ;;  %v483_v57 = vshrl.u32 %v4639_v37, 16 }
  0x16   :  { %3964 = vmatprep.subr.bf16.mxu1 %v4190_v22  ;;  %v398_v20 = vsel %vm386_vm0, %v393_v9, %v397_v1  ;;  %v439_v22 = vshll.u32 %v3667_v4, 16  ;;  %1054 = vmatprep.mubr.bf16.mxu1 %v410_v19  ;;  %v463_v49 = vshll.u32 %v4641_v38, 16  ;;  %v4664_v61 = vcombine.low %v4598_v7, %v4603_v10 }
  0x17   :  { %v475_v0 = vshrl.u32 %v4641_v38, 16  ;;  %v4677_v8 = vcombine.low %v4608_v11, %v4613_v12 }
  0x18   :  { %3871 = vmatpush3.bf16.msra.mxu0 %v4191_v23  ;;  %v426_v23 = vsel %vm386_vm0, %v421_v13, %v425_v3  ;;  %v4660_v60 = vrot.slane %v463_v49, 1  ;;  %v539_v9 = vshrl.u32 %v4664_v61, 16  ;;  %v4682_v13 = vcombine.high %v4619_v16, %v4624_v17 }
  0x19   :  { %3965 = vmatpush3.bf16.msra.mxu1 %v4192_v24  ;;  %3872 = vmatprep.subr.bf16.mxu0 %v4193_v25  ;;  %v413_v24 = vor.u32 %v411_v14, %v397_v1  ;;  %v417_v25 = vrot.slane %v415_v15, 1  ;;  %v479_v1 = vshll.u32 %v4655_v51, 16 }
  0x1a   :  { %3966 = vmatprep.subr.bf16.mxu1 %v4194_v26  ;;  %v3666_v26 = vcombine.low %v49_v45, %v50_v46 }
  0x1c   :  { %3873 = vmatpush3.bf16.msra.mxu0 %v4195_v27  ;;  %v3669_v27 = vcombine.high %v51_v47, %v52_v52  ;;  %v443_v46 = vshrl.u32 %v3666_v26, 16 }
  0x1d   :  { %3967 = vmatpush3.bf16.msra.mxu1 %v4196_v28  ;;  %3874 = vmatprep.subr.bf16.mxu0 %v4197_v29  ;;  %v437_v28 = vor.u32 %v435_v21, %v425_v3  ;;  %v441_v29 = vrot.slane %v439_v22, 1  ;;  %v4672_v3 = vcombine.high %v4608_v11, %v4613_v12  ;;  %v543_v22 = vshll.u32 %v4677_v8, 16 }
  0x1e   :  { %3968 = vmatprep.subr.bf16.mxu1 %v4198_v30  ;;  %v427_v30 = vshrl.u32 %v4550_v44, 16  ;;  %v455_v34 = vshll.u32 %v3669_v27, 16  ;;  %v467_v48 = vshrl.u32 %v3669_v27, 16  ;;  %v567_v11 = vshll.u32 %v4682_v13, 16 }
  0x1f   :  { %v442_v35 = vsel %vm386_vm0, %v437_v28, %v441_v29  ;;  %v551_v21 = vshll.u32 %v4672_v3, 16  ;;  %v4693_v12 = vcombine.low %v4619_v16, %v4624_v17  ;;  %v579_v16 = vshrl.u32 %v4682_v13, 16 }
  0x20   :  { %3875 = vmatpush3.bf16.msra.mxu0 %v4199_v31  ;;  %v418_v31 = vsel %vm386_vm0, %v413_v24, %v417_v25  ;;  %v429_v39 = vor.u32 %v427_v30, %v417_v25  ;;  %v555_v24 = vshrl.u32 %v4677_v8, 16  ;;  %v4698_v25 = vcombine.high %v4629_v18, %v4363_v2 }
  0x21   :  { %3969 = vmatpush3.bf16.msra.mxu1 %v4200_v32  ;;  %v431_v32 = vshll.u32 %v3666_v26, 16  ;;  %v4701_v28 = vrot.slane %v551_v21, 1  ;;  %v545_v30 = vrot.slane %v543_v22, 1 }
  0x22   :  { %v583_v17 = vshll.u32 %v4698_v25, 16  ;;  %v595_v49 = vshrl.u32 %v4698_v25, 16 }
  0x23   :  { %918 = vmatmul.mubr.bf16.vlgmr.msra.gmra.mrb[0].mxu0 %v3634_v36  ;;  %v4637_v36 = vcombine.low %v51_v47, %v52_v52  ;;  %v433_v40 = vrot.slane %v431_v32, 1  ;;  %v471_v47 = vshll.u32 %v4639_v37, 16  ;;  %v559_v32 = vshll.u32 %v4693_v12, 16 }
  0x24   :  { %925 = vmatprep.mubr.bf16.mxu0 %v3663_v41  ;;  %1055 = vmatmul.mubr.bf16.vlgmr.msra.gmra.mrb[0].mxu1 %v398_v20  ;;  %v4646_v41 = vcombine.high %v4363_v2, %v4573_v59 }
  0x25   :  { %1062 = vmatprep.mubr.bf16.mxu1 %v426_v23  ;;  %v447_v45 = vshll.u32 %v4637_v36, 16  ;;  %v434_v50 = vsel %vm386_vm0, %v429_v39, %v433_v40  ;;  %v459_v54 = vshrl.u32 %v4637_v36, 16  ;;  %v445_v55 = vor.u32 %v443_v46, %v433_v40 }
  0x26   :  { %v473_v56 = vrot.slane %v471_v47, 1  ;;  %v563_v23 = vshrl.u32 %v4672_v3, 16  ;;  %v557_v39 = vor.u32 %v555_v24, %v545_v30  ;;  %v561_v40 = vrot.slane %v559_v32, 1 }
  0x27   :  { %v449_v53 = vrot.slane %v447_v45, 1  ;;  %v4716_v45 = vcombine.low %v4629_v18, %v4363_v2  ;;  %v571_v47 = vshrl.u32 %v4693_v12, 16 }
  0x28   :  { %v485_v19 = vor.u32 %v483_v57, %v473_v56 }
  0x29   :  { %v450_v14 = vsel %vm386_vm0, %v445_v55, %v449_v53  ;;  %v461_v15 = vor.u32 %v459_v54, %v449_v53  ;;  %v573_v18 = vor.u32 %v571_v47, %v561_v40  ;;  %v587_v53 = vshrl.u32 %v4716_v45, 16 }
  0x2b   :  { %926 = vmatmul.mubr.bf16.gmra.mrb[4].mxu0 %v3662_v42  ;;  %v453_v42 = vor.u32 %v451_v33, %v441_v29  ;;  %v3675_v33 = vcombine.high %v4578_v62, %v4583_v63  ;;  %v466_v54 = vsel %vm386_vm0, %v461_v15, %v4660_v60  ;;  %v477_v15 = vor.u32 %v475_v0, %v4660_v60 }
  0x2c   :  { %933 = vmatprep.mubr.bf16.mxu0 %v3665_v43  ;;  %1063 = vmatmul.mubr.bf16.gmra.mrb[4].mxu1 %v418_v31  ;;  %v457_v43 = vrot.slane %v455_v34, 1  ;;  %v569_v31 = vrot.slane %v567_v11, 1  ;;  %v3674_v11 = vcombine.low %v4578_v62, %v4583_v63 }
  0x2d   :  { %1070 = vmatprep.mubr.bf16.mxu1 %v442_v35  ;;  %v565_v35 = vor.u32 %v563_v23, %v4701_v28 }
  0x2e   :  { %v458_v52 = vsel %vm386_vm0, %v453_v42, %v457_v43  ;;  %v469_v58 = vor.u32 %v467_v48, %v457_v43  ;;  %v581_v42 = vor.u32 %v579_v16, %v569_v31  ;;  %v585_v43 = vrot.slane %v583_v17, 1 }
  0x2f   :  { %v4720_v46 = vsel %vm386_vm0, %v565_v35, %v569_v31 }
  0x33   :  { %934 = vmatmul.mubr.bf16.gmra.mrb[8].mxu0 %v4550_v44  ;;  %v487_v44 = vshll.u32 %v4646_v41, 16 }
  0x34   :  { %941 = vmatprep.mubr.bf16.mxu0 %v3667_v4  ;;  %1071 = vmatmul.mubr.bf16.gmra.mrb[8].mxu1 %v434_v50  ;;  %v527_v4 = vshll.u32 %v4664_v61, 16  ;;  %v4725_v50 = vsel %vm386_vm0, %v557_v39, %v561_v40 }
  0x35   :  { %1078 = vmatprep.mubr.bf16.mxu1 %v458_v52  ;;  %v4666_v59 = vrot.slane %v487_v44, 1  ;;  %v575_v44 = vshll.u32 %v4716_v45, 16  ;;  %v597_v52 = vor.u32 %v595_v49, %v585_v43 }
  0x36   :  { %v4685_v20 = vrot.slane %v527_v4, 1  ;;  %v503_v4 = vshll.u32 %v3675_v33, 16 }
  0x37   :  { %v577_v55 = vrot.slane %v575_v44, 1  ;;  %v490_v57 = vsel %vm386_vm0, %v485_v19, %v4666_v59  ;;  %v481_v19 = vrot.slane %v479_v1, 1 }
  0x38   :  { %v541_v29 = vor.u32 %v539_v9, %v4685_v20 }
  0x39   :  { %v589_v21 = vor.u32 %v587_v53, %v577_v55 }
  0x3a   :  { %v4710_v34 = vsel %vm386_vm0, %v541_v29, %v545_v30  ;;  %v3677_v29 = vcombine.high %v4588_v5, %v4593_v6 }
  0x3b   :  { %942 = vmatmul.mubr.bf16.gmra.mrb[12].mxu0 %v3666_v26  ;;  %v146_v26 = vld [vmem:[#allocation2 + $0xd0] sm:$0x11] }
  0x3c   :  { %949 = vmatprep.mubr.bf16.mxu0 %v3669_v27  ;;  %v474_v27 = vsel %vm386_vm0, %v469_v58, %v473_v56  ;;  %1079 = vmatmul.mubr.bf16.gmra.mrb[12].mxu1 %v450_v14  ;;  %v3687_v48 = vcombine.high %v146_v26, %v146_v26  ;;  %v3686_v2 = vcombine.low %v146_v26, %v146_v26  ;;  %v499_v58 = vshrl.u32 %v4646_v41, 16 }
  0x3d   :  { %1086 = vmatprep.mubr.bf16.mxu1 %v474_v27  ;;  %v4738_v14 = vsel %vm386_vm0, %v573_v18, %v577_v55  ;;  %v505_v27 = vrot.slane %v503_v4, 1 }
  0x3e   :  { %v591_v56 = vshll.u32 %v3686_v2, 16  ;;  %v501_v26 = vor.u32 %v499_v58, %v4666_v59 }
  0x40   :  { %v593_v22 = vrot.slane %v591_v56, 1 }
  0x42   :  { %v594_v24 = vsel %vm386_vm0, %v589_v21, %v593_v22 }
  0x43   :  { %950 = vmatmul.mubr.bf16.gmra.mrb[16].mxu0 %v4637_v36  ;;  %v4728_v36 = vsel %vm386_vm0, %v581_v42, %v585_v43 }
  0x44   :  { %957 = vmatprep.mubr.bf16.mxu0 %v4639_v37  ;;  %v599_v37 = vshll.u32 %v3687_v48, 16  ;;  %1087 = vmatmul.mubr.bf16.gmra.mrb[16].mxu1 %v466_v54 }
  0x45   :  { %1094 = vmatprep.mubr.bf16.mxu1 %v490_v57 }
  0x46   :  { %v601_v9 = vrot.slane %v599_v37, 1 }
  0x48   :  { %v4741_v23 = vsel %vm386_vm0, %v597_v52, %v601_v9 }
  0x4b   :  { %958 = vmatmul.mubr.bf16.gmra.mrb[20].mxu0 %v4641_v38 }
  0x4c   :  { %965 = vmatprep.mubr.bf16.mxu0 %v4646_v41 }
  0x4d   :  { %16 = vsyncpa [#allocation13], 0  ;;  %v482_v38 = vsel %vm386_vm0, %v477_v15, %v481_v19  ;;  %v491_v60 = vshrl.u32 %v4655_v51, 16  ;;  %v495_v0 = vshll.u32 %v3674_v11, 16  ;;  %v506_v1 = vsel %vm386_vm0, %v501_v26, %v505_v27  ;;  %s4369_s23 = smov [#allocation12]  }
  0x4e   :  { %v515_v30 = vshrl.u32 %v3675_v33, 16  ;;  %v519_v62 = vshll.u32 %v3677_v29, 16  ;;  %1095 = vmatmul.mubr.bf16.gmra.mrb[20].mxu1 %v482_v38  ;;  %v3676_v59 = vcombine.low %v4588_v5, %v4593_v6  ;;  %v3679_v16 = vcombine.high %v4598_v7, %v4603_v10  ;;  %s3611_s24 = sshll.u32 %s4369_s23, 4  ;;  %s3612_s24 = int_to_ptr.vmem [resolvable:$true] %s3611_s24 }
  0x4f   :  { %1102 = vmatprep.mubr.bf16.mxu1 %v506_v1  ;;  %v493_v63 = vor.u32 %v491_v60, %v481_v19  ;;  %v497_v41 = vrot.slane %v495_v0, 1  ;;  %v507_v35 = vshrl.u32 %v3674_v11, 16  ;;  %v531_v42 = vshrl.u32 %v3677_v29, 16  ;;  %p4344_p1 = scmp.lt.s32.totalorder %s3612_s24, %s3612_s24 }
  0x50   :  { %v517_v31 = vor.u32 %v515_v30, %v505_v27  ;;  %v521_v32 = vrot.slane %v519_v62, 1  ;;  %v511_v39 = vshll.u32 %v3676_v59, 16  ;;  %v535_v43 = vshll.u32 %v3679_v16, 16 }
  0x51   :  { %v498_v17 = vsel %vm386_vm0, %v493_v63, %v497_v41  ;;  %v523_v48 = vshrl.u32 %v3676_v59, 16  ;;  %v547_v10 = vshrl.u32 %v3679_v16, 16  ;;  %vm1657_vm1 = vcmask 1040384  }
  0x52   :  { %v522_v40 = vsel %vm386_vm0, %v517_v31, %v521_v32  ;;  %v513_v47 = vrot.slane %v511_v39, 1  ;;  %v533_v5 = vor.u32 %v531_v42, %v521_v32  ;;  %v537_v6 = vrot.slane %v535_v43, 1 }
  0x53   :  { %966 = vmatmul.mubr.bf16.gmra.mrb[24].mxu0 %v4655_v51  ;;  %v509_v51 = vor.u32 %v507_v35, %v497_v41  ;;  %vm1658_vm2 = vsmask.f32 256  ;;  %vm1663_vm3 = vcmask 1043456   ;;  %vm1664_vm5 = vsmask.f32 7938 }
  0x54   :  { %973 = vmatprep.mubr.bf16.mxu0 %v3675_v33  ;;  %v538_v7 = vsel %vm386_vm0, %v533_v5, %v537_v6  ;;  %v525_v49 = vor.u32 %v523_v48, %v513_v47  ;;  %v549_v44 = vor.u32 %v547_v10, %v537_v6  ;;  %vm4863_vm4 = vmand %vm1657_vm1, %vm1658_vm2  ;;  %vm1718_vm7 = vsmask.f32 4368 }
  0x55   :  { %v514_v33 = vsel %vm386_vm0, %v509_v51, %v513_v47  ;;  %vm4881_vm6 = vmand %vm1663_vm3, %vm1664_vm5  ;;  %vm1943_vm9 = vcmask 1046528   ;;  %vm2380_vm10 = vcmask 257024   ;;  %vm2382_vm11 = vcmask 253952  }
  0x56   :  { %1103 = vmatmul.mubr.bf16.gmra.mrb[24].mxu1 %v498_v17  ;;  %v530_v2 = vsel %vm386_vm0, %v525_v49, %v4685_v20  ;;  %v554_v18 = vsel %vm386_vm0, %v549_v44, %v4701_v28  ;;  %vm5056_vm8 = vmor %vm1658_vm2, %vm1718_vm7  ;;  %vm2161_vm14 = vcmask 261120   ;;  %vm4365_vm15 = vmmov 0  }
  0x57   :  { %1110 = vmatprep.mubr.bf16.mxu1 %v522_v40  ;;  %vm5091_vm12 = vmand %vm2382_vm11, %vm1658_vm2  ;;  %vm2568_vm0 = vcmask 523264   ;;  %vm2774_vm2 = vcmask 519168   ;;  %vm2776_vm3 = vcmask 516096  }
  0x58   :  { %vm5097_vm13 = vmand %vm2380_vm10, %vm1664_vm5  ;;  %vm2790_vm5 = vcmask 1044484  }
  0x5b   :  { %974 = vmatmul.mubr.bf16.gmra.mrb[28].mxu0 %v3674_v11 }
  0x5c   :  { %981 = vmatprep.mubr.bf16.mxu0 %v3677_v29 }
  0x5e   :  { %1111 = vmatmul.mubr.bf16.gmra.mrb[28].mxu1 %v514_v33 }
  0x5f   :  { %1118 = vmatprep.mubr.bf16.mxu1 %v538_v7 }
  0x63   :  { %982 = vmatmul.mubr.bf16.gmra.mrb[32].mxu0 %v3676_v59 }
  0x64   :  { %989 = vmatprep.mubr.bf16.mxu0 %v3679_v16 }
  0x66   :  { %1119 = vmatmul.mubr.bf16.gmra.mrb[32].mxu1 %v530_v2 }
  0x67   :  { %1126 = vmatprep.mubr.bf16.mxu1 %v554_v18 }
  0x6b   :  { %990 = vmatmul.mubr.bf16.gmra.mrb[36].mxu0 %v4664_v61  ;;  %v4225_v61 = vld [vmem:[%s5466_s2 + $0x40] sm:$0xff]  }
  0x6c   :  { %997 = vmatprep.mubr.bf16.mxu0 %v4672_v3  ;;  %4048 = vmatprep.subr.bf16.mxu0 %v4225_v61  ;;  %v4226_v3 = vld [vmem:[%s5466_s2] sm:$0xff]  }
  0x6d   :  { %4049 = vmatpush3.bf16.msra.mxu0 %v4226_v3 }
  0x6e   :  { %1127 = vmatmul.mubr.bf16.gmra.mrb[36].mxu1 %v4710_v34 }
  0x6f   :  { %1134 = vmatprep.mubr.bf16.mxu1 %v4720_v46 }
  0x73   :  { %998 = vmatmul.mubr.bf16.gmra.mrb[40].mxu0 %v4677_v8 }
  0x74   :  { %1005 = vmatprep.mubr.bf16.mxu0 %v4682_v13 }
  0x76   :  { %1135 = vmatmul.mubr.bf16.gmra.mrb[40].mxu1 %v4725_v50 }
  0x77   :  { %1142 = vmatprep.mubr.bf16.mxu1 %v4728_v36 }
  0x7b   :  { %1006 = vmatmul.mubr.bf16.gmra.mrb[44].mxu0 %v4693_v12 }
  0x7c   :  { %1013 = vmatprep.mubr.bf16.mxu0 %v4698_v25 }
  0x7e   :  { %1143 = vmatmul.mubr.bf16.gmra.mrb[44].mxu1 %v4738_v14 }
  0x7f   :  { %1150 = vmatprep.mubr.bf16.mxu1 %v4741_v23 }
  0x83   :  { %1014 = vmatmul.mubr.bf16.gmra.mrb[48].mxu0 %v4716_v45 }
  0x86   :  { %1151 = vmatmul.mubr.bf16.gmra.mrb[48].mxu1 %v594_v24 }
  0xf6   :  { %v3876_v8 = vpop.f32.mrb[0].mxu0 }
  0xf7   :  { %v3877_v13 = vpop.f32.mrb[1].mxu0  ;;  %v3970_v34 = vpop.f32.mrb[0].mxu1 }
  0xf8   :  { %v3878_v20 = vadd.f32 %v3877_v13, %v3876_v8  ;;  %v3879_v12 = vpop.f32.mrb[2].mxu0  ;;  %v3971_v46 = vpop.f32.mrb[1].mxu1 }
  0xf9   :  { %v3880_v25 = vpop.f32.mrb[3].mxu0  ;;  %v3972_v50 = vadd.f32 %v3971_v46, %v3970_v34  ;;  %v3973_v36 = vpop.f32.mrb[2].mxu1 }
  0xfa   :  { %v3881_v28 = vadd.f32 %v3880_v25, %v3879_v12  ;;  %v3974_v37 = vpop.f32.mrb[3].mxu1  ;;  %v4228_v25 = vld [vmem:[%s5466_s2 + $0x8] sm:$0xff]  }
  0xfb   :  { %v4791_v55 = vadd.f32 %v3972_v50, %v3878_v20  ;;  %v3975_v56 = vadd.f32 %v3974_v37, %v3973_v36  ;;  %v4227_v20 = vld [vmem:[%s5466_s2 + $0x48] sm:$0xff]  }
  0xfc   :  { %4050 = vmatprep.subr.bf16.mxu0 %v4227_v20  ;;  %v4237_v20 = vld [vmem:[%s5466_s2 + $0x70] sm:$0xff]  }
  0xfd   :  { %v4793_v4 = vadd.f32 %v3975_v56, %v3881_v28  ;;  %v1477_v18 = vmul.f32 %v4791_v55, %v4791_v55  ;;  %4051 = vmatpush3.bf16.msra.mxu0 %v4228_v25 }
  0xfe   :  { %v3882_v45 = vpop.f32.mrb[4].mxu0 }
  0xff   :  { %v3883_v52 = vpop.f32.mrb[5].mxu0  ;;  %v3976_v9 = vpop.f32.mrb[4].mxu1  ;;  %v1478_v33 = vmul.f32 %v4793_v4, %v4793_v4  ;;  %v1446_v8 = vadd.f32 %v4793_v4, %v4791_v55 }
 0x100   :  { %v3884_v53 = vadd.f32 %v3883_v52, %v3882_v45  ;;  %v3885_v54 = vpop.f32.mrb[6].mxu0  ;;  %v3977_v14 = vpop.f32.mrb[5].mxu1 }
 0x101   :  { %v3886_v57 = vpop.f32.mrb[7].mxu0  ;;  %v3978_v22 = vadd.f32 %v3977_v14, %v3976_v9  ;;  %v3979_v23 = vpop.f32.mrb[6].mxu1  ;;  %v1503_v12 = vadd.f32 %v1478_v33, %v1477_v18  ;;  %v4230_v14 = vld [vmem:[%s5466_s2 + $0x10] sm:$0xff]  }
 0x102   :  { %v3887_v58 = vadd.f32 %v3886_v57, %v3885_v54  ;;  %v3980_v19 = vpop.f32.mrb[7].mxu1  ;;  %v4229_v54 = vld [vmem:[%s5466_s2 + $0x50] sm:$0xff]  }
 0x103   :  { %v4795_v26 = vadd.f32 %v3978_v22, %v3884_v53  ;;  %v3981_v27 = vadd.f32 %v3980_v19, %v3979_v23  ;;  %4052 = vmatprep.subr.bf16.mxu0 %v4229_v54  ;;  %v1672_v54 = vld [vmem:[#allocation4 + $0x24] sm:$0xf] }
 0x104   :  { %4053 = vmatpush3.bf16.msra.mxu0 %v4230_v14  ;;  %v4239_v14 = vld [vmem:[%s5466_s2 + $0x78] sm:$0xff]  }
 0x105   :  { %v4797_v60 = vadd.f32 %v3981_v27, %v3887_v58  ;;  %v1479_v61 = vmul.f32 %v4795_v26, %v4795_v26  ;;  %v1447_v28 = vadd.f32 %v1446_v8, %v4795_v26 }
 0x106   :  { %v3888_v21 = vpop.f32.mrb[8].mxu0 }
 0x107   :  { %v3889_v15 = vpop.f32.mrb[9].mxu0  ;;  %v3982_v0 = vpop.f32.mrb[8].mxu1  ;;  %v1504_v46 = vadd.f32 %v1503_v12, %v1479_v61  ;;  %v1480_v45 = vmul.f32 %v4797_v60, %v4797_v60 }
 0x108   :  { %v3890_v11 = vadd.f32 %v3889_v15, %v3888_v21  ;;  %v3891_v24 = vpop.f32.mrb[10].mxu0  ;;  %v3983_v1 = vpop.f32.mrb[9].mxu1  ;;  %v1448_v21 = vadd.f32 %v1447_v28, %v4797_v60 }
 0x109   :  { %v3892_v29 = vpop.f32.mrb[11].mxu0  ;;  %v3984_v62 = vadd.f32 %v3983_v1, %v3982_v0  ;;  %v3985_v63 = vpop.f32.mrb[10].mxu1  ;;  %v1505_v19 = vadd.f32 %v1504_v46, %v1480_v45  ;;  %v4232_v1 = vld [vmem:[%s5466_s2 + $0x18] sm:$0xff]   ;;  %v4238_v46 = vld [vmem:[%s5466_s2 + $0x30] sm:$0xff]  }
 0x10a   :  { %v3893_v38 = vadd.f32 %v3892_v29, %v3891_v24  ;;  %v3986_v59 = vpop.f32.mrb[11].mxu1  ;;  %v4231_v29 = vld [vmem:[%s5466_s2 + $0x58] sm:$0xff]  }
 0x10b   :  { %v4799_v16 = vadd.f32 %v3984_v62, %v3890_v11  ;;  %v3987_v17 = vadd.f32 %v3986_v59, %v3985_v63  ;;  %4054 = vmatprep.subr.bf16.mxu0 %v4231_v29  ;;  %v4234_v59 = vld [vmem:[%s5466_s2 + $0x20] sm:$0xff]   ;;  %v1666_v45 = vld [vmem:[#allocation4 + $0x10] sm:$0xf] }
 0x10c   :  { %4055 = vmatpush3.bf16.msra.mxu0 %v4232_v1  ;;  %v4240_v1 = vld [vmem:[%s5466_s2 + $0x38] sm:$0xff]  }
 0x10d   :  { %v4801_v40 = vadd.f32 %v3987_v17, %v3893_v38  ;;  %v1481_v56 = vmul.f32 %v4799_v16, %v4799_v16  ;;  %v1449_v24 = vadd.f32 %v1448_v21, %v4799_v16  ;;  %v1673_v21 = vsel %vm4881_vm6, 0, %v1672_v54 }
 0x10e   :  { %v3894_v30 = vpop.f32.mrb[12].mxu0  ;;  %1674 = vst [vmem:[#allocation4 + $0x24] sm:$0xf] %v1673_v21 }
 0x10f   :  { %v3895_v41 = vpop.f32.mrb[13].mxu0  ;;  %v3988_v42 = vpop.f32.mrb[12].mxu1  ;;  %v1506_v38 = vadd.f32 %v1505_v19, %v1481_v56  ;;  %v1482_v0 = vmul.f32 %v4801_v40, %v4801_v40 }
 0x110   :  { %v3896_v31 = vadd.f32 %v3895_v41, %v3894_v30  ;;  %v3897_v32 = vpop.f32.mrb[14].mxu0  ;;  %v3989_v43 = vpop.f32.mrb[13].mxu1  ;;  %v4233_v41 = vld [vmem:[%s5466_s2 + $0x60] sm:$0xff]  }
 0x111   :  { %v3898_v35 = vpop.f32.mrb[15].mxu0  ;;  %v3990_v47 = vadd.f32 %v3989_v43, %v3988_v42  ;;  %v3991_v5 = vpop.f32.mrb[14].mxu1  ;;  %v4235_v42 = vld [vmem:[%s5466_s2 + $0x68] sm:$0xff]   ;;  %v1507_v43 = vadd.f32 %v1506_v38, %v1482_v0  ;;  %4056 = vmatprep.subr.bf16.mxu0 %v4233_v41 }
 0x112   :  { %v3899_v39 = vadd.f32 %v3898_v35, %v3897_v32  ;;  %v3992_v48 = vpop.f32.mrb[15].mxu1  ;;  %4057 = vmatpush3.bf16.msra.mxu0 %v4234_v59 }
 0x113   :  { %v4805_v49 = vadd.f32 %v3990_v47, %v3896_v31  ;;  %v3993_v44 = vadd.f32 %v3992_v48, %v3991_v5  ;;  %v1450_v31 = vadd.f32 %v1449_v24, %v4801_v40  ;;  %4058 = vmatprep.subr.bf16.mxu0 %v4235_v42 }
 0x115   :  { %v4813_v13 = vadd.f32 %v3993_v44, %v3899_v39  ;;  %v1483_v32 = vmul.f32 %v4805_v49, %v4805_v49  ;;  %v1451_v5 = vadd.f32 %v1450_v31, %v4805_v49 }
 0x116   :  { %v3900_v51 = vpop.f32.mrb[16].mxu0 }
 0x117   :  { %v3901_v6 = vpop.f32.mrb[17].mxu0  ;;  %v3994_v34 = vpop.f32.mrb[16].mxu1  ;;  %v1508_v61 = vadd.f32 %v1507_v43, %v1483_v32  ;;  %v1452_v25 = vadd.f32 %v1451_v5, %v4813_v13 }
 0x118   :  { %v3902_v7 = vadd.f32 %v3901_v6, %v3900_v51  ;;  %v3903_v10 = vpop.f32.mrb[18].mxu0  ;;  %v3995_v50 = vpop.f32.mrb[17].mxu1 }
 0x119   :  { %v3904_v2 = vpop.f32.mrb[19].mxu0  ;;  %v3996_v52 = vadd.f32 %v3995_v50, %v3994_v34  ;;  %v3997_v37 = vpop.f32.mrb[18].mxu1  ;;  %v1669_v50 = vld [vmem:[#allocation4 + $0x14] sm:$0x1] }
 0x11a   :  { %v3905_v3 = vadd.f32 %v3904_v2, %v3903_v10  ;;  %v3998_v57 = vpop.f32.mrb[19].mxu1  ;;  %v1660_v10 = vld [vmem:[#allocation4] sm:$0x1] }
 0x11b   :  { %v4833_v22 = vadd.f32 %v3996_v52, %v3902_v7  ;;  %v3999_v23 = vadd.f32 %v3998_v57, %v3997_v37  ;;  %v4236_v2 = vld [vmem:[%s5466_s2 + $0x28] sm:$0xff]   ;;  %v1661_v18 = vsel %vm4863_vm4, 0, %v1660_v10  ;;  %v1667_v37 = vsel %vm4881_vm6, 0, %v1666_v45 }
 0x11c   :  { %1662 = vst [vmem:[#allocation4] sm:$0x1] %v1661_v18  ;;  %4059 = vmatpush3.bf16.msra.mxu0 %v4236_v2  ;;  %1668 = vst [vmem:[#allocation4 + $0x10] sm:$0xf] %v1667_v37 }
 0x11d   :  { %v4836_v27 = vadd.f32 %v3999_v23, %v3905_v3  ;;  %v1484_v3 = vmul.f32 %v4813_v13, %v4813_v13  ;;  %v1485_v28 = vmul.f32 %v4833_v22, %v4833_v22  ;;  %v1453_v57 = vadd.f32 %v1452_v25, %v4833_v22  ;;  %4060 = vmatprep.subr.bf16.mxu0 %v4237_v20 }
 0x11e   :  { %v3906_v36 = vpop.f32.mrb[20].mxu0 }
 0x11f   :  { %v3907_v53 = vpop.f32.mrb[21].mxu0  ;;  %v1509_v56 = vadd.f32 %v1508_v61, %v1484_v3  ;;  %v1486_v24 = vmul.f32 %v4836_v27, %v4836_v27 }
 0x120   :  { %v3908_v58 = vadd.f32 %v3907_v53, %v3906_v36  ;;  %v3909_v9 = vpop.f32.mrb[22].mxu0  ;;  %v1670_v53 = vsel %vm4863_vm4, 0, %v1669_v50  ;;  %4061 = vmatpush3.bf16.msra.mxu0 %v4238_v46 }
 0x121   :  { %v3910_v15 = vpop.f32.mrb[23].mxu0  ;;  %v4000_v30 = vpop.f32.mrb[20].mxu1  ;;  %1671 = vst [vmem:[#allocation4 + $0x14] sm:$0x1] %v1670_v53  ;;  %4062 = vmatprep.subr.bf16.mxu0 %v4239_v14 }
 0x122   :  { %v3911_v11 = vadd.f32 %v3910_v15, %v3909_v9  ;;  %v4001_v62 = vpop.f32.mrb[21].mxu1 }
 0x123   :  { %v4002_v17 = vadd.f32 %v4001_v62, %v4000_v30  ;;  %v4003_v35 = vpop.f32.mrb[22].mxu1  ;;  %v1454_v30 = vadd.f32 %v1453_v57, %v4836_v27 }
 0x124   :  { %v4004_v51 = vpop.f32.mrb[23].mxu1  ;;  %4063 = vmatpush3.bf16.msra.mxu0 %v4240_v1 }
 0x125   :  { %v4859_v6 = vadd.f32 %v4002_v17, %v3908_v58  ;;  %v4005_v33 = vadd.f32 %v4004_v51, %v4003_v35 }
 0x126   :  { %v3912_v63 = vpop.f32.mrb[24].mxu0 }
 0x127   :  { %v3913_v39 = vpop.f32.mrb[25].mxu0  ;;  %v4874_v8 = vadd.f32 %v4005_v33, %v3911_v11  ;;  %v1510_v11 = vadd.f32 %v1509_v56, %v1485_v28  ;;  %v1487_v62 = vmul.f32 %v4859_v6, %v4859_v6  ;;  %v1455_v59 = vadd.f32 %v1454_v30, %v4859_v6 }
 0x128   :  { %v3915_v47 = vpop.f32.mrb[26].mxu0 }
 0x129   :  { %v3916_v48 = vpop.f32.mrb[27].mxu0  ;;  %v4006_v34 = vpop.f32.mrb[24].mxu1  ;;  %v1511_v41 = vadd.f32 %v1510_v11, %v1486_v24  ;;  %v1488_v39 = vmul.f32 %v4874_v8, %v4874_v8  ;;  %v1456_v18 = vadd.f32 %v1455_v59, %v4874_v8 }
 0x12a   :  { %v3917_v44 = vadd.f32 %v3916_v48, %v3915_v47  ;;  %v4007_v36 = vpop.f32.mrb[25].mxu1 }
 0x12b   :  { %v4009_v58 = vpop.f32.mrb[26].mxu1  ;;  %v1512_v35 = vadd.f32 %v1511_v41, %v1487_v62 }
 0x12c   :  { %v4010_v23 = vpop.f32.mrb[27].mxu1 }
 0x12d   :  { %v4011_v29 = vadd.f32 %v4010_v23, %v4009_v58  ;;  %v1513_v28 = vadd.f32 %v1512_v35, %v1488_v39 }
 0x12e   :  { %v3918_v52 = vpop.f32.mrb[28].mxu0 }
 0x12f   :  { %v3919_v9 = vpop.f32.mrb[29].mxu0  ;;  %v4909_v63 = vadd.f32 %v4011_v29, %v3917_v44 }
 0x130   :  { %v3920_v15 = vadd.f32 %v3919_v9, %v3918_v52  ;;  %v3921_v19 = vpop.f32.mrb[30].mxu0 }
 0x131   :  { %v3922_v38 = vpop.f32.mrb[31].mxu0  ;;  %v4012_v31 = vpop.f32.mrb[28].mxu1  ;;  %v1490_v48 = vmul.f32 %v4909_v63, %v4909_v63  ;;  %v1458_v20 = vadd.f32 %v1456_v18, %v4909_v63 }
 0x132   :  { %v3923_v0 = vadd.f32 %v3922_v38, %v3921_v19  ;;  %v4013_v32 = vpop.f32.mrb[29].mxu1 }
 0x133   :  { %v4014_v42 = vadd.f32 %v4013_v32, %v4012_v31  ;;  %v4015_v43 = vpop.f32.mrb[30].mxu1  ;;  %v1515_v45 = vadd.f32 %v1513_v28, %v1490_v48 }
 0x134   :  { %v4016_v47 = vpop.f32.mrb[31].mxu1 }
 0x135   :  { %v4916_v10 = vadd.f32 %v4014_v42, %v3920_v15  ;;  %v4017_v44 = vadd.f32 %v4016_v47, %v4015_v43 }
 0x136   :  { %v3924_v17 = vpop.f32.mrb[32].mxu0 }
 0x137   :  { %v3925_v51 = vpop.f32.mrb[33].mxu0  ;;  %v4919_v3 = vadd.f32 %v4017_v44, %v3923_v0  ;;  %v1491_v25 = vmul.f32 %v4916_v10, %v4916_v10  ;;  %v1459_v46 = vadd.f32 %v1458_v20, %v4916_v10 }
 0x138   :  { %v3926_v5 = vadd.f32 %v3925_v51, %v3924_v17  ;;  %v3927_v33 = vpop.f32.mrb[34].mxu0 }
 0x139   :  { %v3928_v2 = vpop.f32.mrb[35].mxu0  ;;  %v4018_v34 = vpop.f32.mrb[32].mxu1  ;;  %v1492_v54 = vmul.f32 %v4919_v3, %v4919_v3  ;;  %v1516_v56 = vadd.f32 %v1515_v45, %v1491_v25  ;;  %v1460_v15 = vadd.f32 %v1459_v46, %v4919_v3 }
 0x13a   :  { %v3929_v61 = vadd.f32 %v3928_v2, %v3927_v33  ;;  %v4019_v50 = vpop.f32.mrb[33].mxu1 }
 0x13b   :  { %v4020_v52 = vadd.f32 %v4019_v50, %v4018_v34  ;;  %v4021_v37 = vpop.f32.mrb[34].mxu1  ;;  %v1517_v38 = vadd.f32 %v1516_v56, %v1492_v54 }
 0x13c   :  { %v4022_v57 = vpop.f32.mrb[35].mxu1 }
 0x13d   :  { %v4927_v14 = vadd.f32 %v4020_v52, %v3926_v5  ;;  %v4023_v21 = vadd.f32 %v4022_v57, %v4021_v37 }
 0x13e   :  { %v3930_v36 = vpop.f32.mrb[36].mxu0 }
 0x13f   :  { %v3931_v53 = vpop.f32.mrb[37].mxu0  ;;  %v4930_v11 = vadd.f32 %v4023_v21, %v3929_v61  ;;  %v1461_v24 = vadd.f32 %v1460_v15, %v4927_v14  ;;  %v1493_v29 = vmul.f32 %v4927_v14, %v4927_v14 }
 0x140   :  { %v3932_v58 = vadd.f32 %v3931_v53, %v3930_v36  ;;  %v3933_v9 = vpop.f32.mrb[38].mxu0 }
 0x141   :  { %v3934_v23 = vpop.f32.mrb[39].mxu0  ;;  %v4024_v0 = vpop.f32.mrb[36].mxu1  ;;  %v1462_v1 = vadd.f32 %v1461_v24, %v4930_v11  ;;  %v1494_v30 = vmul.f32 %v4930_v11, %v4930_v11  ;;  %v1518_v62 = vadd.f32 %v1517_v38, %v1493_v29 }
 0x142   :  { %v3935_v19 = vadd.f32 %v3934_v23, %v3933_v9  ;;  %v4025_v41 = vpop.f32.mrb[37].mxu1 }
 0x143   :  { %v4026_v31 = vadd.f32 %v4025_v41, %v4024_v0  ;;  %v4027_v32 = vpop.f32.mrb[38].mxu1  ;;  %v1519_v35 = vadd.f32 %v1518_v62, %v1494_v30 }
 0x144   :  { %v4028_v39 = vpop.f32.mrb[39].mxu1 }
 0x145   :  { %v4938_v51 = vadd.f32 %v4026_v31, %v3932_v58  ;;  %v4029_v47 = vadd.f32 %v4028_v39, %v4027_v32 }
 0x146   :  { %v3936_v59 = vpop.f32.mrb[40].mxu0 }
 0x147   :  { %v3937_v17 = vpop.f32.mrb[41].mxu0  ;;  %v4940_v48 = vadd.f32 %v4029_v47, %v3935_v19  ;;  %v1463_v44 = vadd.f32 %v1462_v1, %v4938_v51  ;;  %v1495_v2 = vmul.f32 %v4938_v51, %v4938_v51 }
 0x148   :  { %v3938_v42 = vadd.f32 %v3937_v17, %v3936_v59  ;;  %v3939_v43 = vpop.f32.mrb[42].mxu0 }
 0x149   :  { %v3940_v5 = vpop.f32.mrb[43].mxu0  ;;  %v4030_v18 = vpop.f32.mrb[40].mxu1  ;;  %v1464_v61 = vadd.f32 %v1463_v44, %v4940_v48  ;;  %v1496_v20 = vmul.f32 %v4940_v48, %v4940_v48  ;;  %v1520_v25 = vadd.f32 %v1519_v35, %v1495_v2 }
 0x14a   :  { %v3941_v33 = vadd.f32 %v3940_v5, %v3939_v43  ;;  %v4031_v28 = vpop.f32.mrb[41].mxu1 }
 0x14b   :  { %v4032_v46 = vadd.f32 %v4031_v28, %v4030_v18  ;;  %v4033_v45 = vpop.f32.mrb[42].mxu1  ;;  %v1521_v36 = vadd.f32 %v1520_v25, %v1496_v20 }
 0x14c   :  { %v4034_v52 = vpop.f32.mrb[43].mxu1 }
 0x14d   :  { %v4948_v54 = vadd.f32 %v4032_v46, %v3938_v42  ;;  %v4035_v56 = vadd.f32 %v4034_v52, %v4033_v45 }
 0x14e   :  { %v3942_v34 = vpop.f32.mrb[44].mxu0 }
 0x14f   :  { %v3943_v50 = vpop.f32.mrb[45].mxu0  ;;  %v4950_v9 = vadd.f32 %v4035_v56, %v3941_v33  ;;  %v1465_v21 = vadd.f32 %v1464_v61, %v4948_v54  ;;  %v1497_v23 = vmul.f32 %v4948_v54, %v4948_v54 }
 0x150   :  { %v3944_v37 = vadd.f32 %v3943_v50, %v3942_v34  ;;  %v3945_v53 = vpop.f32.mrb[46].mxu0 }
 0x151   :  { %v3946_v57 = vpop.f32.mrb[47].mxu0  ;;  %v4036_v15 = vpop.f32.mrb[44].mxu1  ;;  %v1466_v19 = vadd.f32 %v1465_v21, %v4950_v9  ;;  %v1498_v24 = vmul.f32 %v4950_v9, %v4950_v9  ;;  %v1522_v29 = vadd.f32 %v1521_v36, %v1497_v23 }
 0x152   :  { %v3947_v58 = vadd.f32 %v3946_v57, %v3945_v53  ;;  %v4037_v38 = vpop.f32.mrb[45].mxu1 }
 0x153   :  { %v4038_v1 = vadd.f32 %v4037_v38, %v4036_v15  ;;  %v4039_v30 = vpop.f32.mrb[46].mxu1  ;;  %v1523_v41 = vadd.f32 %v1522_v29, %v1498_v24 }
 0x154   :  { %v4040_v59 = vpop.f32.mrb[47].mxu1 }
 0x155   :  { %v1145_v17 = vadd.f32 %v4038_v1, %v3944_v37  ;;  %v4041_v35 = vadd.f32 %v4040_v59, %v4039_v30 }
 0x156   :  { %v3948_v0 = vpop.f32.mrb[48].mxu0 }
 0x157   :  { %v3949_v62 = vpop.f32.mrb[49].mxu0  ;;  %v1148_v42 = vadd.f32 %v4041_v35, %v3947_v58  ;;  %v1467_v43 = vadd.f32 %v1466_v19, %v1145_v17  ;;  %v1499_v47 = vmul.f32 %v1145_v17, %v1145_v17 }
 0x158   :  { %v3950_v31 = vadd.f32 %v3949_v62, %v3948_v0  ;;  %v3951_v32 = vpop.f32.mrb[50].mxu0 }
 0x159   :  { %v3952_v39 = vpop.f32.mrb[51].mxu0  ;;  %v4042_v5 = vpop.f32.mrb[48].mxu1  ;;  %v1468_v33 = vadd.f32 %v1467_v43, %v1148_v42  ;;  %v1500_v44 = vmul.f32 %v1148_v42, %v1148_v42  ;;  %v1524_v2 = vadd.f32 %v1523_v41, %v1499_v47  ;;  %v1544_v41 = vlaneseq  ;;  %v93_v43 = vld [vmem:[%s5470_s6 + $0x1] sm:$0x1] }
 0x15a   :  { %v4043_v18 = vpop.f32.mrb[49].mxu1 }
 0x15b   :  { %v4044_v61 = vadd.f32 %v4043_v18, %v4042_v5  ;;  %v1525_v20 = vadd.f32 %v1524_v2, %v1500_v44  ;;  %v4045_v25 = vpop.f32.mrb[50].mxu1  ;;  %v4958_v59 = vshrl.u32 %v1544_v41, 7 }
 0x15c   :  { %v4046_v28 = vpop.f32.mrb[51].mxu1 }
 0x15d   :  { %v1153_v34 = vadd.f32 %v4044_v61, %v3950_v31  ;;  %v92_v31 = vld [vmem:[%s5470_s6] sm:$0x1]  ;;  %v4964_v32 = vsub.s32 0, %v4958_v59 }
 0x15f   :  { %v1469_v46 = vadd.f32 %v1468_v33, %v1153_v34  ;;  %v1501_v45 = vmul.f32 %v1153_v34, %v1153_v34 }
 0x161   :  { %v1471_v50 = vrot.slane %v1469_v46, 4  ;;  %v1526_v36 = vadd.f32 %v1525_v20, %v1501_v45 }
 0x163   :  { %v1472_v52 = vadd.f32 %v1471_v50, %v1469_v46  ;;  %v1528_v37 = vrot.slane %v1526_v36, 4 }
 0x165   :  { %v1473_v53 = vrot.slane %v1472_v52, 2  ;;  %v1529_v56 = vadd.f32 %v1528_v37, %v1526_v36 }
 0x167   :  { %v1474_v57 = vadd.f32 %v1473_v53, %v1472_v52  ;;  %v1530_v58 = vrot.slane %v1529_v56, 2 }
 0x169   :  { %v1475_v21 = vrot.slane %v1474_v57, 1  ;;  %v1531_v23 = vadd.f32 %v1530_v58, %v1529_v56 }
 0x16b   :  { %v1476_v15 = vadd.f32 %v1475_v21, %v1474_v57  ;;  %v1532_v19 = vrot.slane %v1531_v23, 1 }
 0x16d   :  { %v1533_v24 = vadd.f32 %v1532_v19, %v1531_v23  ;;  %v1534_v29 = vmul.f32 0.0052083335, %v1476_v15 }
 0x16f   :  { %v1535_v38 = vmul.f32 0.0052083335, %v1533_v24  ;;  %v1536_v0 = vmul.f32 %v1534_v29, %v1534_v29 }
 0x171   :  { %v1537_v1 = vsub.f32 %v1535_v38, %v1536_v0 }
 0x173   :  { %v1538_v30 = vmax.f32 %v1537_v1, 0.0 }
 0x175   :  { %v1539_v62 = vadd.f32 1e-05, %v1538_v30 }
 0x177   :  { %4326 = vrsqrt.f32 %v1539_v62 }
 0x181   :  { %v4327_v35 = vpop.eup %4326 }
 0x182   :  { %v1541_v39 = vmul.f32 %v4327_v35, %v92_v31 }
 0x184   :  { %v1542_v47 = vmul.f32 %v1541_v39, %v1534_v29  ;;  %v4970_v5 = vrot.slane %v1541_v39, %v4964_v32 }
 0x186   :  { %v1543_v33 = vsub.f32 %v93_v43, %v1542_v47  ;;  %v1564_v44 = vmul.f32 %v4970_v5, %v4927_v14  ;;  %v1565_v2 = vmul.f32 %v4970_v5, %v4930_v11  ;;  %v1566_v18 = vmul.f32 %v4970_v5, %v4938_v51 }
 0x187   :  { %v1567_v61 = vmul.f32 %v4970_v5, %v4940_v48  ;;  %v1568_v20 = vmul.f32 %v4970_v5, %v4948_v54  ;;  %v1569_v25 = vmul.f32 %v4970_v5, %v4950_v9  ;;  %v1570_v28 = vmul.f32 %v4970_v5, %v1145_v17 }
 0x188   :  { %v1571_v46 = vmul.f32 %v4970_v5, %v1148_v42  ;;  %v1572_v14 = vmul.f32 %v4970_v5, %v1153_v34  ;;  %v4988_v11 = vrot.slane %v1543_v33, %v4964_v32  ;;  %v1548_v51 = vmul.f32 %v4970_v5, %v4791_v55 }
 0x189   :  { %v1549_v48 = vmul.f32 %v4970_v5, %v4793_v4  ;;  %v1550_v54 = vmul.f32 %v4970_v5, %v4795_v26  ;;  %v1551_v15 = vmul.f32 %v4970_v5, %v4797_v60  ;;  %v1552_v19 = vmul.f32 %v4970_v5, %v4799_v16 }
 0x18a   :  { %v1594_v9 = vadd.f32 %v4988_v11, %v1564_v44  ;;  %v1595_v17 = vadd.f32 %v4988_v11, %v1565_v2  ;;  %v1596_v42 = vadd.f32 %v4988_v11, %v1566_v18  ;;  %v1597_v34 = vadd.f32 %v4988_v11, %v1567_v61 }
 0x18b   :  { %v1598_v45 = vadd.f32 %v4988_v11, %v1568_v20  ;;  %v1599_v50 = vadd.f32 %v4988_v11, %v1569_v25  ;;  %v1600_v55 = vadd.f32 %v4988_v11, %v1570_v28  ;;  %v1601_v36 = vadd.f32 %v4988_v11, %v1571_v46 }
 0x18c   :  { %v1602_v4 = vadd.f32 %v4988_v11, %v1572_v14  ;;  %v1620_v52 = vmax.f32 %v1594_v9, 0.0  ;;  %v1621_v26 = vmax.f32 %v1595_v17, 0.0  ;;  %v1622_v37 = vmax.f32 %v1596_v42, 0.0 }
 0x18d   :  { %v1623_v53 = vmax.f32 %v1597_v34, 0.0  ;;  %v1624_v56 = vmax.f32 %v1598_v45, 0.0  ;;  %v1625_v57 = vmax.f32 %v1599_v50, 0.0  ;;  %v1626_v58 = vmax.f32 %v1600_v55, 0.0 }
 0x18e   :  { %v1627_v21 = vmax.f32 %v1601_v36, 0.0  ;;  %v1628_v23 = vmax.f32 %v1602_v4, 0.0  ;;  %1646 = vst [vmem:[#allocation3 + $0x80] sm:$0xff] %v1620_v52  ;;  %1647 = vst [vmem:[#allocation3 + $0x88] sm:$0xff] %v1621_v26  ;;  %v1553_v24 = vmul.f32 %v4970_v5, %v4801_v40  ;;  %v1554_v29 = vmul.f32 %v4970_v5, %v4805_v49 }
 0x18f   :  { %1648 = vst [vmem:[#allocation3 + $0x90] sm:$0xff] %v1622_v37  ;;  %1649 = vst [vmem:[#allocation3 + $0x98] sm:$0xff] %v1623_v53  ;;  %v1555_v38 = vmul.f32 %v4970_v5, %v4813_v13  ;;  %v1556_v0 = vmul.f32 %v4970_v5, %v4833_v22  ;;  %v1557_v60 = vmul.f32 %v4970_v5, %v4836_v27 }
 0x190   :  { %1650 = vst [vmem:[#allocation3 + $0xa0] sm:$0xff] %v1624_v56  ;;  %1651 = vst [vmem:[#allocation3 + $0xa8] sm:$0xff] %v1625_v57  ;;  %v1558_v16 = vmul.f32 %v4970_v5, %v4859_v6  ;;  %v1559_v40 = vmul.f32 %v4970_v5, %v4874_v8  ;;  %v1578_v1 = vadd.f32 %v4988_v11, %v1548_v51 }
 0x191   :  { %1652 = vst [vmem:[#allocation3 + $0xb0] sm:$0xff] %v1626_v58  ;;  %1653 = vst [vmem:[#allocation3 + $0xb8] sm:$0xff] %v1627_v21  ;;  %v1579_v30 = vadd.f32 %v4988_v11, %v1549_v48  ;;  %v1580_v49 = vadd.f32 %v4988_v11, %v1550_v54  ;;  %v1581_v13 = vadd.f32 %v4988_v11, %v1551_v15 }
 0x192   :  { %1654 = vst [vmem:[#allocation3 + $0xc0] sm:$0xff] %v1628_v23  ;;  %v1582_v62 = vadd.f32 %v4988_v11, %v1552_v19  ;;  %v1583_v22 = vadd.f32 %v4988_v11, %v1553_v24  ;;  %v1584_v27 = vadd.f32 %v4988_v11, %v1554_v29  ;;  %v1585_v41 = vadd.f32 %v4988_v11, %v1555_v38 }
 0x193   :  { %v1586_v6 = vadd.f32 %v4988_v11, %v1556_v0  ;;  %v1587_v8 = vadd.f32 %v4988_v11, %v1557_v60  ;;  %v1588_v31 = vadd.f32 %v4988_v11, %v1558_v16  ;;  %v1589_v35 = vadd.f32 %v4988_v11, %v1559_v40  ;;  %v1859_v16 = vld [vmem:[#allocation4 + $0x24] sm:$0x1] }
 0x194   :  { %v1604_v39 = vmax.f32 %v1578_v1, 0.0  ;;  %v1605_v43 = vmax.f32 %v1579_v30, 0.0  ;;  %v1606_v47 = vmax.f32 %v1580_v49, 0.0  ;;  %v1607_v33 = vmax.f32 %v1581_v13, 0.0 }
 0x195   :  { %v1608_v44 = vmax.f32 %v1582_v62, 0.0  ;;  %v1609_v2 = vmax.f32 %v1583_v22, 0.0  ;;  %v1610_v18 = vmax.f32 %v1584_v27, 0.0  ;;  %v1611_v61 = vmax.f32 %v1585_v41, 0.0 }
 0x196   :  { %v1612_v20 = vmax.f32 %v1586_v6, 0.0  ;;  %1630 = vst [vmem:[#allocation3] sm:$0xff] %v1604_v39  ;;  %1631 = vst [vmem:[#allocation3 + $0x8] sm:$0xff] %v1605_v43  ;;  %v1561_v46 = vmul.f32 %v4970_v5, %v4909_v63  ;;  %v1562_v14 = vmul.f32 %v4970_v5, %v4916_v10  ;;  %v1563_v51 = vmul.f32 %v4970_v5, %v4919_v3  ;;  %v1772_v48 = vld [vmem:[#allocation3 + $0x80] ss:$3 sm:$0xff] }
 0x197   :  { %1632 = vst [vmem:[#allocation3 + $0x10] sm:$0xff] %v1606_v47  ;;  %1633 = vst [vmem:[#allocation3 + $0x18] sm:$0xff] %v1607_v33  ;;  %v1613_v9 = vmax.f32 %v1587_v8, 0.0  ;;  %v1614_v17 = vmax.f32 %v1588_v31, 0.0  ;;  %v1615_v42 = vmax.f32 %v1589_v35, 0.0 }
 0x198   :  { %1634 = vst [vmem:[#allocation3 + $0x20] sm:$0xff] %v1608_v44  ;;  %1635 = vst [vmem:[#allocation3 + $0x28] sm:$0xff] %v1609_v2  ;;  %v1774_v34 = vld [vmem:[#allocation3 + $0x98] ss:$3 sm:$0xff]  ;;  %v1591_v50 = vadd.f32 %v4988_v11, %v1561_v46  ;;  %v1592_v63 = vadd.f32 %v4988_v11, %v1562_v14  ;;  %v1593_v10 = vadd.f32 %v4988_v11, %v1563_v51  ;;  %v1782_v36 = vld [vmem:[#allocation3 + $0x99] ss:$3 sm:$0xff] }
 0x199   :  { %v1776_v25 = vld [vmem:[#allocation3 + $0xb0] ss:$3 sm:$0xff]  ;;  %v1784_v28 = vld [vmem:[#allocation3 + $0xb1] ss:$3 sm:$0xff]  ;;  %1636 = vst [vmem:[#allocation3 + $0x30] sm:$0xff] %v1610_v18  ;;  %1637 = vst [vmem:[#allocation3 + $0x38] sm:$0xff] %v1611_v61  ;;  %v1787_v4 = vmax.f32 %v1774_v34, %v1782_v36 }
 0x19a   :  { %v1788_v54 = vmax.f32 %v1776_v25, %v1784_v28  ;;  %1638 = vst [vmem:[#allocation3 + $0x40] sm:$0xff] %v1612_v20  ;;  %v1796_v45 = vld [vmem:[#allocation3 + $0xb2] ss:$3 sm:$0xff]  ;;  %1639 = vst [vmem:[#allocation3 + $0x48] sm:$0xff] %v1613_v9  ;;  %v1617_v52 = vmax.f32 %v1591_v50, 0.0  ;;  %v1618_v26 = vmax.f32 %v1592_v63, 0.0 }
 0x19b   :  { %v1780_v55 = vld [vmem:[#allocation3 + $0x81] ss:$3 sm:$0xff]  ;;  %1640 = vst [vmem:[#allocation3 + $0x50] sm:$0xff] %v1614_v17  ;;  %1641 = vst [vmem:[#allocation3 + $0x58] sm:$0xff] %v1615_v42  ;;  %v1619_v37 = vmax.f32 %v1593_v10, 0.0 }
 0x19c   :  { %v1800_v3 = vmax.f32 %v1788_v54, %v1796_v45  ;;  %v1786_v5 = vmax.f32 %v1772_v48, %v1780_v55  ;;  %v1792_v53 = vld [vmem:[#allocation3 + $0x82] ss:$3 sm:$0xff]  ;;  %1643 = vst [vmem:[#allocation3 + $0x68] sm:$0xff] %v1617_v52  ;;  %1644 = vst [vmem:[#allocation3 + $0x70] sm:$0xff] %v1618_v26  ;;  %v1794_v58 = vld [vmem:[#allocation3 + $0x9a] ss:$3 sm:$0xff] }
 0x19d   :  { %1645 = vst [vmem:[#allocation3 + $0x78] sm:$0xff] %v1619_v37  ;;  %v1799_v19 = vmax.f32 %v1787_v4, %v1794_v58  ;;  %v1760_v52 = vld [vmem:[#allocation4] sm:$0xf] }
 0x19e   :  { %v3836_v56 = vpack.c.bf16 %v1800_v3, %v1800_v3  ;;  %v1798_v57 = vmax.f32 %v1786_v5, %v1792_v53  ;;  %v1675_v23 = vld [vmem:[#allocation3] ss:$3 sm:$0xff]  ;;  %v1683_v15 = vld [vmem:[#allocation3 + $0x1] ss:$3 sm:$0xff]  ;;  %v1695_v49 = vld [vmem:[#allocation3 + $0x2] ss:$3 sm:$0xff] }
 0x19f   :  { %v1677_v29 = vld [vmem:[#allocation3 + $0x18] ss:$3 sm:$0xff]  ;;  %v1685_v0 = vld [vmem:[#allocation3 + $0x19] ss:$3 sm:$0xff]  ;;  %v1690_v60 = vmax.f32 %v1675_v23, %v1683_v15  ;;  %v1697_v41 = vld [vmem:[#allocation3 + $0x1a] ss:$3 sm:$0xff]  ;;  %v5044_v43 = vpack.c.bf16 %v1799_v19, %v1799_v19 }
 0x1a0   :  { %v1840_v21 = vshrl.u32 %v3836_v56, 16  ;;  %v1843_v11 = vshll.u32 %v3836_v56, 16  ;;  %v3834_v24 = vpack.c.bf16 %v1798_v57, %v1798_v57  ;;  %v1691_v30 = vmax.f32 %v1677_v29, %v1685_v0 }
 0x1a1   :  { %v1679_v38 = vld [vmem:[#allocation3 + $0x30] ss:$3 sm:$0xff]  ;;  %v1687_v1 = vld [vmem:[#allocation3 + $0x31] ss:$3 sm:$0xff]  ;;  %v1702_v6 = vmax.f32 %v1690_v60, %v1695_v49  ;;  %v1699_v35 = vld [vmem:[#allocation3 + $0x32] ss:$3 sm:$0xff] }
 0x1a2   :  { %v1842_v40 = vrot.slane %v1840_v21, 7  ;;  %v1822_v13 = vshrl.u32 %v3834_v24, 16  ;;  %v1681_v62 = vld [vmem:[#allocation3 + $0x48] ss:$3 sm:$0xff]  ;;  %v1689_v22 = vld [vmem:[#allocation3 + $0x49] ss:$3 sm:$0xff]  ;;  %v1692_v27 = vmax.f32 %v1679_v38, %v1687_v1  ;;  %v1703_v39 = vmax.f32 %v1691_v30, %v1697_v41 }
 0x1a3   :  { %v1693_v31 = vmax.f32 %v1681_v62, %v1689_v22  ;;  %v1701_v33 = vld [vmem:[#allocation3 + $0x4a] ss:$3 sm:$0xff]  ;;  %v3829_v2 = vpack.c.bf16 %v1702_v6, %v1702_v6  ;;  %v1825_v46 = vshll.u32 %v3834_v24, 16  ;;  %v1831_v15 = vshrl.u32 %v5044_v43, 16  ;;  %v1766_v38 = vld [vmem:[#allocation4 + $0x10] sm:$0x1] }
 0x1a4   :  { %v1847_v8 = vrot.slane %v1842_v40, 4  ;;  %v5046_v47 = vor.u32 %v1843_v11, %v1842_v40  ;;  %v1704_v44 = vmax.f32 %v1692_v27, %v1699_v35  ;;  %v5048_v18 = vrot.slane %v1822_v13, 7  ;;  %v1770_v25 = vld [vmem:[#allocation3 + $0x68] ss:$3 sm:$0xff]  ;;  %v1778_v28 = vld [vmem:[#allocation3 + $0x69] ss:$3 sm:$0xff] }
 0x1a5   :  { %v1705_v61 = vmax.f32 %v1693_v31, %v1701_v33  ;;  %v3830_v20 = vpack.c.bf16 %v1703_v39, %v1703_v39  ;;  %v1721_v48 = vshrl.u32 %v3829_v2, 16  ;;  %v1724_v54 = vshll.u32 %v3829_v2, 16  ;;  %v1790_v45 = vld [vmem:[#allocation3 + $0x6a] ss:$3 sm:$0xff]  ;;  %v1853_v41 = vld [vmem:[#allocation4 + $0x14] sm:$0xf] }
 0x1a6   :  { %v1860_v14 = vsel %vm4863_vm4, %v1847_v8, %v1859_v16  ;;  %v3831_v51 = vpack.c.bf16 %v1704_v44, %v1704_v44  ;;  %v1785_v9 = vmax.f32 %v1770_v25, %v1778_v28  ;;  %v1827_v50 = vor.u32 %v1825_v46, %v5048_v18 }
 0x1a7   :  { %1861 = vst [vmem:[#allocation4 + $0x24] sm:$0x1] %v1860_v14  ;;  %v3832_v17 = vpack.c.bf16 %v1705_v61, %v1705_v61  ;;  %v1729_v42 = vshrl.u32 %v3830_v20, 16  ;;  %v1732_v34 = vshll.u32 %v3830_v20, 16  ;;  %v1723_v63 = vrot.slane %v1721_v48, 7 }
 0x1a8   :  { %v1738_v10 = vshrl.u32 %v3831_v51, 16  ;;  %v1741_v55 = vshll.u32 %v3831_v51, 16  ;;  %v1797_v36 = vmax.f32 %v1785_v9, %v1790_v45  ;;  %v1829_v26 = vrot.slane %v5048_v18, 4 }
 0x1a9   :  { %v1731_v3 = vrot.slane %v1729_v42, 7  ;;  %v1747_v5 = vshrl.u32 %v3832_v17, 16  ;;  %v1750_v4 = vshll.u32 %v3832_v17, 16  ;;  %v1726_v53 = vor.u32 %v1724_v54, %v1723_v63 }
 0x1aa   :  { %v1727_v56 = vrot.slane %v1723_v63, 4  ;;  %v1740_v57 = vrot.slane %v1738_v10, 7  ;;  %v3833_v58 = vpack.c.bf16 %v1797_v36, %v1797_v36  ;;  %v1833_v13 = vrot.slane %v1831_v15, 7 }
 0x1ab   :  { %v1734_v21 = vor.u32 %v1732_v34, %v1731_v3  ;;  %v1736_v11 = vrot.slane %v1731_v3, 4  ;;  %v1749_v23 = vrot.slane %v1747_v5, 7  ;;  %v1761_v29 = vsel %vm4881_vm6, %v1726_v53, %v1760_v52  ;;  %v4250_v34 = vld [vmem:[#allocation4 + $0x28] ss:$0 sps:$4 sm:$0x11]  }
 0x1ac   :  { %v1743_v19 = vor.u32 %v1741_v55, %v1740_v57  ;;  %v1745_v24 = vrot.slane %v1740_v57, 4  ;;  %v1814_v0 = vshrl.u32 %v3833_v58, 16  ;;  %1762 = vst [vmem:[#allocation4] sm:$0xf] %v1761_v29  ;;  %v1817_v1 = vshll.u32 %v3833_v58, 16  ;;  %v5086_v55 = vld [vmem:[#allocation2 + $0x60] sm:$0xff] }
 0x1ad   :  { %v1735_v60 = vsel %vm5056_vm8, %v1727_v56, %v1734_v21  ;;  %v1752_v16 = vor.u32 %v1750_v4, %v1749_v23  ;;  %v1754_v40 = vrot.slane %v1749_v23, 4  ;;  %v1834_v62 = vshll.u32 %v5044_v43, 16  ;;  %2381 = vst.msk [vmem:[#allocation6 + $0x18] sm:$0xf] %vm2380_vm10, %v5086_v55  ;;  %v2395_v3 = vld [vmem:[#allocation6 + $0x14] sm:$0xf] }
 0x1ae   :  { %v1744_v30 = vsel %vm5056_vm8, %v1736_v11, %v1743_v19  ;;  %1763 = vst [vmem:[#allocation4 + $0x4] sm:$0xf] %v1735_v60  ;;  %v1816_v49 = vrot.slane %v1814_v0, 7  ;;  %v1838_v35 = vrot.slane %v1833_v13, 4  ;;  %v1953_v45 = vrot.slane %v4250_v34, 1  ;;  %v4257_v0 = vld [vmem:[%s5467_s3 + $0x8] sm:$0xff]  }
 0x1af   :  { %v1753_v22 = vsel %vm5056_vm8, %v1745_v24, %v1752_v16  ;;  %1764 = vst [vmem:[#allocation4 + $0x8] sm:$0xf] %v1744_v30  ;;  %v1767_v27 = vsel %vm4863_vm4, %v1754_v40, %v1766_v38  ;;  %v1836_v31 = vor.u32 %v1834_v62, %v1833_v13  ;;  %v2384_v5 = vld [vmem:[#allocation6] sm:$0x1]  ;;  %v2392_v53 = vld [vmem:[#allocation6 + $0xc] sm:$0x1] }
 0x1b0   :  { %1765 = vst [vmem:[#allocation4 + $0xc] sm:$0xf] %v1753_v22  ;;  %1768 = vst [vmem:[#allocation4 + $0x10] sm:$0x1] %v1767_v27  ;;  %v1819_v6 = vor.u32 %v1817_v1, %v1816_v49  ;;  %v1820_v8 = vrot.slane %v1816_v49, 4  ;;  %v1846_v7 = vsel %vm5056_vm8, %v1838_v35, %v5046_v47  ;;  %v2385_v52 = vsel %vm5091_vm12, 0, %v2384_v5 }
 0x1b1   :  { %v1837_v33 = vsel %vm5056_vm8, %v1829_v26, %v1836_v31  ;;  %1858 = vst [vmem:[#allocation4 + $0x20] sm:$0xf] %v1846_v7  ;;  %v2389_v26 = vld [vmem:[#allocation6 + $0x8] sm:$0xf]  ;;  %v2396_v56 = vsel %vm5097_vm13, 0, %v2395_v3  ;;  %v2393_v58 = vsel %vm5091_vm12, 0, %v2392_v53 }
 0x1b2   :  { %v1854_v39 = vsel %vm4881_vm6, %v1819_v6, %v1853_v41  ;;  %v1828_v43 = vsel %vm5056_vm8, %v1820_v8, %v1827_v50  ;;  %1857 = vst [vmem:[#allocation4 + $0x1c] sm:$0xf] %v1837_v33  ;;  %2386 = vst [vmem:[#allocation6] sm:$0x1] %v2385_v52  ;;  %v2390_v57 = vsel %vm5097_vm13, 0, %v2389_v26  ;;  %v4256_v24 = vld [vmem:[%s5467_s3] sm:$0xff]  }
 0x1b3   :  { %1855 = vst [vmem:[#allocation4 + $0x14] sm:$0xf] %v1854_v39  ;;  %1856 = vst [vmem:[#allocation4 + $0x18] sm:$0xf] %v1828_v43  ;;  %v4364_v38 = vmov 0.0   ;;  %v4258_v40 = vld [vmem:[%s5467_s3 + $0x10] sm:$0xff]  }
 0x1b4   :  { %2397 = vst [vmem:[#allocation6 + $0x14] sm:$0xf] %v2396_v56  ;;  %2391 = vst [vmem:[#allocation6 + $0x8] sm:$0xf] %v2390_v57  ;;  %4112 = vmatprep.subr.bf16.mxu1 %v4364_v38  ;;  %v4259_v62 = vld [vmem:[%s5467_s3 + $0x18] sm:$0xff]   ;;  %4120 = vmatprep.mubr.msk.bf16.mxu1 %vm4365_vm15, %v4364_v38  ;;  %vm2778_vm4 = vcmask 519169  }
 0x1b5   :  { %v4241_v44 = vld [vmem:[#allocation4] sm:$0xfe]   ;;  %2394 = vst [vmem:[#allocation6 + $0xc] sm:$0x1] %v2393_v58  ;;  %4113 = vmatpush3.bf16.msra.mxu1 %v4256_v24  ;;  %2779 = vst.msk [vmem:[#allocation8 + $0x8] sm:$0xe] %vm2778_vm4, %v5086_v55 }
 0x1b6   :  { %v1944_v18 = vrot.slane %v4241_v44, 1  ;;  %v4243_v25 = vld [vmem:[#allocation4] sm:$0xff]   ;;  %4114 = vmatprep.subr.bf16.mxu1 %v4364_v38  ;;  %v4253_v4 = vld [vmem:[#allocation6 + $0x18] ss:$0 sps:$4 sm:$0x11]   ;;  %vm2791_vm6 = vmor %vm1657_vm1, %vm2790_vm5  ;;  %vm2853_vm1 = vcmask 1045504  }
 0x1b7   :  { %v4242_v2 = vld [vmem:[#allocation4 + $0x8] sm:$0xff]   ;;  %v2519_v37 = vrot.slane %v4253_v4, 1  ;;  %2780 = vst.msk [vmem:[#allocation8 + $0xc] sm:$0x1] %vm2776_vm3, %v5086_v55  ;;  %2777 = vst.msk [vmem:[#allocation8] sm:$0x1] %vm2776_vm3, %v5086_v55 }
 0x1b8   :  { %v1945_v12 = vrot.slane %v4242_v2, 1  ;;  %v4245_v51 = vld [vmem:[#allocation4 + $0x8] sm:$0xff]   ;;  %v4248_v54 = vld [vmem:[#allocation4 + $0x20] sm:$0xff]   ;;  %2781 = vst.msk [vmem:[#allocation8 + $0x14] sm:$0xe] %vm2778_vm4, %v5086_v55 }
 0x1b9   :  { %v1951_v9 = vrot.slane %v4248_v54, 1  ;;  %v4251_v10 = vld [vmem:[#allocation4 + $0x20] sm:$0xff]   ;;  %4115 = vmatpush3.bf16.msra.mxu1 %v4257_v0  ;;  %2775 = vst.msk [vmem:[#allocation8 + $0x18] sm:$0xf] %vm2774_vm2, %v5086_v55  ;;  %v4268_v55 = vld [vmem:[%s5468_s4 + $0x18] sm:$0xff]  }
 0x1ba   :  { %v4244_v61 = vld [vmem:[#allocation4 + $0x10] sm:$0xff]   ;;  %v1946_v20 = vsel %vm1943_vm9, %v1944_v18, %v1945_v12  ;;  %v4246_v46 = vld [vmem:[#allocation4 + $0x18] sm:$0xff]   ;;  %4116 = vmatprep.subr.bf16.mxu1 %v4364_v38 }
 0x1bb   :  { %2120 = vmatprep.mubr.bf16.mxu0 %v1946_v20  ;;  %v1947_v28 = vrot.slane %v4244_v61, 1  ;;  %v1949_v47 = vrot.slane %v4246_v46, 1  ;;  %v4247_v17 = vld [vmem:[#allocation4 + $0x10] sm:$0xff]   ;;  %v4249_v50 = vld [vmem:[#allocation4 + $0x18] sm:$0xff]   ;;  %v1954_v63 = vsel %vm1943_vm9, %v1951_v9, %v1953_v45 }
 0x1bc   :  { %2121 = vmatmul.mubr.bf16.vlgmr.msra.gmra.mrb[52].mxu0 %v4243_v25 }
 0x1bd   :  { %v1948_v14 = vsel %vm1943_vm9, %v1945_v12, %v1947_v28  ;;  %v1950_v48 = vsel %vm1943_vm9, %v1947_v28, %v1949_v47  ;;  %v1952_v42 = vsel %vm1943_vm9, %v1949_v47, %v1951_v9  ;;  %4117 = vmatpush3.bf16.msra.mxu1 %v4258_v40 }
 0x1be   :  { %2128 = vmatprep.mubr.bf16.mxu0 %v1948_v14  ;;  %4118 = vmatprep.subr.bf16.mxu1 %v4364_v38 }
 0x1c1   :  { %4119 = vmatpush3.bf16.msra.mxu1 %v4259_v62 }
 0x1c2   :  { %4132 = vmatprep.subr.bf16.mxu1 %v4364_v38 }
 0x1c4   :  { %2129 = vmatmul.mubr.bf16.gmra.mrb[56].mxu0 %v4245_v51 }
 0x1c5   :  { %2136 = vmatprep.mubr.bf16.mxu0 %v1950_v48 }
 0x1cc   :  { %2137 = vmatmul.mubr.bf16.gmra.mrb[60].mxu0 %v4247_v17 }
 0x1cd   :  { %2144 = vmatprep.mubr.bf16.mxu0 %v1952_v42 }
 0x1d4   :  { %2145 = vmatmul.mubr.bf16.gmra.mrb[64].mxu0 %v4249_v50 }
 0x1d5   :  { %2152 = vmatprep.mubr.bf16.mxu0 %v1954_v63 }
 0x1dc   :  { %2153 = vmatmul.mubr.bf16.gmra.mrb[68].mxu0 %v4251_v10 }
 0x28f   :  { %v4064_v21 = vpop.f32.mrb[52].mxu0 }
 0x290   :  { %v4065_v11 = vpop.f32.mrb[53].mxu0 }
 0x291   :  { %v4066_v23 = vadd.f32 %v4065_v11, %v4064_v21  ;;  %v4067_v15 = vpop.f32.mrb[54].mxu0 }
 0x292   :  { %v4068_v19 = vpop.f32.mrb[55].mxu0 }
 0x293   :  { %2162 = vst.msk [vmem:[#allocation5] sm:$0xff] %vm2161_vm14, %v4066_v23  ;;  %v4069_v29 = vadd.f32 %v4068_v19, %v4067_v15 }
 0x295   :  { %2163 = vst.msk [vmem:[#allocation5 + $0x8] sm:$0xff] %vm2161_vm14, %v4069_v29 }
 0x297   :  { %v4070_v60 = vpop.f32.mrb[56].mxu0 }
 0x298   :  { %v4071_v16 = vpop.f32.mrb[57].mxu0 }
 0x299   :  { %v4072_v1 = vadd.f32 %v4071_v16, %v4070_v60  ;;  %v4073_v30 = vpop.f32.mrb[58].mxu0 }
 0x29a   :  { %v4074_v49 = vpop.f32.mrb[59].mxu0  ;;  %v5134_v39 = vld [vmem:[#allocation5] sm:$0xff] }
 0x29b   :  { %2164 = vst.msk [vmem:[#allocation5 + $0x10] sm:$0xff] %vm2161_vm14, %v4072_v1  ;;  %v4075_v13 = vadd.f32 %v4074_v49, %v4073_v30  ;;  %v2287_v61 = vmul.f32 %v5134_v39, %v5134_v39  ;;  %v2262_v14 = vsel %vm2161_vm14, %v5134_v39, 0.0 }
 0x29c   :  { %v5131_v35 = vld [vmem:[#allocation5 + $0x8] sm:$0xff] }
 0x29d   :  { %2165 = vst.msk [vmem:[#allocation5 + $0x18] sm:$0xff] %vm2161_vm14, %v4075_v13  ;;  %v2288_v7 = vmul.f32 %v5131_v35, %v5131_v35  ;;  %v2263_v12 = vsel %vm2161_vm14, %v5131_v35, 0.0  ;;  %v2297_v17 = vsel %vm2161_vm14, %v2287_v61, 0.0 }
 0x29e   :  { %v2264_v54 = vadd.f32 %v2263_v12, %v2262_v14 }
 0x29f   :  { %v4076_v22 = vpop.f32.mrb[60].mxu0  ;;  %v2298_v51 = vsel %vm2161_vm14, %v2288_v7, 0.0 }
 0x2a0   :  { %v4077_v27 = vpop.f32.mrb[61].mxu0  ;;  %v2299_v45 = vadd.f32 %v2298_v51, %v2297_v17 }
 0x2a1   :  { %v4078_v41 = vadd.f32 %v4077_v27, %v4076_v22  ;;  %v4079_v6 = vpop.f32.mrb[62].mxu0 }
 0x2a2   :  { %v4080_v8 = vpop.f32.mrb[63].mxu0  ;;  %v5136_v43 = vld [vmem:[#allocation5 + $0x10] sm:$0xff] }
 0x2a3   :  { %2166 = vst.msk [vmem:[#allocation5 + $0x20] sm:$0xff] %vm2161_vm14, %v4078_v41  ;;  %v4081_v31 = vadd.f32 %v4080_v8, %v4079_v6  ;;  %v2289_v20 = vmul.f32 %v5136_v43, %v5136_v43  ;;  %v2265_v47 = vsel %vm2161_vm14, %v5136_v43, 0.0 }
 0x2a4   :  { %v5146_v28 = vld [vmem:[#allocation5 + $0x18] sm:$0xff]  ;;  %v2266_v34 = vadd.f32 %v2265_v47, %v2264_v54 }
 0x2a5   :  { %2167 = vst.msk [vmem:[#allocation5 + $0x28] sm:$0xff] %vm2161_vm14, %v4081_v31  ;;  %v2290_v9 = vmul.f32 %v5146_v28, %v5146_v28  ;;  %v2300_v42 = vsel %vm2161_vm14, %v2289_v20, 0.0  ;;  %v2267_v63 = vsel %vm2161_vm14, %v5146_v28, 0.0 }
 0x2a6   :  { %v2301_v5 = vadd.f32 %v2300_v42, %v2299_v45  ;;  %v2268_v58 = vadd.f32 %v2267_v63, %v2266_v34 }
 0x2a7   :  { %v4082_v33 = vpop.f32.mrb[64].mxu0  ;;  %v2302_v53 = vsel %vm2161_vm14, %v2290_v9, 0.0 }
 0x2a8   :  { %v4083_v44 = vpop.f32.mrb[65].mxu0  ;;  %v2303_v0 = vadd.f32 %v2302_v53, %v2301_v5 }
 0x2a9   :  { %v4084_v2 = vadd.f32 %v4083_v44, %v4082_v33  ;;  %v4085_v18 = vpop.f32.mrb[66].mxu0 }
 0x2aa   :  { %v4086_v25 = vpop.f32.mrb[67].mxu0  ;;  %v2226_v53 = vld [vmem:[#allocation5 + $0x20] sm:$0xff] }
 0x2ab   :  { %2168 = vst.msk [vmem:[#allocation5 + $0x30] sm:$0xff] %vm2161_vm14, %v4084_v2  ;;  %v4087_v46 = vadd.f32 %v4086_v25, %v4085_v18 }
 0x2ac   :  { %v5154_v48 = vld [vmem:[#allocation5 + $0x28] sm:$0xff] }
 0x2ad   :  { %2169 = vst.msk [vmem:[#allocation5 + $0x38] sm:$0xff] %vm2161_vm14, %v4087_v46  ;;  %v2292_v10 = vmul.f32 %v5154_v48, %v5154_v48  ;;  %v2271_v26 = vsel %vm2161_vm14, %v5154_v48, 0.0 }
 0x2ae   :  { %v2272_v29 = vadd.f32 %v2271_v26, %v2268_v58 }
 0x2af   :  { %v4088_v50 = vpop.f32.mrb[68].mxu0  ;;  %v2306_v15 = vsel %vm2161_vm14, %v2292_v10, 0.0 }
 0x2b0   :  { %v4089_v3 = vpop.f32.mrb[69].mxu0  ;;  %v2307_v1 = vadd.f32 %v2306_v15, %v2303_v0 }
 0x2b1   :  { %v4090_v52 = vadd.f32 %v4089_v3, %v4088_v50  ;;  %v4091_v56 = vpop.f32.mrb[70].mxu0  ;;  %v1862_v50 = vld [vmem:[%s5471_s7] sm:$0x1]  ;;  %v1863_v3 = vld [vmem:[%s5471_s7 + $0x1] sm:$0x1]  ;;  %s4366_s7 = smov 32  }
 0x2b2   :  { %v2228_v57 = vld [vmem:[#allocation5 + $0x30] sm:$0xff]  ;;  %v4092_v21 = vpop.f32.mrb[71].mxu0 }
 0x2b3   :  { %2170 = vst.msk [vmem:[#allocation5 + $0x40] sm:$0xff] %vm2161_vm14, %v4090_v52  ;;  %v2273_v11 = vsel %vm2161_vm14, %v2228_v57, 0.0  ;;  %v2293_v23 = vmul.f32 %v2228_v57, %v2228_v57  ;;  %v4093_v19 = vadd.f32 %v4092_v21, %v4091_v56 }
 0x2b4   :  { %v2229_v24 = vld [vmem:[#allocation5 + $0x38] sm:$0xff]  ;;  %v2274_v40 = vadd.f32 %v2273_v11, %v2272_v29 }
 0x2b5   :  { %v2294_v60 = vmul.f32 %v2229_v24, %v2229_v24  ;;  %v2308_v16 = vsel %vm2161_vm14, %v2293_v23, 0.0  ;;  %2171 = vst.msk [vmem:[#allocation5 + $0x48] sm:$0xff] %vm2161_vm14, %v4093_v19  ;;  %v2275_v30 = vsel %vm2161_vm14, %v2229_v24, 0.0 }
 0x2b6   :  { %v2309_v49 = vadd.f32 %v2308_v16, %v2307_v1  ;;  %v2276_v22 = vadd.f32 %v2275_v30, %v2274_v40 }
 0x2b7   :  { %v2310_v13 = vsel %vm2161_vm14, %v2294_v60, 0.0 }
 0x2b8   :  { %v2311_v8 = vadd.f32 %v2310_v13, %v2309_v49 }
 0x2ba   :  { %v2230_v62 = vld [vmem:[#allocation5 + $0x40] sm:$0xff] }
 0x2bb   :  { %v2277_v27 = vsel %vm2161_vm14, %v2230_v62, 0.0  ;;  %v2295_v41 = vmul.f32 %v2230_v62, %v2230_v62 }
 0x2bc   :  { %v2278_v6 = vadd.f32 %v2277_v27, %v2276_v22  ;;  %v2231_v29 = vld [vmem:[#allocation5 + $0x48] sm:$0xff] }
 0x2bd   :  { %v2312_v31 = vsel %vm2161_vm14, %v2295_v41, 0.0 }
 0x2be   :  { %v2281_v33 = vrot.slane %v2278_v6, 4  ;;  %v2313_v7 = vadd.f32 %v2312_v31, %v2311_v8 }
 0x2c0   :  { %v2282_v44 = vadd.f32 %v2281_v33, %v2278_v6  ;;  %v2316_v2 = vrot.slane %v2313_v7, 4 }
 0x2c2   :  { %v2283_v18 = vrot.slane %v2282_v44, 2  ;;  %v2317_v12 = vadd.f32 %v2316_v2, %v2313_v7 }
 0x2c4   :  { %v2284_v61 = vadd.f32 %v2283_v18, %v2282_v44  ;;  %v2318_v20 = vrot.slane %v2317_v12, 2 }
 0x2c6   :  { %v2285_v25 = vrot.slane %v2284_v61, 1  ;;  %v2319_v46 = vadd.f32 %v2318_v20, %v2317_v12 }
 0x2c8   :  { %v2286_v14 = vadd.f32 %v2285_v25, %v2284_v61  ;;  %v2320_v47 = vrot.slane %v2319_v46, 1 }
 0x2ca   :  { %v2321_v51 = vadd.f32 %v2320_v47, %v2319_v46  ;;  %v2322_v54 = vmul.f32 0.015625, %v2286_v14 }
 0x2cc   :  { %v2323_v9 = vmul.f32 0.015625, %v2321_v51  ;;  %v2324_v17 = vmul.f32 %v2322_v54, %v2322_v54 }
 0x2ce   :  { %v2325_v42 = vsub.f32 %v2323_v9, %v2324_v17 }
 0x2d0   :  { %v2326_v34 = vmax.f32 %v2325_v42, 0.0 }
 0x2d2   :  { %v2327_v45 = vadd.f32 1e-05, %v2326_v34 }
 0x2d4   :  { %4328 = vrsqrt.f32 %v2327_v45 }
 0x2de   :  { %v4329_v63 = vpop.eup %4328 }
 0x2df   :  { %v2329_v10 = vmul.f32 %v4329_v63, %v1862_v50 }
 0x2e1   :  { %v2330_v5 = vmul.f32 %v2329_v10, %v2322_v54  ;;  %v2335_v52 = vrot.slane %v2329_v10, %v4964_v32 }
 0x2e3   :  { %v2331_v26 = vsub.f32 %v1863_v3, %v2330_v5  ;;  %v2336_v56 = vmul.f32 %v2335_v52, %v5134_v39  ;;  %v2337_v58 = vmul.f32 %v2335_v52, %v5131_v35  ;;  %v2338_v21 = vmul.f32 %v2335_v52, %v5136_v43 }
 0x2e4   :  { %v2339_v11 = vmul.f32 %v2335_v52, %v5146_v28  ;;  %v2340_v23 = vmul.f32 %v2335_v52, %v2226_v53  ;;  %v2341_v15 = vmul.f32 %v2335_v52, %v5154_v48  ;;  %v2342_v0 = vmul.f32 %v2335_v52, %v2228_v57 }
 0x2e5   :  { %v2349_v19 = vrot.slane %v2331_v26, %v4964_v32  ;;  %v2343_v60 = vmul.f32 %v2335_v52, %v2229_v24  ;;  %v2344_v16 = vmul.f32 %v2335_v52, %v2230_v62  ;;  %v2345_v40 = vmul.f32 %v2335_v52, %v2231_v29 }
 0x2e7   :  { %v2350_v1 = vadd.f32 %v2349_v19, %v2336_v56  ;;  %v2351_v30 = vadd.f32 %v2349_v19, %v2337_v58  ;;  %v2352_v49 = vadd.f32 %v2349_v19, %v2338_v21  ;;  %v2353_v39 = vadd.f32 %v2349_v19, %v2339_v11  ;;  %v2433_v56 = vld [vmem:[#allocation6] sm:$0xf] }
 0x2e8   :  { %v2354_v13 = vadd.f32 %v2349_v19, %v2340_v23  ;;  %v2355_v35 = vadd.f32 %v2349_v19, %v2341_v15  ;;  %v2356_v22 = vadd.f32 %v2349_v19, %v2342_v0  ;;  %v2357_v43 = vadd.f32 %v2349_v19, %v2343_v60  ;;  %v2480_v0 = vld [vmem:[#allocation6 + $0x14] sm:$0x1]  ;;  %v2437_v60 = vld [vmem:[#allocation6 + $0x8] sm:$0x1] }
 0x2e9   :  { %v2358_v27 = vadd.f32 %v2349_v19, %v2344_v16  ;;  %v2360_v28 = vmax.f32 %v2350_v1, 0.0  ;;  %v2361_v41 = vmax.f32 %v2351_v30, 0.0  ;;  %v2362_v6 = vmax.f32 %v2352_v49, 0.0 }
 0x2ea   :  { %v2363_v48 = vmax.f32 %v2353_v39, 0.0  ;;  %v2364_v8 = vmax.f32 %v2354_v13, 0.0  ;;  %v2365_v31 = vmax.f32 %v2355_v35, 0.0  ;;  %v2366_v33 = vmax.f32 %v2356_v22, 0.0 }
 0x2eb   :  { %v2367_v57 = vmax.f32 %v2357_v43, 0.0  ;;  %v2368_v24 = vmax.f32 %v2358_v27, 0.0  ;;  %2370 = vst.msk [vmem:[#allocation5] sm:$0xff] %vm2161_vm14, %v2360_v28  ;;  %2371 = vst.msk [vmem:[#allocation5 + $0x8] sm:$0xff] %vm2161_vm14, %v2361_v41  ;;  %v2359_v62 = vadd.f32 %v2349_v19, %v2345_v40  ;;  %v2476_v19 = vld [vmem:[#allocation6 + $0xc] sm:$0xf] }
 0x2ec   :  { %2372 = vst.msk [vmem:[#allocation5 + $0x10] sm:$0xff] %vm2161_vm14, %v2362_v6  ;;  %2373 = vst.msk [vmem:[#allocation5 + $0x18] sm:$0xff] %vm2161_vm14, %v2363_v48 }
 0x2ed   :  { %2374 = vst.msk [vmem:[#allocation5 + $0x20] sm:$0xff] %vm2161_vm14, %v2364_v8  ;;  %2375 = vst.msk [vmem:[#allocation5 + $0x28] sm:$0xff] %vm2161_vm14, %v2365_v31  ;;  %v2369_v7 = vmax.f32 %v2359_v62, 0.0 }
 0x2ee   :  { %2376 = vst.msk [vmem:[#allocation5 + $0x30] sm:$0xff] %vm2161_vm14, %v2366_v33  ;;  %2377 = vst.msk [vmem:[#allocation5 + $0x38] sm:$0xff] %vm2161_vm14, %v2367_v57 }
 0x2ef   :  { %2378 = vst.msk [vmem:[#allocation5 + $0x40] sm:$0xff] %vm2161_vm14, %v2368_v24  ;;  %2379 = vst.msk [vmem:[#allocation5 + $0x48] sm:$0xff] %vm2161_vm14, %v2369_v7 }
 0x2f2   :  { %v2398_v44 = vld [vmem:[#allocation5] ss:$2 sm:$0xff]  ;;  %v2402_v2 = vld [vmem:[#allocation5 + $0x1] ss:$2 sm:$0xff] }
 0x2f3   :  { %v2400_v61 = vld [vmem:[#allocation5 + $0x10] ss:$2 sm:$0xff]  ;;  %v2405_v20 = vmax.f32 %v2398_v44, %v2402_v2  ;;  %v2404_v47 = vld [vmem:[#allocation5 + $0x11] ss:$2 sm:$0xff] }
 0x2f4   :  { %v2406_v54 = vmax.f32 %v2400_v61, %v2404_v47  ;;  %v4267_v47 = vld [vmem:[%s5468_s4 + $0x10] sm:$0xff]  }
 0x2f5   :  { %v2441_v18 = vld [vmem:[#allocation5 + $0x28] ss:$2 sm:$0xff]  ;;  %v2445_v12 = vld [vmem:[#allocation5 + $0x29] ss:$2 sm:$0xff]  ;;  %v3837_v9 = vpack.c.bf16 %v2405_v20, %v2405_v20 }
 0x2f6   :  { %v2443_v25 = vld [vmem:[#allocation5 + $0x38] ss:$2 sm:$0xff]  ;;  %v2447_v46 = vld [vmem:[#allocation5 + $0x39] ss:$2 sm:$0xff]  ;;  %v2448_v14 = vmax.f32 %v2441_v18, %v2445_v12  ;;  %v3838_v34 = vpack.c.bf16 %v2406_v54, %v2406_v54 }
 0x2f7   :  { %v2449_v51 = vmax.f32 %v2443_v25, %v2447_v46  ;;  %v2414_v45 = vshrl.u32 %v3837_v9, 16  ;;  %v2417_v3 = vshll.u32 %v3837_v9, 16  ;;  %v4265_v46 = vld [vmem:[%s5468_s4] sm:$0xff]   ;;  %v4270_v54 = vld [vmem:[%s5468_s4 + $0x28] sm:$0xff]  }
 0x2f8   :  { %v3839_v17 = vpack.c.bf16 %v2448_v14, %v2448_v14  ;;  %v2422_v5 = vshrl.u32 %v3838_v34, 16  ;;  %v2425_v53 = vshll.u32 %v3838_v34, 16  ;;  %v4266_v14 = vld [vmem:[%s5468_s4 + $0x8] sm:$0xff]  }
 0x2f9   :  { %v3840_v42 = vpack.c.bf16 %v2449_v51, %v2449_v51  ;;  %v2416_v10 = vrot.slane %v2414_v45, 7  ;;  %v4269_v51 = vld [vmem:[%s5468_s4 + $0x20] sm:$0xff]  }
 0x2fa   :  { %v2457_v50 = vshrl.u32 %v3839_v17, 16  ;;  %v2460_v58 = vshll.u32 %v3839_v17, 16  ;;  %v2424_v15 = vrot.slane %v2422_v5, 7  ;;  %v4271_v17 = vld [vmem:[%s5468_s4 + $0x30] sm:$0xff]  }
 0x2fb   :  { %v2465_v63 = vshrl.u32 %v3840_v42, 16  ;;  %v2468_v52 = vshll.u32 %v3840_v42, 16  ;;  %v2419_v11 = vor.u32 %v2417_v3, %v2416_v10  ;;  %v2420_v23 = vrot.slane %v2416_v10, 4 }
 0x2fc   :  { %v2459_v26 = vrot.slane %v2457_v50, 7  ;;  %v2427_v30 = vor.u32 %v2425_v53, %v2424_v15  ;;  %v2429_v49 = vrot.slane %v2424_v15, 4  ;;  %v4272_v50 = vld [vmem:[%s5468_s4 + $0x38] sm:$0xff]  }
 0x2fd   :  { %v2467_v21 = vrot.slane %v2465_v63, 7  ;;  %v2434_v39 = vsel %vm5097_vm13, %v2419_v11, %v2433_v56 }
 0x2fe   :  { %v2463_v29 = vrot.slane %v2459_v26, 4  ;;  %v2462_v16 = vor.u32 %v2460_v58, %v2459_v26  ;;  %v2428_v43 = vsel %vm5056_vm8, %v2420_v23, %v2427_v30  ;;  %2435 = vst [vmem:[#allocation6] sm:$0xf] %v2434_v39  ;;  %v2438_v27 = vsel %vm5091_vm12, %v2429_v49, %v2437_v60 }
 0x2ff   :  { %v2470_v40 = vor.u32 %v2468_v52, %v2467_v21  ;;  %v2472_v1 = vrot.slane %v2467_v21, 4  ;;  %2436 = vst.msk [vmem:[#allocation6 + $0x4] sm:$0xf] %vm2380_vm10, %v2428_v43  ;;  %2439 = vst [vmem:[#allocation6 + $0x8] sm:$0x1] %v2438_v27 }
 0x300   :  { %v2477_v13 = vsel %vm5097_vm13, %v2462_v16, %v2476_v19 }
 0x301   :  { %v2471_v35 = vsel %vm5056_vm8, %v2463_v29, %v2470_v40  ;;  %v2481_v22 = vsel %vm5091_vm12, %v2472_v1, %v2480_v0  ;;  %2478 = vst [vmem:[#allocation6 + $0xc] sm:$0xf] %v2477_v13 }
 0x302   :  { %2479 = vst.msk [vmem:[#allocation6 + $0x10] sm:$0xf] %vm2380_vm10, %v2471_v35  ;;  %2482 = vst [vmem:[#allocation6 + $0x14] sm:$0x1] %v2481_v22 }
 0x305   :  { %v2491_v28 = vld [vmem:[#allocation6] sm:$0xe] }
 0x306   :  { %v2486_v6 = vld [vmem:[#allocation6 + $0x4] sm:$0xf]  ;;  %v2485_v7 = vld [vmem:[#allocation6] sm:$0xf] }
 0x307   :  { %v3762_v36 = vcombine.low %v2491_v28, %v2486_v6  ;;  %v3759_v44 = vcombine.low %v2485_v7, %v2486_v6 }
 0x308   :  { %v4254_v48 = vld [vmem:[#allocation6 + $0x8] sm:$0xff]  }
 0x309   :  { %v4252_v41 = vld [vmem:[#allocation6 + $0x10] sm:$0xff]   ;;  %v2515_v31 = vrot.slane %v4254_v48, 1  ;;  %v2514_v57 = vrot.slane %v3762_v36, 1 }
 0x30a   :  { %v2517_v8 = vrot.slane %v4252_v41, 1 }
 0x30b   :  { %v2516_v24 = vsel %vm1943_vm9, %v2514_v57, %v2515_v31 }
 0x30c   :  { %v2520_v33 = vsel %vm1943_vm9, %v2517_v8, %v2519_v37  ;;  %2521 = vrot.lane.b32.xlu0 %v2516_v24, %s4366_s7  ;;  %v2518_v62 = vsel %vm1943_vm9, %v2515_v31, %v2517_v8 }
 0x30d   :  { %2525 = vrot.lane.b32.xlu1 %v2520_v33, %s4366_s7 }
 0x310   :  { %2523 = vrot.lane.b32.xlu0 %v2518_v62, %s4366_s7 }
 0x37e   :  { %v2522_v2 = vpop.permute.xlu0 %2521 }
 0x37f   :  { %v2529_v18 = vsel %vm2161_vm14, %v3759_v44, %v2522_v2  ;;  %v2526_v20 = vpop.permute.xlu1 %2525 }
 0x380   :  { %4121 = vmatmul.mubr.msk.bf16.vlgmr.msra.gmra.mrb[52].mxu1 %vm2568_vm0, %v2529_v18  ;;  %v2535_v25 = vsel %vm2161_vm14, %v4252_v41, %v2526_v20 }
 0x381   :  { %4124 = vmatprep.mubr.msk.bf16.mxu1 %vm4365_vm15, %v4364_v38  ;;  %4133 = vmatpush3.bf16.msra.mxu1 %v4265_v46 }
 0x382   :  { %v2524_v12 = vpop.permute.xlu0 %2523  ;;  %4134 = vmatprep.subr.bf16.mxu1 %v4364_v38 }
 0x383   :  { %v2532_v61 = vsel %vm2161_vm14, %v4254_v48, %v2524_v12 }
 0x385   :  { %4135 = vmatpush3.bf16.msra.mxu1 %v4266_v14 }
 0x386   :  { %4136 = vmatprep.subr.bf16.mxu1 %v4364_v38 }
 0x388   :  { %4125 = vmatmul.mubr.msk.bf16.gmra.mrb[56].mxu1 %vm2568_vm0, %v2532_v61 }
 0x389   :  { %4128 = vmatprep.mubr.msk.bf16.mxu1 %vm4365_vm15, %v4364_v38  ;;  %4137 = vmatpush3.bf16.msra.mxu1 %v4267_v47  ;;  %v2484_v47 = vld [vmem:[%s5472_s8 + $0x1] sm:$0x1] }
 0x38a   :  { %4138 = vmatprep.subr.bf16.mxu1 %v4364_v38 }
 0x38d   :  { %4139 = vmatpush3.bf16.msra.mxu1 %v4268_v55 }
 0x38e   :  { %4140 = vmatprep.subr.bf16.mxu1 %v4364_v38 }
 0x390   :  { %4129 = vmatmul.mubr.msk.bf16.gmra.mrb[60].mxu1 %vm2568_vm0, %v2535_v25  ;;  %v2483_v25 = vld [vmem:[%s5472_s8] sm:$0x1]  ;;  %s4367_s8 = smov 64  }
 0x391   :  { %4148 = vmatprep.mubr.msk.bf16.mxu1 %vm4365_vm15, %v4364_v38  ;;  %4141 = vmatpush3.bf16.msra.mxu1 %v4269_v51 }
 0x392   :  { %4142 = vmatprep.subr.bf16.mxu1 %v4364_v38 }
 0x395   :  { %4143 = vmatpush3.bf16.msra.mxu1 %v4270_v54 }
 0x396   :  { %4144 = vmatprep.subr.bf16.mxu1 %v4364_v38 }
 0x399   :  { %4145 = vmatpush3.bf16.msra.mxu1 %v4271_v17 }
 0x39a   :  { %4146 = vmatprep.subr.bf16.mxu1 %v4364_v38 }
 0x39d   :  { %4147 = vmatpush3.bf16.msra.mxu1 %v4272_v50 }
 0x453   :  { %v2609_v9 = vpop.f32.mrb[52].mxu1 }
 0x454   :  { %2632 = vst.msk [vmem:[#allocation7] sm:$0xff] %vm2568_vm0, %v2609_v9  ;;  %v4122_v42 = vpop.f32.mrb[53].mxu1 }
 0x455   :  { %v2612_v34 = vpop.f32.mrb[54].mxu1 }
 0x456   :  { %2633 = vst.msk [vmem:[#allocation7 + $0x8] sm:$0xff] %vm2568_vm0, %v2612_v34  ;;  %v4123_v45 = vpop.f32.mrb[55].mxu1 }
 0x45b   :  { %v2617_v63 = vpop.f32.mrb[56].mxu1  ;;  %v2668_v53 = vld [vmem:[#allocation7] sm:$0xff] }
 0x45c   :  { %2634 = vst.msk [vmem:[#allocation7 + $0x10] sm:$0xff] %vm2568_vm0, %v2617_v63  ;;  %v4126_v10 = vpop.f32.mrb[57].mxu1  ;;  %v2709_v15 = vmul.f32 %v2668_v53, %v2668_v53  ;;  %v2692_v0 = vsel %vm2568_vm0, %v2668_v53, 0.0 }
 0x45d   :  { %v2620_v3 = vpop.f32.mrb[58].mxu1  ;;  %v2669_v52 = vld [vmem:[#allocation7 + $0x8] sm:$0xff] }
 0x45e   :  { %2635 = vst.msk [vmem:[#allocation7 + $0x18] sm:$0xff] %vm2568_vm0, %v2620_v3  ;;  %v4127_v5 = vpop.f32.mrb[59].mxu1  ;;  %v2710_v56 = vmul.f32 %v2669_v52, %v2669_v52  ;;  %v2693_v23 = vsel %vm2568_vm0, %v2669_v52, 0.0  ;;  %v2715_v1 = vsel %vm2568_vm0, %v2709_v15, 0.0 }
 0x45f   :  { %v2694_v40 = vadd.f32 %v2693_v23, %v2692_v0 }
 0x460   :  { %v2716_v16 = vsel %vm2568_vm0, %v2710_v56, 0.0 }
 0x461   :  { %v2717_v13 = vadd.f32 %v2716_v16, %v2715_v1 }
 0x463   :  { %v2625_v26 = vpop.f32.mrb[60].mxu1  ;;  %v2670_v9 = vld [vmem:[#allocation7 + $0x10] sm:$0xff] }
 0x464   :  { %2636 = vst.msk [vmem:[#allocation7 + $0x20] sm:$0xff] %vm2568_vm0, %v2625_v26  ;;  %v4130_v58 = vpop.f32.mrb[61].mxu1 }
 0x465   :  { %v2671_v21 = vld [vmem:[#allocation7 + $0x18] sm:$0xff]  ;;  %v2628_v11 = vpop.f32.mrb[62].mxu1 }
 0x466   :  { %v2712_v19 = vmul.f32 %v2671_v21, %v2671_v21  ;;  %2637 = vst.msk [vmem:[#allocation7 + $0x28] sm:$0xff] %vm2568_vm0, %v2628_v11  ;;  %v4131_v29 = vpop.f32.mrb[63].mxu1  ;;  %v2697_v60 = vsel %vm2568_vm0, %v2671_v21, 0.0 }
 0x467   :  { %v2698_v39 = vadd.f32 %v2697_v60, %v2694_v40 }
 0x468   :  { %v2720_v30 = vsel %vm2568_vm0, %v2712_v19, 0.0 }
 0x469   :  { %v2721_v27 = vadd.f32 %v2720_v30, %v2717_v13 }
 0x46b   :  { %v2672_v49 = vld [vmem:[#allocation7 + $0x20] sm:$0xff] }
 0x46c   :  { %v2699_v35 = vsel %vm2568_vm0, %v2672_v49, 0.0  ;;  %v2713_v22 = vmul.f32 %v2672_v49, %v2672_v49 }
 0x46d   :  { %v2700_v43 = vadd.f32 %v2699_v35, %v2698_v39  ;;  %v2673_v63 = vld [vmem:[#allocation7 + $0x28] sm:$0xff] }
 0x46e   :  { %v2722_v4 = vsel %vm2568_vm0, %v2713_v22, 0.0 }
 0x46f   :  { %v2703_v28 = vrot.slane %v2700_v43, 4  ;;  %v2723_v41 = vadd.f32 %v2722_v4, %v2721_v27 }
 0x471   :  { %v2704_v37 = vadd.f32 %v2703_v28, %v2700_v43  ;;  %v2726_v6 = vrot.slane %v2723_v41, 4 }
 0x473   :  { %v2705_v48 = vrot.slane %v2704_v37, 2  ;;  %v2727_v8 = vadd.f32 %v2726_v6, %v2723_v41 }
 0x475   :  { %v2706_v36 = vadd.f32 %v2705_v48, %v2704_v37  ;;  %v2728_v31 = vrot.slane %v2727_v8, 2 }
 0x477   :  { %v2707_v33 = vrot.slane %v2706_v36, 1  ;;  %v2729_v57 = vadd.f32 %v2728_v31, %v2727_v8 }
 0x479   :  { %v2708_v24 = vadd.f32 %v2707_v33, %v2706_v36  ;;  %v2730_v62 = vrot.slane %v2729_v57, 1 }
 0x47b   :  { %v2731_v7 = vadd.f32 %v2730_v62, %v2729_v57  ;;  %v2732_v44 = vmul.f32 0.03125, %v2708_v24  ;;  %v4264_v62 = vld [vmem:[#allocation8 + $0x18] ss:$0 sps:$4 sm:$0x33]  }
 0x47d   :  { %v2733_v2 = vmul.f32 0.03125, %v2731_v7  ;;  %v2734_v18 = vmul.f32 %v2732_v44, %v2732_v44 }
 0x47f   :  { %v2735_v12 = vsub.f32 %v2733_v2, %v2734_v18  ;;  %v2859_v18 = vrot.slane %v4264_v62, 2 }
 0x481   :  { %v2736_v61 = vmax.f32 %v2735_v12, 0.0 }
 0x483   :  { %v2737_v20 = vadd.f32 1e-05, %v2736_v61 }
 0x485   :  { %4330 = vrsqrt.f32 %v2737_v20 }
 0x48f   :  { %v4331_v46 = vpop.eup %4330 }
 0x490   :  { %v2739_v14 = vmul.f32 %v4331_v46, %v2483_v25 }
 0x492   :  { %v2740_v55 = vmul.f32 %v2739_v14, %v2732_v44  ;;  %v2745_v51 = vrot.slane %v2739_v14, %v4964_v32 }
 0x494   :  { %v2741_v54 = vsub.f32 %v2484_v47, %v2740_v55  ;;  %v2746_v17 = vmul.f32 %v2745_v51, %v2668_v53  ;;  %v2747_v42 = vmul.f32 %v2745_v51, %v2669_v52  ;;  %v2748_v34 = vmul.f32 %v2745_v51, %v2670_v9  ;;  %v4276_v9 = vld [vmem:[%s5469_s5 + $0x4] ss:$8 sps:$4 sm:$0xff]  }
 0x495   :  { %v2749_v45 = vmul.f32 %v2745_v51, %v2671_v21  ;;  %v2750_v10 = vmul.f32 %v2745_v51, %v2672_v49  ;;  %v2751_v3 = vmul.f32 %v2745_v51, %v2673_v63  ;;  %3340 = vmatprep.subr.bf16.mxu0 %v4276_v9  ;;  %v4288_v63 = vld [vmem:[%s5469_s5 + $0x44] ss:$8 sps:$4 sm:$0xff]  }
 0x496   :  { %v2755_v50 = vrot.slane %v2741_v54, %v4964_v32  ;;  %v4274_v54 = vld [vmem:[%s5469_s5] ss:$8 sps:$4 sm:$0xff]  }
 0x497   :  { %3341 = vmatpush1.bf16.msra.mxu0 %v4274_v54 }
 0x498   :  { %v2756_v5 = vadd.f32 %v2755_v50, %v2746_v17  ;;  %v2757_v26 = vadd.f32 %v2755_v50, %v2747_v42  ;;  %v2758_v56 = vadd.f32 %v2755_v50, %v2748_v34  ;;  %v2759_v58 = vadd.f32 %v2755_v50, %v2749_v45  ;;  %v4279_v17 = vld [vmem:[%s5469_s5 + $0x14] ss:$8 sps:$4 sm:$0xff]   ;;  %v4282_v42 = vld [vmem:[%s5469_s5 + $0x24] ss:$8 sps:$4 sm:$0xff]   ;;  %v4280_v34 = vld [vmem:[%s5469_s5 + $0x20] ss:$8 sps:$4 sm:$0xff]  }
 0x499   :  { %v2760_v11 = vadd.f32 %v2755_v50, %v2750_v10  ;;  %v2761_v23 = vadd.f32 %v2755_v50, %v2751_v3  ;;  %3342 = vmatprep.subr.bf16.mxu0 %v4279_v17  ;;  %v4285_v45 = vld [vmem:[%s5469_s5 + $0x34] ss:$8 sps:$4 sm:$0xff]   ;;  %v4283_v50 = vld [vmem:[%s5469_s5 + $0x30] ss:$8 sps:$4 sm:$0xff]   ;;  %v4286_v10 = vld [vmem:[%s5469_s5 + $0x40] ss:$8 sps:$4 sm:$0xff]  }
 0x49a   :  { %v2762_v15 = vmax.f32 %v2756_v5, 0.0  ;;  %v2763_v19 = vmax.f32 %v2757_v26, 0.0  ;;  %v2764_v29 = vmax.f32 %v2758_v56, 0.0  ;;  %v2765_v0 = vmax.f32 %v2759_v58, 0.0  ;;  %v4291_v3 = vld [vmem:[%s5469_s5 + $0x54] ss:$8 sps:$4 sm:$0xff]  }
 0x49b   :  { %v2766_v60 = vmax.f32 %v2760_v11, 0.0  ;;  %v2767_v53 = vmax.f32 %v2761_v23, 0.0  ;;  %v4289_v5 = vld [vmem:[%s5469_s5 + $0x50] ss:$8 sps:$4 sm:$0xff]   ;;  %v4294_v26 = vld [vmem:[%s5469_s5 + $0x64] ss:$8 sps:$4 sm:$0xff]  }
 0x49c   :  { %2768 = vst.msk [vmem:[#allocation7] sm:$0xff] %vm2568_vm0, %v2762_v15  ;;  %2769 = vst.msk [vmem:[#allocation7 + $0x8] sm:$0xff] %vm2568_vm0, %v2763_v19  ;;  %v4292_v56 = vld [vmem:[%s5469_s5 + $0x60] ss:$8 sps:$4 sm:$0xff]   ;;  %v4297_v58 = vld [vmem:[%s5469_s5 + $0x74] ss:$8 sps:$4 sm:$0xff]  }
 0x49d   :  { %2770 = vst.msk [vmem:[#allocation7 + $0x10] sm:$0xff] %vm2568_vm0, %v2764_v29  ;;  %2771 = vst.msk [vmem:[#allocation7 + $0x18] sm:$0xff] %vm2568_vm0, %v2765_v0  ;;  %v4295_v11 = vld [vmem:[%s5469_s5 + $0x70] ss:$8 sps:$4 sm:$0xff]   ;;  %v4300_v23 = vld [vmem:[%s5469_s5 + $0x84] ss:$8 sps:$4 sm:$0xff]  }
 0x49e   :  { %2772 = vst.msk [vmem:[#allocation7 + $0x20] sm:$0xff] %vm2568_vm0, %v2766_v60  ;;  %2773 = vst.msk [vmem:[#allocation7 + $0x28] sm:$0xff] %vm2568_vm0, %v2767_v53  ;;  %v4298_v15 = vld [vmem:[%s5469_s5 + $0x80] ss:$8 sps:$4 sm:$0xff]   ;;  %v4303_v19 = vld [vmem:[%s5469_s5 + $0x94] ss:$8 sps:$4 sm:$0xff]  }
 0x49f   :  { %v4301_v29 = vld [vmem:[%s5469_s5 + $0x90] ss:$8 sps:$4 sm:$0xff]   ;;  %v4306_v0 = vld [vmem:[%s5469_s5 + $0xa4] ss:$8 sps:$4 sm:$0xff]   ;;  %v4304_v60 = vld [vmem:[%s5469_s5 + $0xa0] ss:$8 sps:$4 sm:$0xff]  }
 0x4a0   :  { %v4309_v53 = vld [vmem:[%s5469_s5 + $0xb4] ss:$8 sps:$4 sm:$0xff]  }
 0x4a3   :  { %v2783_v21 = vld [vmem:[#allocation7 + $0x8] sm:$0xff]  ;;  %v2782_v16 = vld [vmem:[#allocation7] sm:$0xff] }
 0x4a4   :  { %v2803_v52 = vld [vmem:[#allocation7 + $0x18] sm:$0xff]  ;;  %v3842_v30 = vpack.c.bf16 %v2783_v21, %v2783_v21  ;;  %v3841_v49 = vpack.c.bf16 %v2782_v16, %v2782_v16  ;;  %v4312_v21 = vld [vmem:[%s5469_s5 + $0xc4] ss:$8 sps:$4 sm:$0xff]   ;;  %v4310_v16 = vld [vmem:[%s5469_s5 + $0xc0] ss:$8 sps:$4 sm:$0xff]  }
 0x4a5   :  { %v2804_v40 = vld [vmem:[#allocation7 + $0x20] sm:$0xff]  ;;  %v3843_v1 = vpack.c.bf16 %v2803_v52, %v2803_v52  ;;  %v4307_v52 = vld [vmem:[%s5469_s5 + $0xb0] ss:$8 sps:$4 sm:$0xff]  }
 0x4a6   :  { %v3844_v39 = vpack.c.bf16 %v2804_v40, %v2804_v40  ;;  %v2794_v35 = vrot.slane %v3842_v30, 7  ;;  %v2792_v22 = vrot.slane %v3841_v49, 7  ;;  %v4315_v40 = vld [vmem:[%s5469_s5 + $0xd4] ss:$8 sps:$4 sm:$0xff]   ;;  %v4318_v30 = vld [vmem:[%s5469_s5 + $0xe4] ss:$8 sps:$4 sm:$0xff]  }
 0x4a7   :  { %v2811_v13 = vrot.slane %v3843_v1, 7  ;;  %v4313_v1 = vld [vmem:[%s5469_s5 + $0xd0] ss:$8 sps:$4 sm:$0xff]   ;;  %v4316_v49 = vld [vmem:[%s5469_s5 + $0xe0] ss:$8 sps:$4 sm:$0xff]  }
 0x4a8   :  { %v2813_v43 = vrot.slane %v3844_v39, 7  ;;  %v2796_v4 = vrot.slane %v2794_v35, 4  ;;  %v2793_v28 = vrot.slane %v2792_v22, 4  ;;  %2800 = vst.msk [vmem:[#allocation8] sm:$0xe] %vm2778_vm4, %v2792_v22 }
 0x4a9   :  { %v2812_v27 = vrot.slane %v2811_v13, 4  ;;  %2819 = vst.msk [vmem:[#allocation8 + $0xc] sm:$0xe] %vm2778_vm4, %v2811_v13  ;;  %v4321_v39 = vld [vmem:[%s5469_s5 + $0xf4] ss:$8 sps:$4 sm:$0xff]  }
 0x4aa   :  { %v2815_v41 = vrot.slane %v2813_v43, 4  ;;  %2802 = vst.msk [vmem:[#allocation8 + $0x8] sm:$0x1] %vm2776_vm3, %v2796_v4  ;;  %v2795_v6 = vsel %vm2791_vm6, %v2793_v28, %v2794_v35  ;;  %v4319_v13 = vld [vmem:[%s5469_s5 + $0xf0] ss:$8 sps:$4 sm:$0xff]  }
 0x4ab   :  { %v2814_v37 = vsel %vm2791_vm6, %v2812_v27, %v2813_v43  ;;  %2801 = vst.msk [vmem:[#allocation8 + $0x4] sm:$0xf] %vm2774_vm2, %v2795_v6 }
 0x4ac   :  { %2820 = vst.msk [vmem:[#allocation8 + $0x10] sm:$0xf] %vm2774_vm2, %v2814_v37 }
 0x4ad   :  { %2821 = vst.msk [vmem:[#allocation8 + $0x14] sm:$0x1] %vm2776_vm3, %v2815_v41 }
 0x4af   :  { %v2830_v33 = vld [vmem:[#allocation8] sm:$0xc] }
 0x4b0   :  { %v2824_v61 = vld [vmem:[#allocation8] sm:$0xf] }
 0x4b1   :  { %v4261_v48 = vld [vmem:[#allocation8 + $0x8] sm:$0xff]  }
 0x4b2   :  { %v2855_v36 = vrot.slane %v4261_v48, 2  ;;  %v2825_v31 = vld [vmem:[#allocation8 + $0x4] sm:$0xf] }
 0x4b3   :  { %v3778_v24 = vcombine.low %v2830_v33, %v2825_v31  ;;  %v3775_v20 = vcombine.low %v2824_v61, %v2825_v31 }
 0x4b4   :  { %v4262_v8 = vld [vmem:[#allocation8 + $0x10] sm:$0xff]  }
 0x4b5   :  { %v2857_v57 = vrot.slane %v4262_v8, 2  ;;  %v2854_v44 = vrot.slane %v3778_v24, 2 }
 0x4b7   :  { %v2858_v7 = vsel %vm2853_vm1, %v2855_v36, %v2857_v57  ;;  %v2856_v2 = vsel %vm2853_vm1, %v2854_v44, %v2855_v36  ;;  %v2860_v12 = vsel %vm2853_vm1, %v2857_v57, %v2859_v18 }
 0x4b8   :  { %2863 = vrot.lane.b32.xlu0 %v2858_v7, %s4367_s8  ;;  %2861 = vrot.lane.b32.xlu1 %v2856_v2, %s4367_s8 }
 0x4bc   :  { %2865 = vrot.lane.b32.xlu1 %v2860_v12, %s4367_s8 }
 0x52a   :  { %v2862_v25 = vpop.permute.xlu1 %2861  ;;  %v2864_v14 = vpop.permute.xlu0 %2863 }
 0x52b   :  { %v2869_v46 = vsel %vm2568_vm0, %v3775_v20, %v2862_v25  ;;  %v2873_v47 = vsel %vm2568_vm0, %v4261_v48, %v2864_v14 }
 0x52c   :  { %4149 = vmatmul.mubr.bf16.vlgmr.msra.gmra.mrb[64].mxu1 %v2869_v46 }
 0x52d   :  { %4152 = vmatprep.mubr.msk.bf16.mxu1 %vm4365_vm15, %v4364_v38 }
 0x52e   :  { %v2866_v55 = vpop.permute.xlu1 %2865 }
 0x52f   :  { %v2877_v51 = vsel %vm2568_vm0, %v4262_v8, %v2866_v55 }
 0x534   :  { %4153 = vmatmul.mubr.bf16.gmra.mrb[68].mxu1 %v2873_v47 }
 0x535   :  { %4156 = vmatprep.mubr.msk.bf16.mxu1 %vm4365_vm15, %v4364_v38  ;;  %v4277_v38 = vld [vmem:[%s5469_s5 + $0x10] ss:$8 sps:$4 sm:$0xff]  }
 0x536   :  { %3343 = vmatpush1.bf16.msra.mxu0 %v4277_v38 }
 0x537   :  { %3344 = vmatprep.subr.bf16.mxu0 %v4282_v42 }
 0x53a   :  { %3345 = vmatpush1.bf16.msra.mxu0 %v4280_v34 }
 0x53b   :  { %3346 = vmatprep.subr.bf16.mxu0 %v4285_v45 }
 0x53c   :  { %4157 = vmatmul.mubr.bf16.gmra.mrb[72].mxu1 %v2877_v51 }
 0x53e   :  { %3347 = vmatpush1.bf16.msra.mxu0 %v4283_v50 }
 0x53f   :  { %3348 = vmatprep.subr.bf16.mxu0 %v4288_v63 }
 0x542   :  { %3349 = vmatpush1.bf16.msra.mxu0 %v4286_v10 }
 0x543   :  { %3350 = vmatprep.subr.bf16.mxu0 %v4291_v3  ;;  %v2822_v3 = vld [vmem:[%s5473_s9] sm:$0x1] }
 0x546   :  { %3351 = vmatpush1.bf16.msra.mxu0 %v4289_v5 }
 0x547   :  { %3352 = vmatprep.subr.bf16.mxu0 %v4294_v26 }
 0x54a   :  { %3353 = vmatpush1.bf16.msra.mxu0 %v4292_v56  ;;  %v2823_v56 = vld [vmem:[%s5473_s9 + $0x1] sm:$0x1] }
 0x54b   :  { %3354 = vmatprep.subr.bf16.mxu0 %v4297_v58 }
 0x54e   :  { %3355 = vmatpush1.bf16.msra.mxu0 %v4295_v11 }
 0x54f   :  { %3356 = vmatprep.subr.bf16.mxu0 %v4300_v23 }
 0x552   :  { %3357 = vmatpush1.bf16.msra.mxu0 %v4298_v15 }
 0x553   :  { %3358 = vmatprep.subr.bf16.mxu0 %v4303_v19 }
 0x556   :  { %3359 = vmatpush1.bf16.msra.mxu0 %v4301_v29 }
 0x557   :  { %3360 = vmatprep.subr.bf16.mxu0 %v4306_v0 }
 0x55a   :  { %3361 = vmatpush1.bf16.msra.mxu0 %v4304_v60 }
 0x55b   :  { %3362 = vmatprep.subr.bf16.mxu0 %v4309_v53 }
 0x55e   :  { %3363 = vmatpush1.bf16.msra.mxu0 %v4307_v52 }
 0x55f   :  { %3364 = vmatprep.subr.bf16.mxu0 %v4312_v21 }
 0x562   :  { %3365 = vmatpush1.bf16.msra.mxu0 %v4310_v16 }
 0x563   :  { %3366 = vmatprep.subr.bf16.mxu0 %v4315_v40 }
 0x566   :  { %3367 = vmatpush1.bf16.msra.mxu0 %v4313_v1 }
 0x567   :  { %3368 = vmatprep.subr.bf16.mxu0 %v4318_v30 }
 0x56a   :  { %3369 = vmatpush1.bf16.msra.mxu0 %v4316_v49 }
 0x56b   :  { %3370 = vmatprep.subr.bf16.mxu0 %v4321_v39 }
 0x56e   :  { %3371 = vmatpush1.bf16.msra.mxu0 %v4319_v13 }
 0x5ff   :  { %v2977_v35 = vpop.f32.mrb[64].mxu1 }
 0x600   :  { %v4150_v22 = vpop.f32.mrb[65].mxu1  ;;  %v3029_v27 = vmul.f32 %v2977_v35, %v2977_v35 }
 0x601   :  { %v2980_v43 = vpop.f32.mrb[66].mxu1 }
 0x602   :  { %v3018_v4 = vadd.f32 %v2980_v43, %v2977_v35  ;;  %v3030_v28 = vmul.f32 %v2980_v43, %v2980_v43  ;;  %v4151_v41 = vpop.f32.mrb[67].mxu1 }
 0x604   :  { %v3035_v37 = vadd.f32 %v3030_v28, %v3029_v27 }
 0x607   :  { %v2985_v6 = vpop.f32.mrb[68].mxu1 }
 0x608   :  { %v4154_v48 = vpop.f32.mrb[69].mxu1 }
 0x609   :  { %v2988_v8 = vpop.f32.mrb[70].mxu1 }
 0x60a   :  { %v3020_v36 = vadd.f32 %v3018_v4, %v2988_v8  ;;  %v3032_v31 = vmul.f32 %v2988_v8, %v2988_v8  ;;  %v4155_v33 = vpop.f32.mrb[71].mxu1 }
 0x60c   :  { %v3037_v57 = vadd.f32 %v3035_v37, %v3032_v31 }
 0x60f   :  { %v2993_v24 = vpop.f32.mrb[72].mxu1 }
 0x610   :  { %v3021_v62 = vadd.f32 %v3020_v36, %v2993_v24  ;;  %v3033_v7 = vmul.f32 %v2993_v24, %v2993_v24  ;;  %v4158_v44 = vpop.f32.mrb[73].mxu1 }
 0x611   :  { %v2996_v2 = vpop.f32.mrb[74].mxu1 }
 0x612   :  { %v3023_v18 = vrot.slane %v3021_v62, 4  ;;  %v3038_v12 = vadd.f32 %v3037_v57, %v3033_v7  ;;  %v4159_v61 = vpop.f32.mrb[75].mxu1 }
 0x614   :  { %v3024_v20 = vadd.f32 %v3023_v18, %v3021_v62  ;;  %v3040_v25 = vrot.slane %v3038_v12, 4 }
 0x616   :  { %v3025_v46 = vrot.slane %v3024_v20, 2  ;;  %v3041_v14 = vadd.f32 %v3040_v25, %v3038_v12 }
 0x618   :  { %v3026_v47 = vadd.f32 %v3025_v46, %v3024_v20  ;;  %v3042_v55 = vrot.slane %v3041_v14, 2 }
 0x61a   :  { %v3027_v51 = vrot.slane %v3026_v47, 1  ;;  %v3043_v54 = vadd.f32 %v3042_v55, %v3041_v14 }
 0x61c   :  { %v3028_v9 = vadd.f32 %v3027_v51, %v3026_v47  ;;  %v3044_v17 = vrot.slane %v3043_v54, 1 }
 0x61e   :  { %v3045_v38 = vadd.f32 %v3044_v17, %v3043_v54  ;;  %v3046_v42 = vmul.f32 0.03125, %v3028_v9 }
 0x620   :  { %v3047_v34 = vmul.f32 0.03125, %v3045_v38  ;;  %v3048_v45 = vmul.f32 %v3046_v42, %v3046_v42 }
 0x622   :  { %v3049_v50 = vsub.f32 %v3047_v34, %v3048_v45 }
 0x624   :  { %v3050_v63 = vmax.f32 %v3049_v50, 0.0 }
 0x626   :  { %v3051_v10 = vadd.f32 1e-05, %v3050_v63 }
 0x628   :  { %4332 = vrsqrt.f32 %v3051_v10 }
 0x632   :  { %v4333_v5 = vpop.eup %4332 }
 0x633   :  { %v3053_v26 = vmul.f32 %v4333_v5, %v2822_v3 }
 0x635   :  { %v3054_v58 = vmul.f32 %v3053_v26, %v3046_v42  ;;  %v3059_v11 = vrot.slane %v3053_v26, %v4964_v32 }
 0x637   :  { %v3055_v23 = vsub.f32 %v2823_v56, %v3054_v58  ;;  %v3060_v15 = vmul.f32 %v3059_v11, %v2977_v35  ;;  %v3061_v19 = vmul.f32 %v3059_v11, %v2980_v43  ;;  %v3063_v29 = vmul.f32 %v3059_v11, %v2988_v8 }
 0x638   :  { %v3064_v0 = vmul.f32 %v3059_v11, %v2993_v24 }
 0x639   :  { %v3069_v60 = vrot.slane %v3055_v23, %v4964_v32 }
 0x63b   :  { %v3070_v53 = vadd.f32 %v3069_v60, %v3060_v15  ;;  %v3071_v52 = vadd.f32 %v3069_v60, %v3061_v19  ;;  %v3073_v21 = vadd.f32 %v3069_v60, %v3063_v29  ;;  %v3074_v16 = vadd.f32 %v3069_v60, %v3064_v0 }
 0x63d   :  { %v3076_v40 = vmax.f32 %v3070_v53, 0.0  ;;  %v3077_v1 = vmax.f32 %v3071_v52, 0.0  ;;  %v3079_v30 = vmax.f32 %v3073_v21, 0.0  ;;  %v3080_v49 = vmax.f32 %v3074_v16, 0.0 }
 0x63f   :  { %v3852_v39 = vpack.c.bf16 %v3077_v1, %v3076_v40  ;;  %v3857_v13 = vpack.c.bf16 %v3080_v49, %v3079_v30  ;;  %v4368_v40 = vmov 1966171168  }
 0x640   :  { %v3507_v1 = vunpack.c.l.s4 %v4368_v40 }
 0x641   :  { %3853 = vst [vmem:[#allocation10] sm:$0xff] %v3852_v39   ;;  %3859 = vst [vmem:[#allocation10 + $0x8] sm:$0xff] %v3857_v13  }
 0x642   :  { %v3508_v30 = vunpack.c.0.s8 %v3507_v1 }
 0x644   :  { %v3511_v39 = vsub.s32 %v3508_v30, %v4958_v59 }
 0x648   :  { %v4322_v22 = vld [vmem:[#allocation10 + $0x4] sm:$0xff]   ;;  %v4324_v35 = vld [vmem:[#allocation10 + $0xc] sm:$0xff]  }
 0x649   :  { %v4323_v27 = vld [vmem:[#allocation10] sm:$0xff]   ;;  %3372 = vmatprep.mubr.bf16.mxu0 %v4322_v22  ;;  %v4325_v43 = vld [vmem:[#allocation10 + $0x8] sm:$0xff]  }
 0x64a   :  { %3373 = vmatmul.mubr.bf16.vlgmr.msra.gmra.mrb[72].mxu0 %v4323_v27 }
 0x64b   :  { %3382 = vmatprep.mubr.bf16.mxu0 %v4324_v35  ;;  %v3113_v35 = vld [vmem:[%s5474_s10] ss:$2 sm:$0x3] }
 0x652   :  { %3383 = vmatmul.mubr.bf16.gmra.mrb[76].mxu0 %v4325_v43 }
 0x71d   :  { %v5418_v4 = vpop.f32.mrb[72].mxu0 }
 0x71e   :  { %v5420_v28 = vpop.f32.mrb[73].mxu0  ;;  %v3463_v48 = vmul.f32 %v5418_v4, %v5418_v4 }
 0x71f   :  { %v3378_v41 = vpop.f32.mrb[74].mxu0  ;;  %v3464_v33 = vmul.f32 %v5420_v28, %v5420_v28 }
 0x720   :  { %v3380_v37 = vpop.f32.mrb[75].mxu0  ;;  %v3529_v41 = vsub.s32 1, %v4958_v59  ;;  %v3792_v59 = vld [vmem:[%s5474_s10 + $0x1] ss:$2 sm:$0x3]  ;;  %s4339_s10 = scalar_lea.vmem %s3612_s24, 512 }
 0x721   :  { %p4340_p0 = scmp.ne.s32.totalorder %s3612_s24, %s4339_s10  ;;  %p4345_p2 = scmp.lt.s32.totalorder %s4339_s10, %s4339_s10 }
 0x723   :  { %p4346_p3 = por %p4345_p2, %p4344_p1 }
 0x725   :  { %v5422_v6 = vpop.f32.mrb[76].mxu0  ;;  %p4347_p4 = pnand %p4346_p3, %p4340_p0 }
 0x726   :  { %v3446_v8 = vadd.f32 %v5422_v6, %v5418_v4  ;;  %v3467_v36 = vmul.f32 %v5422_v6, %v5422_v6  ;;  %v5430_v31 = vpop.f32.mrb[77].mxu0 }
 0x727   :  { %v3455_v57 = vadd.f32 %v5430_v31, %v5420_v28  ;;  %v3468_v24 = vmul.f32 %v5430_v31, %v5430_v31  ;;  %v3388_v62 = vpop.f32.mrb[78].mxu0 }
 0x728   :  { %v3448_v7 = vrot.slane %v3446_v8, 4  ;;  %v3472_v44 = vadd.f32 %v3467_v36, %v3463_v48  ;;  %v3390_v2 = vpop.f32.mrb[79].mxu0 }
 0x729   :  { %v3457_v18 = vrot.slane %v3455_v57, 4  ;;  %v3481_v12 = vadd.f32 %v3468_v24, %v3464_v33 }
 0x72a   :  { %v3449_v61 = vadd.f32 %v3448_v7, %v3446_v8  ;;  %v3474_v20 = vrot.slane %v3472_v44, 4 }
 0x72b   :  { %v3458_v25 = vadd.f32 %v3457_v18, %v3455_v57  ;;  %v3483_v46 = vrot.slane %v3481_v12, 4 }
 0x72c   :  { %v3450_v14 = vrot.slane %v3449_v61, 2  ;;  %v3475_v47 = vadd.f32 %v3474_v20, %v3472_v44 }
 0x72d   :  { %v3459_v55 = vrot.slane %v3458_v25, 2  ;;  %v3484_v51 = vadd.f32 %v3483_v46, %v3481_v12 }
 0x72e   :  { %v3451_v54 = vadd.f32 %v3450_v14, %v3449_v61  ;;  %v3476_v9 = vrot.slane %v3475_v47, 2 }
 0x72f   :  { %v3460_v17 = vadd.f32 %v3459_v55, %v3458_v25  ;;  %v3485_v38 = vrot.slane %v3484_v51, 2 }
 0x730   :  { %v3452_v42 = vrot.slane %v3451_v54, 1  ;;  %v3477_v34 = vadd.f32 %v3476_v9, %v3475_v47 }
 0x731   :  { %v3461_v45 = vrot.slane %v3460_v17, 1  ;;  %v3486_v50 = vadd.f32 %v3485_v38, %v3484_v51 }
 0x732   :  { %v3453_v63 = vadd.f32 %v3452_v42, %v3451_v54  ;;  %v3478_v10 = vrot.slane %v3477_v34, 1 }
 0x733   :  { %v3462_v3 = vadd.f32 %v3461_v45, %v3460_v17  ;;  %v3487_v5 = vrot.slane %v3486_v50, 1 }
 0x734   :  { %v3479_v26 = vadd.f32 %v3478_v10, %v3477_v34  ;;  %v3489_v56 = vmul.f32 0.0625, %v3453_v63 }
 0x735   :  { %v3488_v58 = vadd.f32 %v3487_v5, %v3486_v50  ;;  %v3490_v11 = vmul.f32 0.0625, %v3462_v3 }
 0x736   :  { %v3491_v23 = vmul.f32 0.0625, %v3479_v26  ;;  %v3493_v15 = vmul.f32 %v3489_v56, %v3489_v56 }
 0x737   :  { %v3492_v19 = vmul.f32 0.0625, %v3488_v58  ;;  %v3494_v29 = vmul.f32 %v3490_v11, %v3490_v11 }
 0x738   :  { %v3495_v0 = vsub.f32 %v3491_v23, %v3493_v15 }
 0x739   :  { %v3496_v60 = vsub.f32 %v3492_v19, %v3494_v29 }
 0x73a   :  { %v3497_v53 = vmax.f32 %v3495_v0, 0.0 }
 0x73b   :  { %v3498_v52 = vmax.f32 %v3496_v60, 0.0 }
 0x73c   :  { %v3499_v21 = vadd.f32 1e-05, %v3497_v53 }
 0x73d   :  { %v3500_v16 = vadd.f32 1e-05, %v3498_v52 }
 0x73e   :  { %4334 = vrsqrt.f32 %v3499_v21 }
 0x73f   :  { %4336 = vrsqrt.f32 %v3500_v16 }
 0x748   :  { %v4335_v49 = vpop.eup %4334 }
 0x749   :  { %v4337_v13 = vpop.eup %4336 }
 0x74a   :  { %v3505_v22 = vcombine.low %v4335_v49, %v4337_v13 }
 0x74c   :  { %v3512_v27 = vrot.slane %v3505_v22, %v3511_v39 }
 0x74e   :  { %v3519_v43 = vrot.slane %v3512_v27, %v3511_v39 }
 0x750   :  { %v3521_v37 = vmul.f32 %v3519_v43, %v3113_v35 }
 0x752   :  { %v3526_v48 = vrot.slane %v3521_v37, %v4964_v32  ;;  %v3530_v8 = vrot.slane %v3521_v37, %v3529_v41 }
 0x754   :  { %v3533_v36 = vmul.f32 %v3526_v48, %v3489_v56  ;;  %v3534_v33 = vmul.f32 %v3530_v8, %v3490_v11  ;;  %v3554_v57 = vmul.f32 %v3526_v48, %v5418_v4  ;;  %v3555_v24 = vmul.f32 %v3530_v8, %v5420_v28 }
 0x755   :  { %v3558_v62 = vmul.f32 %v3526_v48, %v5422_v6  ;;  %v3559_v7 = vmul.f32 %v3530_v8, %v5430_v31 }
 0x756   :  { %v3537_v44 = vcombine.low %v3533_v36, %v3534_v33 }
 0x758   :  { %v3544_v2 = vrot.slane %v3537_v44, %v3511_v39 }
 0x75a   :  { %v3551_v18 = vrot.slane %v3544_v2, %v3511_v39 }
 0x75c   :  { %v3553_v12 = vsub.f32 %v3792_v59, %v3551_v18 }
 0x75e   :  { %v3566_v61 = vrot.slane %v3553_v12, %v4964_v32  ;;  %v3570_v20 = vrot.slane %v3553_v12, %v3529_v41 }
 0x760   :  { %v3573_v4 = vadd.f32 %v3566_v61, %v3554_v57  ;;  %v3574_v25 = vadd.f32 %v3570_v20, %v3555_v24  ;;  %v3577_v28 = vadd.f32 %v3566_v61, %v3558_v62  ;;  %v3578_v46 = vadd.f32 %v3570_v20, %v3559_v7 }
 0x762   :  { %v3581_v6 = vmax.f32 %v3573_v4, 0.0  ;;  %v3582_v14 = vmax.f32 %v3574_v25, 0.0  ;;  %v3585_v31 = vmax.f32 %v3577_v28, 0.0  ;;  %v3586_v47 = vmax.f32 %v3578_v46, 0.0 }
 0x764   :  { %3599 = vst [vmem:[#allocation12] sm:$0xff] %v3581_v6  ;;  %3600 = vst [vmem:[#allocation12 + $0x8] sm:$0xff] %v3582_v14 }
 0x765   :  { %3604 = vst [vmem:[#allocation12 + $0x10] sm:$0xff] %v3585_v31  ;;  %3605 = vst [vmem:[#allocation12 + $0x18] sm:$0xff] %v3586_v47 }
 0x766   :  { %4350 = shalt.err (!%p4347_p4)
}
 0x767   :  { %s4351_s26 = scalar_lea.hbm %s5475_s11, 512 }
 0x768   :  { %p4352_p5 = scmp.ne.s32.totalorder %s5475_s11, %s4351_s26  ;;  %p4355_p6 = scmp.lt.u32.totalorder %s4351_s26, %s5475_s11 }
 0x76a   :  { %p4357_p7 = pnand %p4355_p6, %p4352_p5 }
 0x76c   :  { %4360 = shalt.err (!%p4357_p7)
}
 0x76d   :  { %s4370_s30 = smov 256   ;;  %s4371_s8 = smov 16  }
 0x76e   :  { %3617 = dma.vmem_to_hbm [thread:$0]  %s3612_s24, 512, %s5475_s11, [#allocation13], %s4370_s30, %s4370_s30, %s4371_s8  }
 0x76f   :  { %4361 = dma.done.wait [#allocation13], 512  }
 0x770   :  { %4362 = vsyncadd [#allocation13], 4294966784 }
 0x771   :  { %3621 = vsyncpa [#allocation13], 1 }

</bundles_post_ra>
